<compile_context>
chip_gen: v7x
topology: tpu7x:2x2x1
jax: 0.10.0
libtpu: 0.0.40
codegen_flags: <defaults>
</compile_context>

<pallas_src>
import jax
import jax.numpy as jnp
from jax.experimental import pallas as pl
from jax.experimental.pallas import tpu as pltpu


def _head_kernel(pooled_ref, w1_ref, wfc_ref, bias_ref, out_ref):
    # pooled_ref: (N, C_in)          bf16  -- globally pooled backbone features
    # w1_ref:     (C_in, C_out)      bf16  -- 1x1 conv weight (contiguous slab)
    # wfc_ref:    (C_out, class_pad) bf16  -- fc weight with BN scale folded into rows
    # bias_ref:   (1, class_pad)     f32   -- BN shift @ fc weight + fc bias (padded)
    # out_ref:    (N, class_pad)     f32   -- logits (lane-padded)

    # 1x1 conv over globally pooled features == channel matmul (MXU, f32 acc).
    feat = jnp.dot(pooled_ref[...], w1_ref[...], preferred_element_type=jnp.float32)
    # fc with BN scale pre-folded into the weight; shift+bias pre-folded into bias.
    logits = jnp.dot(feat.astype(jnp.bfloat16), wfc_ref[...],
                     preferred_element_type=jnp.float32)
    out_ref[...] = logits + bias_ref[...]


def resnet_head(feature_map, w1, bn_gamma, bn_beta, bn_mean, bn_var,
                w_fc_t, b_fc, *, eps=1e-5):
    """Eval-mode classification head: pool -> 1x1 conv -> BN (running stats) -> fc.

    feature_map: (N, C_in, H, W) NCHW backbone output
    w1:          (C_in, C_out)   1x1 conv weight (torch (C_out, C_in, 1, 1) transposed)
    w_fc_t:      (C_out, classNum)  (torch fc weight transposed)
    b_fc:        (classNum,)
    """
    n, c_in, h, w = feature_map.shape
    c_out = w1.shape[1]
    class_num = w_fc_t.shape[1]
    class_pad = ((class_num + 127) // 128) * 128   # lane-dense output width

    # AvgPool, 1x1 conv and eval-mode BN are all linear -> pool first.
    # Reduction over the contiguous trailing H, W dims of NCHW -- no transpose.
    pooled = jnp.mean(feature_map, axis=(2, 3)).astype(jnp.bfloat16)      # (N, C_in)
    w1_b = w1.astype(jnp.bfloat16)                                        # (C_in, C_out)

    # Fold eval-mode BatchNorm2d into per-channel scale/shift, then fold scale into
    # the fc weight rows and shift (+ fc bias) into one effective bias row.
    inv_std = 1.0 / jnp.sqrt(bn_var.astype(jnp.float32) + eps)
    scale = bn_gamma.astype(jnp.float32) * inv_std                        # (C_out,)
    shift = bn_beta.astype(jnp.float32) - bn_mean.astype(jnp.float32) * scale

    w_fc_pad = jnp.pad(w_fc_t.astype(jnp.float32),
                       ((0, 0), (0, class_pad - class_num)))              # (C_out, class_pad)
    wfc_scaled = (w_fc_pad * scale[:, None]).astype(jnp.bfloat16)         # (C_out, class_pad)
    b_fc_pad = jnp.pad(b_fc.astype(jnp.float32), (0, class_pad - class_num))
    bias_eff = shift[None, :] @ w_fc_pad + b_fc_pad[None, :]              # (1, class_pad)

    # TODO(synk): if the weights are static across many calls, the whole head can be
    # pre-folded offline into a single (C_in, class_pad) bf16 weight
    # W_eff = (w1 * scale) @ w_fc, cutting weight HBM traffic ~8x; kept as two dots
    # here so the fold cost is not paid on every call.

    logits_pad = pl.pallas_call(
        _head_kernel,
        out_shape=jax.ShapeDtypeStruct((n, class_pad), jnp.float32),
        grid=(1,),
        in_specs=[
            pl.BlockSpec((n, c_in), lambda i: (0, 0)),            # pooled features
            pl.BlockSpec((c_in, c_out), lambda i: (0, 0)),        # 1x1 conv weight
            pl.BlockSpec((c_out, class_pad), lambda i: (0, 0)),   # BN-folded fc weight
            pl.BlockSpec((1, class_pad), lambda i: (0, 0)),       # effective bias
        ],
        out_specs=pl.BlockSpec((n, class_pad), lambda i: (0, 0)),
        compiler_params=pltpu.CompilerParams(
            dimension_semantics=("arbitrary",),
            vmem_limit_bytes=32 << 20,   # ~8.5 MiB actually used; safe on v5e/v6e/v7x
        ),
    )(pooled, w1_b, wfc_scaled, bias_eff)

    # Drop the lane padding once at the end.
    return logits_pad[:, :class_num]


if __name__ == "__main__":
    # Small shapes consistent with the module: backbone output has 2048 channels,
    # changeChannel maps to imageFeatureDim=1024, fc maps 1024 -> classNum=80.
    N, H, W = 2, 4, 4
    C_IN, C_OUT, CLASS_NUM = 2048, 1024, 80

    key = jax.random.PRNGKey(0)
    k1, k2, k3, k4 = jax.random.split(key, 4)

    feature_map = jax.random.normal(k1, (N, C_IN, H, W), dtype=jnp.float32)

    # changeChannel: Conv2d(2048, 1024, kernel_size=1, bias=False)
    # torch weight shape (C_OUT, C_IN, 1, 1) -> pass as (C_IN, C_OUT)
    w_conv = jax.random.normal(k2, (C_OUT, C_IN), dtype=jnp.float32) * 0.02
    w1 = w_conv.T

    # BatchNorm2d(1024) default init / running stats (eval-mode semantics)
    bn_gamma = jnp.ones((C_OUT,), jnp.float32)
    bn_beta = jnp.zeros((C_OUT,), jnp.float32)
    bn_mean = jnp.zeros((C_OUT,), jnp.float32)
    bn_var = jnp.ones((C_OUT,), jnp.float32)

    # fc: Linear(1024, 80); torch weight (80, 1024) -> pass transposed
    w_fc_t = jax.random.normal(k3, (C_OUT, CLASS_NUM), dtype=jnp.float32) * 0.02
    b_fc = jax.random.normal(k4, (CLASS_NUM,), dtype=jnp.float32) * 0.02

    out = resnet_head(feature_map, w1, bn_gamma, bn_beta, bn_mean, bn_var,
                      w_fc_t, b_fc)
    out = jax.block_until_ready(out)

    # Pure-JAX f32 reference for the same computation (original op order:
    # conv -> BN -> pool -> fc).
    x2d = jnp.transpose(feature_map, (0, 2, 3, 1)).reshape(N * H * W, C_IN)
    feat = x2d @ w1
    feat = (feat - bn_mean) / jnp.sqrt(bn_var + 1e-5) * bn_gamma + bn_beta
    pooled_ref = feat.reshape(N, H * W, C_OUT).mean(axis=1)
    ref = pooled_ref @ w_fc_t + b_fc

    assert out.shape == (N, CLASS_NUM), out.shape
    # bf16 matmul operands (f32 accumulation) -> bf16-appropriate tolerance.
    assert jnp.allclose(out, ref, rtol=2e-2, atol=2e-2), float(jnp.max(jnp.abs(out - ref)))
    print("KERNEL_OK")
</pallas_src>

<mosaic_0001>
module attributes {stable_mosaic.version = 11 : i64} {
  func.func @_head_kernel(%arg0: i32, %arg1: memref<2x2048xbf16, #tpu.memory_space<vmem>>, %arg2: memref<2048x1024xbf16, #tpu.memory_space<vmem>>, %arg3: memref<1024x128xbf16, #tpu.memory_space<vmem>>, %arg4: memref<1x128xf32, #tpu.memory_space<vmem>>, %arg5: memref<2x128xf32, #tpu.memory_space<vmem>>) attributes {dimension_semantics = [#tpu.dimension_semantics<arbitrary>], iteration_bounds = array<i64: 1>, scalar_prefetch = 0 : i64, scratch_operands = 0 : i64, tpu.core_type = #tpu.core_type<tc>, window_params = [{pipeline_mode = #tpu.pipeline_mode<synchronous>, transform_indices = @transform_0, window_bounds = array<i64: 2, 2048>}, {pipeline_mode = #tpu.pipeline_mode<synchronous>, transform_indices = @transform_1, window_bounds = array<i64: 2048, 1024>}, {pipeline_mode = #tpu.pipeline_mode<synchronous>, transform_indices = @transform_2, window_bounds = array<i64: 1024, 128>}, {pipeline_mode = #tpu.pipeline_mode<synchronous>, transform_indices = @transform_3, window_bounds = array<i64: 1, 128>}, {pipeline_mode = #tpu.pipeline_mode<synchronous>, transform_indices = @transform_4, window_bounds = array<i64: 2, 128>}]} {
    %c0 = arith.constant 0 : index
    %c0_0 = arith.constant 0 : index
    %0 = vector.load %arg1[%c0, %c0_0] : memref<2x2048xbf16, #tpu.memory_space<vmem>>, vector<2x2048xbf16>
    %c0_1 = arith.constant 0 : index
    %c0_2 = arith.constant 0 : index
    %1 = vector.load %arg2[%c0_1, %c0_2] : memref<2048x1024xbf16, #tpu.memory_space<vmem>>, vector<2048x1024xbf16>
    %cst = arith.constant dense<0.000000e+00> : vector<2x1024xf32>
    %2 = tpu.matmul %0, %1, %cst {dimension_numbers = #tpu.dot_dimension_numbers<[1], [0], [0], [1], [0, 0, 1, 1], [], []>} : vector<2x2048xbf16>, vector<2048x1024xbf16>, vector<2x1024xf32> -> vector<2x1024xf32>
    %3 = arith.truncf %2 : vector<2x1024xf32> to vector<2x1024xbf16>
    %c0_3 = arith.constant 0 : index
    %c0_4 = arith.constant 0 : index
    %4 = vector.load %arg3[%c0_3, %c0_4] : memref<1024x128xbf16, #tpu.memory_space<vmem>>, vector<1024x128xbf16>
    %cst_5 = arith.constant dense<0.000000e+00> : vector<2x128xf32>
    %5 = tpu.matmul %3, %4, %cst_5 {dimension_numbers = #tpu.dot_dimension_numbers<[1], [0], [0], [1], [0, 0, 1, 1], [], []>} : vector<2x1024xbf16>, vector<1024x128xbf16>, vector<2x128xf32> -> vector<2x128xf32>
    %c0_6 = arith.constant 0 : index
    %c0_7 = arith.constant 0 : index
    %6 = vector.load %arg4[%c0_6, %c0_7] : memref<1x128xf32, #tpu.memory_space<vmem>>, vector<1x128xf32>
    %7 = vector.broadcast %6 : vector<1x128xf32> to vector<2x128xf32>
    %8 = arith.addf %5, %7 : vector<2x128xf32>
    %c0_8 = arith.constant 0 : index
    %c0_9 = arith.constant 0 : index
    %9 = vector.load %arg5[%c0_8, %c0_9] : memref<2x128xf32, #tpu.memory_space<vmem>>, vector<2x128xf32>
    tpu.vector_store %arg5[%c0_8, %c0_9], %8 {strides = array<i32>} : memref<2x128xf32, #tpu.memory_space<vmem>>, vector<2x128xf32>,
    return
  }
  func.func @transform_0(%arg0: i32) -> (i32, i32) {
    %c0_i32 = arith.constant 0 : i32
    %c0_i32_0 = arith.constant 0 : i32
    %c0_i32_1 = arith.constant 0 : i32
    return %c0_i32, %c0_i32_0 : i32, i32
  }
  func.func @transform_1(%arg0: i32) -> (i32, i32) {
    %c0_i32 = arith.constant 0 : i32
    %c0_i32_0 = arith.constant 0 : i32
    %c0_i32_1 = arith.constant 0 : i32
    return %c0_i32, %c0_i32_0 : i32, i32
  }
  func.func @transform_2(%arg0: i32) -> (i32, i32) {
    %c0_i32 = arith.constant 0 : i32
    %c0_i32_0 = arith.constant 0 : i32
    %c0_i32_1 = arith.constant 0 : i32
    return %c0_i32, %c0_i32_0 : i32, i32
  }
  func.func @transform_3(%arg0: i32) -> (i32, i32) {
    %c0_i32 = arith.constant 0 : i32
    %c0_i32_0 = arith.constant 0 : i32
    %c0_i32_1 = arith.constant 0 : i32
    return %c0_i32, %c0_i32_0 : i32, i32
  }
  func.func @transform_4(%arg0: i32) -> (i32, i32) {
    %c0_i32 = arith.constant 0 : i32
    %c0_i32_0 = arith.constant 0 : i32
    %c0_i32_1 = arith.constant 0 : i32
    return %c0_i32, %c0_i32_0 : i32, i32
  }
}

</mosaic_0001>

<bundles_post_ra>
// kernel: tpu_custom_call.1
= control target key start
LH: loop header
LB: loop body
LE: loop exit
PB: predicated region body
PF: predicated region fallthrough
CT: control target
= control target key end

     0   :  { %9 = vsyncpa [#allocation3], 0  ;;  %s10099_s0 = inlined_call_operand.hbm [shape: bf16[2,2048], index: 0, kind: input, shape index: {}]   ;;  %s10100_s1 = inlined_call_operand.hbm [shape: bf16[2048,1024], index: 1, kind: input, shape index: {}]   ;;  %s10101_s2 = inlined_call_operand.hbm [shape: bf16[1024,128], index: 2, kind: input, shape index: {}]   ;;  %s10102_s3 = inlined_call_operand.hbm [shape: f32[1,128], index: 3, kind: input, shape index: {}]   ;;  %s10103_s4 = inlined_call_operand.hbm [shape: f32[2,128], index: 4, kind: output, shape index: {}]  }
   0x1   :  { %10 = vsyncpa [#allocation6], 0 }
   0x2   :  { %11 = vsyncpa [#allocation9], 0 }
   0x3   :  { %12 = vsyncpa [#allocation4], 0  ;;  %s9832_s15 = smov [#allocation5]   ;;  %s9714_s19 = scalar_lea.hbm %s10100_s1, 131072 }
   0x4   :  { %s28_s16 = sshll.u32 %s9832_s15, 4  ;;  %p9715_p0 = scmp.ne.s32.totalorder %s10100_s1, %s9714_s19  ;;  %s29_s16 = int_to_ptr.vmem [resolvable:$true] %s28_s16 }
   0x5   :  { %p9718_p1 = scmp.lt.u32.totalorder %s9714_s19, %s10100_s1 }
   0x7   :  { %p9720_p2 = pnand %p9718_p1, %p9715_p0 }
   0x9   :  { %9723 = shalt.err (!%p9720_p2)
}
   0xa   :  { %s9724_s24 = scalar_lea.vmem %s29_s16, 131072  ;;  %p9729_p4 = scmp.lt.s32.totalorder %s29_s16, %s29_s16 }
   0xb   :  { %p9725_p3 = scmp.ne.s32.totalorder %s29_s16, %s9724_s24  ;;  %p9730_p5 = scmp.lt.s32.totalorder %s9724_s24, %s9724_s24 }
   0xd   :  { %p9731_p6 = por %p9730_p5, %p9729_p4 }
   0xf   :  { %p9732_p7 = pnand %p9731_p6, %p9725_p3 }
  0x11   :  { %9735 = shalt.err (!%p9732_p7)
}
  0x12   :  { %s9833_s25 = smov 512   ;;  %s9834_s26 = smov 32  }
  0x13   :  { %34 = dma.hbm_to_vmem [thread:$0]  %s10100_s1, 131072, %s29_s16, [#allocation6], %s9833_s25, %s9833_s25, %s9834_s26  }
  0x14   :  { %s9835_s29 = smov [#allocation2]   ;;  %s9836_s5 = smov [#allocation7]  }
  0x15   :  { %s19_s30 = sshll.u32 %s9835_s29, 4  ;;  %s40_s6 = sshll.u32 %s9836_s5, 4  ;;  %s20_s30 = int_to_ptr.vmem [resolvable:$true] %s19_s30  ;;  %s41_s6 = int_to_ptr.vmem [resolvable:$true] %s40_s6 }
  0x16   :  { %s9736_s9 = scalar_lea.hbm %s10099_s0, 256 }
  0x17   :  { %p9737_p8 = scmp.ne.s32.totalorder %s10099_s0, %s9736_s9  ;;  %p9740_p9 = scmp.lt.u32.totalorder %s9736_s9, %s10099_s0 }
  0x19   :  { %p9742_p10 = pnand %p9740_p9, %p9737_p8 }
  0x1b   :  { %9745 = shalt.err (!%p9742_p10)
}
  0x1c   :  { %s9746_s1 = scalar_lea.vmem %s20_s30, 256  ;;  %p9751_p12 = scmp.lt.s32.totalorder %s20_s30, %s20_s30 }
  0x1d   :  { %p9747_p11 = scmp.ne.s32.totalorder %s20_s30, %s9746_s1  ;;  %p9752_p13 = scmp.lt.s32.totalorder %s9746_s1, %s9746_s1 }
  0x1f   :  { %p9753_p0 = por %p9752_p13, %p9751_p12 }
  0x21   :  { %p9754_p1 = pnand %p9753_p0, %p9747_p11 }
  0x23   :  { %9757 = shalt.err (!%p9754_p1)
}
  0x24   :  { %22 = dma.hbm_to_vmem [thread:$0]  %s10099_s0, 256, %s20_s30, [#allocation3]  }
  0x25   :  { %s9758_s18 = scalar_lea.hbm %s10101_s2, 8192 }
  0x26   :  { %p9759_p2 = scmp.ne.s32.totalorder %s10101_s2, %s9758_s18  ;;  %p9762_p3 = scmp.lt.u32.totalorder %s9758_s18, %s10101_s2 }
  0x28   :  { %p9764_p4 = pnand %p9762_p3, %p9759_p2 }
  0x2a   :  { %9767 = shalt.err (!%p9764_p4)
}
  0x2b   :  { %s9768_s23 = scalar_lea.vmem %s41_s6, 8192  ;;  %p9773_p6 = scmp.lt.s32.totalorder %s41_s6, %s41_s6 }
  0x2c   :  { %p9769_p5 = scmp.ne.s32.totalorder %s41_s6, %s9768_s23  ;;  %p9774_p7 = scmp.lt.s32.totalorder %s9768_s23, %s9768_s23 }
  0x2e   :  { %p9775_p8 = por %p9774_p7, %p9773_p6 }
  0x30   :  { %p9776_p9 = pnand %p9775_p8, %p9769_p5 }
  0x32   :  { %9779 = shalt.err (!%p9776_p9)
}
  0x33   :  { %s9837_s0 = smov 64   ;;  %s9838_s24 = smov 4  }
  0x34   :  { %46 = dma.hbm_to_vmem [thread:$0]  %s10101_s2, 8192, %s41_s6, [#allocation6], %s9837_s0, %s9837_s0, %s9838_s24  }
  0x35   :  { %s9839_s27 = smov [#allocation8]   ;;  %s9780_s5 = scalar_lea.hbm %s10102_s3, 16 }
  0x36   :  { %s53_s28 = sshll.u32 %s9839_s27, 4  ;;  %p9781_p10 = scmp.ne.s32.totalorder %s10102_s3, %s9780_s5  ;;  %s54_s28 = int_to_ptr.vmem [resolvable:$true] %s53_s28 }
  0x37   :  { %p9784_p11 = scmp.lt.u32.totalorder %s9780_s5, %s10102_s3 }
  0x39   :  { %p9786_p12 = pnand %p9784_p11, %p9781_p10 }
  0x3b   :  { %9789 = shalt.err (!%p9786_p12)
}
  0x3c   :  { %s9790_s11 = scalar_lea.vmem %s54_s28, 16  ;;  %s9794_s2 = scalar_lea.vmem %s54_s28, 32 }
  0x3d   :  { %p9791_p13 = scmp.ne.s32.totalorder %s54_s28, %s9790_s11  ;;  %p9795_p0 = scmp.lt.s32.totalorder %s54_s28, %s54_s28 }
  0x3e   :  { %p9796_p1 = scmp.lt.s32.totalorder %s9794_s2, %s9790_s11 }
  0x40   :  { %p9797_p2 = por %p9796_p1, %p9795_p0 }
  0x42   :  { %p9798_p3 = pnand %p9797_p2, %p9791_p13 }
  0x44   :  { %9801 = shalt.err (!%p9798_p3)
}
  0x45   :  { %56 = dma.hbm_to_vmem [thread:$0]  %s10102_s3, 16, %s54_s28, [#allocation9]  }
  0x46   :  { %9824 = dma.done.wait [#allocation3], 256  }
  0x47   :  { %9825 = vsyncadd [#allocation3], 4294967040 }
  0x48   :  { %9826 = dma.done.wait [#allocation6], 139264  }
  0x49   :  { %9827 = vsyncadd [#allocation6], 4294828032 }
  0x4a   :  { %9828 = dma.done.wait [#allocation9], 16  }
  0x4b   :  { %9829 = vsyncadd [#allocation9], 4294967280  ;;  %v72_v0 = vld [vmem:[#allocation5] sm:$0xff]  ;;  %v73_v2 = vld [vmem:[#allocation5 + $0x8] sm:$0xff]  ;;  %v9840_v32 = vmov 1966171168   ;;  %v1102_v34 = vlaneseq }
  0x4c   :  { %v76_v1 = vld [vmem:[#allocation5 + $0x20] sm:$0xff]  ;;  %v77_v4 = vld [vmem:[#allocation5 + $0x28] sm:$0xff]  ;;  %v1100_v33 = vunpack.c.l.s4 %v9840_v32  ;;  %v9917_v59 = vld [vmem:[#allocation2] sm:$0xff]  ;;  %s9841_s3 = smov [#allocation10]  }
  0x4d   :  { %v8350_v3 = vcombine.high %v72_v0, %v76_v1  ;;  %v8349_v5 = vcombine.low %v72_v0, %v76_v1  ;;  %v80_v6 = vld [vmem:[#allocation5 + $0x40] sm:$0xff]  ;;  %v8352_v8 = vcombine.high %v73_v2, %v77_v4  ;;  %v8351_v9 = vcombine.low %v73_v2, %v77_v4  ;;  %v81_v11 = vld [vmem:[#allocation5 + $0x48] sm:$0xff]  ;;  %s8338_s13 = sshll.u32 %s9841_s3, 4  ;;  %s8339_s13 = int_to_ptr.vmem [resolvable:$true] %s8338_s13 }
  0x4e   :  { %v84_v7 = vld [vmem:[#allocation5 + $0x60] sm:$0xff]  ;;  %v85_v12 = vld [vmem:[#allocation5 + $0x68] sm:$0xff]  ;;  %v1101_v43 = vunpack.c.0.s8 %v1100_v33  ;;  %v1103_v44 = vshrl.u32 %v1102_v34, 7  ;;  %s9802_s1 = scalar_lea.vmem %s8339_s13, 32  ;;  %p9807_p5 = scmp.lt.s32.totalorder %s8339_s13, %s8339_s13 }
  0x4f   :  { %v8358_v10 = vcombine.high %v80_v6, %v84_v7  ;;  %v88_v13 = vld [vmem:[#allocation5 + $0x80] sm:$0xff]  ;;  %6332 = vmatprep.subr.bf16.mxu0 %v8350_v3  ;;  %v8360_v14 = vcombine.high %v81_v11, %v85_v12  ;;  %v89_v16 = vld [vmem:[#allocation5 + $0x88] sm:$0xff]  ;;  %6660 = vmatprep.subr.bf16.mxu1 %v8352_v8  ;;  %v8357_v18 = vcombine.low %v80_v6, %v84_v7  ;;  %p9803_p4 = scmp.ne.s32.totalorder %s8339_s13, %s9802_s1  ;;  %p9808_p6 = scmp.lt.s32.totalorder %s9802_s1, %s9802_s1 }
  0x50   :  { %v92_v15 = vld [vmem:[#allocation5 + $0xa0] sm:$0xff]  ;;  %v93_v17 = vld [vmem:[#allocation5 + $0xa8] sm:$0xff]  ;;  %6333 = vmatpush1.bf16.msra.mxu0 %v8349_v5  ;;  %6661 = vmatpush1.bf16.msra.mxu1 %v8351_v9  ;;  %v8359_v19 = vcombine.low %v81_v11, %v85_v12  ;;  %v9915_v53 = vsub.s32 %v1101_v43, %v1103_v44 }
  0x51   :  { %6334 = vmatprep.subr.bf16.mxu0 %v8358_v10  ;;  %v8366_v20 = vcombine.high %v88_v13, %v92_v15  ;;  %6662 = vmatprep.subr.bf16.mxu1 %v8360_v14  ;;  %v8368_v21 = vcombine.high %v89_v16, %v93_v17  ;;  %v96_v22 = vld [vmem:[#allocation5 + $0xc0] sm:$0xff]  ;;  %v97_v24 = vld [vmem:[#allocation5 + $0xc8] sm:$0xff]  ;;  %v8365_v26 = vcombine.low %v88_v13, %v92_v15  ;;  %p9809_p7 = por %p9808_p6, %p9807_p5 }
  0x52   :  { %v100_v23 = vld [vmem:[#allocation5 + $0xe0] sm:$0xff]  ;;  %v101_v25 = vld [vmem:[#allocation5 + $0xe8] sm:$0xff]  ;;  %v8367_v27 = vcombine.low %v89_v16, %v93_v17  ;;  %v9921_v63 = vrot.slane %v9917_v59, %v9915_v53 }
  0x53   :  { %v8374_v28 = vcombine.high %v96_v22, %v100_v23  ;;  %v8376_v29 = vcombine.high %v97_v24, %v101_v25  ;;  %v104_v30 = vld [vmem:[#allocation5 + $0x100] sm:$0xff]  ;;  %v105_v35 = vld [vmem:[#allocation5 + $0x108] sm:$0xff]  ;;  %v8373_v37 = vcombine.low %v96_v22, %v100_v23  ;;  %v8375_v38 = vcombine.low %v97_v24, %v101_v25  ;;  %p9810_p8 = pnand %p9809_p7, %p9803_p4 }
  0x54   :  { %6335 = vmatpush1.bf16.msra.mxu0 %v8357_v18  ;;  %6663 = vmatpush1.bf16.msra.mxu1 %v8359_v19  ;;  %v108_v31 = vld [vmem:[#allocation5 + $0x120] sm:$0xff]  ;;  %v109_v36 = vld [vmem:[#allocation5 + $0x128] sm:$0xff]  ;;  %v1113_v3 = vcombine.high %v9921_v63, %v9921_v63 }
  0x55   :  { %6336 = vmatprep.subr.bf16.mxu0 %v8366_v20  ;;  %6664 = vmatprep.subr.bf16.mxu1 %v8368_v21  ;;  %v8382_v39 = vcombine.high %v104_v30, %v108_v31  ;;  %v8384_v40 = vcombine.high %v105_v35, %v109_v36  ;;  %v112_v41 = vld [vmem:[#allocation5 + $0x140] sm:$0xff]  ;;  %v113_v45 = vld [vmem:[#allocation5 + $0x148] sm:$0xff]  ;;  %v8381_v47 = vcombine.low %v104_v30, %v108_v31 }
  0x56   :  { %v116_v42 = vld [vmem:[#allocation5 + $0x160] sm:$0xff]  ;;  %v117_v46 = vld [vmem:[#allocation5 + $0x168] sm:$0xff]  ;;  %v8383_v48 = vcombine.low %v105_v35, %v109_v36  ;;  %v9926_v9 = vrot.slane %v1113_v3, %v9915_v53 }
  0x57   :  { %v8390_v49 = vcombine.high %v112_v41, %v116_v42  ;;  %v8392_v50 = vcombine.high %v113_v45, %v117_v46  ;;  %v120_v51 = vld [vmem:[#allocation5 + $0x180] sm:$0xff]  ;;  %v121_v54 = vld [vmem:[#allocation5 + $0x188] sm:$0xff]  ;;  %v8389_v56 = vcombine.low %v112_v41, %v116_v42  ;;  %v8391_v57 = vcombine.low %v113_v45, %v117_v46 }
  0x58   :  { %6337 = vmatpush1.bf16.msra.mxu0 %v8365_v26  ;;  %6665 = vmatpush1.bf16.msra.mxu1 %v8367_v27  ;;  %v124_v52 = vld [vmem:[#allocation5 + $0x1a0] sm:$0xff]  ;;  %v125_v55 = vld [vmem:[#allocation5 + $0x1a8] sm:$0xff] }
  0x59   :  { %6338 = vmatprep.subr.bf16.mxu0 %v8374_v28  ;;  %6666 = vmatprep.subr.bf16.mxu1 %v8376_v29  ;;  %v8398_v58 = vcombine.high %v120_v51, %v124_v52  ;;  %v8400_v60 = vcombine.high %v121_v54, %v125_v55  ;;  %v128_v61 = vld [vmem:[#allocation5 + $0x1c0] sm:$0xff]  ;;  %v129_v0 = vld [vmem:[#allocation5 + $0x1c8] sm:$0xff]  ;;  %v8397_v2 = vcombine.low %v120_v51, %v124_v52 }
  0x5a   :  { %v132_v62 = vld [vmem:[#allocation5 + $0x1e0] sm:$0xff]  ;;  %v133_v1 = vld [vmem:[#allocation5 + $0x1e8] sm:$0xff]  ;;  %v8399_v4 = vcombine.low %v121_v54, %v125_v55  ;;  %6364 = vmatprep.mubr.bf16.mxu0 %v9926_v9  ;;  %6692 = vmatprep.mubr.bf16.mxu1 %v9926_v9 }
  0x5b   :  { %v8406_v5 = vcombine.high %v128_v61, %v132_v62  ;;  %v8408_v6 = vcombine.high %v129_v0, %v133_v1  ;;  %v136_v7 = vld [vmem:[#allocation5 + $0x200] sm:$0xff]  ;;  %v137_v10 = vld [vmem:[#allocation5 + $0x208] sm:$0xff]  ;;  %v8405_v12 = vcombine.low %v128_v61, %v132_v62  ;;  %v8407_v13 = vcombine.low %v129_v0, %v133_v1 }
  0x5c   :  { %6339 = vmatpush1.bf16.msra.mxu0 %v8373_v37  ;;  %6667 = vmatpush1.bf16.msra.mxu1 %v8375_v38  ;;  %v140_v8 = vld [vmem:[#allocation5 + $0x220] sm:$0xff]  ;;  %v141_v11 = vld [vmem:[#allocation5 + $0x228] sm:$0xff] }
  0x5d   :  { %6340 = vmatprep.subr.bf16.mxu0 %v8382_v39  ;;  %6668 = vmatprep.subr.bf16.mxu1 %v8384_v40  ;;  %v8414_v14 = vcombine.high %v136_v7, %v140_v8  ;;  %v8416_v15 = vcombine.high %v137_v10, %v141_v11  ;;  %v144_v16 = vld [vmem:[#allocation5 + $0x240] sm:$0xff]  ;;  %v145_v18 = vld [vmem:[#allocation5 + $0x248] sm:$0xff]  ;;  %v8413_v20 = vcombine.low %v136_v7, %v140_v8 }
  0x5e   :  { %v148_v17 = vld [vmem:[#allocation5 + $0x260] sm:$0xff]  ;;  %v149_v19 = vld [vmem:[#allocation5 + $0x268] sm:$0xff]  ;;  %v8415_v21 = vcombine.low %v137_v10, %v141_v11 }
  0x5f   :  { %v8422_v22 = vcombine.high %v144_v16, %v148_v17  ;;  %v8424_v23 = vcombine.high %v145_v18, %v149_v19  ;;  %v152_v24 = vld [vmem:[#allocation5 + $0x280] sm:$0xff]  ;;  %v153_v26 = vld [vmem:[#allocation5 + $0x288] sm:$0xff]  ;;  %v8421_v28 = vcombine.low %v144_v16, %v148_v17  ;;  %v8423_v29 = vcombine.low %v145_v18, %v149_v19 }
  0x60   :  { %6341 = vmatpush1.bf16.msra.mxu0 %v8381_v47  ;;  %6669 = vmatpush1.bf16.msra.mxu1 %v8383_v48  ;;  %v156_v25 = vld [vmem:[#allocation5 + $0x2a0] sm:$0xff]  ;;  %v157_v27 = vld [vmem:[#allocation5 + $0x2a8] sm:$0xff] }
  0x61   :  { %6342 = vmatprep.subr.bf16.mxu0 %v8390_v49  ;;  %6670 = vmatprep.subr.bf16.mxu1 %v8392_v50  ;;  %v8430_v30 = vcombine.high %v152_v24, %v156_v25  ;;  %v8432_v31 = vcombine.high %v153_v26, %v157_v27  ;;  %v160_v32 = vld [vmem:[#allocation5 + $0x2c0] sm:$0xff]  ;;  %v161_v34 = vld [vmem:[#allocation5 + $0x2c8] sm:$0xff]  ;;  %v8429_v36 = vcombine.low %v152_v24, %v156_v25 }
  0x62   :  { %v164_v33 = vld [vmem:[#allocation5 + $0x2e0] sm:$0xff]  ;;  %v165_v35 = vld [vmem:[#allocation5 + $0x2e8] sm:$0xff]  ;;  %v8431_v37 = vcombine.low %v153_v26, %v157_v27 }
  0x63   :  { %v8438_v38 = vcombine.high %v160_v32, %v164_v33  ;;  %v8440_v39 = vcombine.high %v161_v34, %v165_v35  ;;  %v168_v40 = vld [vmem:[#allocation5 + $0x300] sm:$0xff]  ;;  %v169_v42 = vld [vmem:[#allocation5 + $0x308] sm:$0xff]  ;;  %v8437_v44 = vcombine.low %v160_v32, %v164_v33  ;;  %v8439_v45 = vcombine.low %v161_v34, %v165_v35 }
  0x64   :  { %6343 = vmatpush1.bf16.msra.mxu0 %v8389_v56  ;;  %6671 = vmatpush1.bf16.msra.mxu1 %v8391_v57  ;;  %v172_v41 = vld [vmem:[#allocation5 + $0x320] sm:$0xff]  ;;  %v173_v43 = vld [vmem:[#allocation5 + $0x328] sm:$0xff]  ;;  %v9936_v33 = vcombine.high %v9926_v9, %v9926_v9 }
  0x65   :  { %6344 = vmatprep.subr.bf16.mxu0 %v8398_v58  ;;  %6672 = vmatprep.subr.bf16.mxu1 %v8400_v60  ;;  %v8446_v46 = vcombine.high %v168_v40, %v172_v41  ;;  %v8448_v47 = vcombine.high %v169_v42, %v173_v43  ;;  %v176_v48 = vld [vmem:[#allocation5 + $0x340] sm:$0xff]  ;;  %v177_v50 = vld [vmem:[#allocation5 + $0x348] sm:$0xff]  ;;  %v8445_v52 = vcombine.low %v168_v40, %v172_v41 }
  0x66   :  { %v180_v49 = vld [vmem:[#allocation5 + $0x360] sm:$0xff]  ;;  %v181_v51 = vld [vmem:[#allocation5 + $0x368] sm:$0xff]  ;;  %v8447_v54 = vcombine.low %v169_v42, %v173_v43 }
  0x67   :  { %v8454_v55 = vcombine.high %v176_v48, %v180_v49  ;;  %v8456_v56 = vcombine.high %v177_v50, %v181_v51  ;;  %v184_v57 = vld [vmem:[#allocation5 + $0x380] sm:$0xff]  ;;  %v185_v60 = vld [vmem:[#allocation5 + $0x388] sm:$0xff]  ;;  %v8453_v62 = vcombine.low %v176_v48, %v180_v49  ;;  %v8455_v0 = vcombine.low %v177_v50, %v181_v51 }
  0x68   :  { %6345 = vmatpush1.bf16.msra.mxu0 %v8397_v2  ;;  %6673 = vmatpush1.bf16.msra.mxu1 %v8399_v4  ;;  %v188_v58 = vld [vmem:[#allocation5 + $0x3a0] sm:$0xff]  ;;  %v189_v61 = vld [vmem:[#allocation5 + $0x3a8] sm:$0xff] }
  0x69   :  { %6346 = vmatprep.subr.bf16.mxu0 %v8406_v5  ;;  %6674 = vmatprep.subr.bf16.mxu1 %v8408_v6  ;;  %v8462_v1 = vcombine.high %v184_v57, %v188_v58  ;;  %v8464_v2 = vcombine.high %v185_v60, %v189_v61  ;;  %v192_v3 = vld [vmem:[#allocation5 + $0x3c0] sm:$0xff]  ;;  %v193_v5 = vld [vmem:[#allocation5 + $0x3c8] sm:$0xff]  ;;  %v8461_v7 = vcombine.low %v184_v57, %v188_v58 }
  0x6a   :  { %v196_v4 = vld [vmem:[#allocation5 + $0x3e0] sm:$0xff]  ;;  %v197_v6 = vld [vmem:[#allocation5 + $0x3e8] sm:$0xff]  ;;  %v8463_v8 = vcombine.low %v185_v60, %v189_v61 }
  0x6b   :  { %v8470_v10 = vcombine.high %v192_v3, %v196_v4  ;;  %v8472_v11 = vcombine.high %v193_v5, %v197_v6  ;;  %v8469_v16 = vcombine.low %v192_v3, %v196_v4  ;;  %v8471_v17 = vcombine.low %v193_v5, %v197_v6  ;;  %v213_v24 = vld [vmem:[#allocation5 + $0x468] sm:$0xff] }
  0x6c   :  { %6347 = vmatpush1.bf16.msra.mxu0 %v8405_v12  ;;  %6675 = vmatpush1.bf16.msra.mxu1 %v8407_v13  ;;  %v200_v12 = vld [vmem:[#allocation5 + $0x400] sm:$0xff]  ;;  %v221_v32 = vld [vmem:[#allocation5 + $0x4a8] sm:$0xff] }
  0x6d   :  { %6348 = vmatprep.subr.bf16.mxu0 %v8414_v14  ;;  %6676 = vmatprep.subr.bf16.mxu1 %v8416_v15  ;;  %v204_v13 = vld [vmem:[#allocation5 + $0x420] sm:$0xff]  ;;  %v201_v14 = vld [vmem:[#allocation5 + $0x408] sm:$0xff] }
  0x6e   :  { %v205_v15 = vld [vmem:[#allocation5 + $0x428] sm:$0xff]  ;;  %v8478_v18 = vcombine.high %v200_v12, %v204_v13  ;;  %v8477_v25 = vcombine.low %v200_v12, %v204_v13 }
  0x6f   :  { %v8480_v19 = vcombine.high %v201_v14, %v205_v15  ;;  %v8479_v26 = vcombine.low %v201_v14, %v205_v15  ;;  %v229_v40 = vld [vmem:[#allocation5 + $0x4e8] sm:$0xff] }
  0x70   :  { %6349 = vmatpush1.bf16.msra.mxu0 %v8413_v20  ;;  %6677 = vmatpush1.bf16.msra.mxu1 %v8415_v21  ;;  %v208_v20 = vld [vmem:[#allocation5 + $0x440] sm:$0xff]  ;;  %v237_v48 = vld [vmem:[#allocation5 + $0x528] sm:$0xff] }
  0x71   :  { %6350 = vmatprep.subr.bf16.mxu0 %v8422_v22  ;;  %6678 = vmatprep.subr.bf16.mxu1 %v8424_v23  ;;  %v212_v21 = vld [vmem:[#allocation5 + $0x460] sm:$0xff]  ;;  %v9932_v22 = vrot.slane %v9921_v63, %v9915_v53  ;;  %v209_v23 = vld [vmem:[#allocation5 + $0x448] sm:$0xff] }
  0x72   :  { %v8486_v27 = vcombine.high %v208_v20, %v212_v21  ;;  %v8485_v63 = vcombine.low %v208_v20, %v212_v21  ;;  %v8487_v34 = vcombine.low %v209_v23, %v213_v24  ;;  %v245_v57 = vld [vmem:[#allocation5 + $0x568] sm:$0xff] }
  0x73   :  { %v253_v3 = vld [vmem:[#allocation5 + $0x5a8] sm:$0xff] }
  0x74   :  { %6351 = vmatpush1.bf16.msra.mxu0 %v8421_v28  ;;  %6679 = vmatpush1.bf16.msra.mxu1 %v8423_v29  ;;  %v216_v28 = vld [vmem:[#allocation5 + $0x480] sm:$0xff]  ;;  %v261_v12 = vld [vmem:[#allocation5 + $0x5e8] sm:$0xff] }
  0x75   :  { %6352 = vmatprep.subr.bf16.mxu0 %v8430_v30  ;;  %6680 = vmatprep.subr.bf16.mxu1 %v8432_v31  ;;  %v220_v29 = vld [vmem:[#allocation5 + $0x4a0] sm:$0xff]  ;;  %v217_v30 = vld [vmem:[#allocation5 + $0x488] sm:$0xff]  ;;  %v8488_v31 = vcombine.high %v209_v23, %v213_v24 }
  0x76   :  { %v8494_v35 = vcombine.high %v216_v28, %v220_v29  ;;  %v8493_v41 = vcombine.low %v216_v28, %v220_v29  ;;  %v8495_v42 = vcombine.low %v217_v30, %v221_v32  ;;  %v269_v20 = vld [vmem:[#allocation5 + $0x628] sm:$0xff] }
  0x77   :  { %v277_v29 = vld [vmem:[#allocation5 + $0x668] sm:$0xff] }
  0x78   :  { %6353 = vmatpush1.bf16.msra.mxu0 %v8429_v36  ;;  %6681 = vmatpush1.bf16.msra.mxu1 %v8431_v37  ;;  %v224_v36 = vld [vmem:[#allocation5 + $0x4c0] sm:$0xff] }
  0x79   :  { %6354 = vmatprep.subr.bf16.mxu0 %v8438_v38  ;;  %6682 = vmatprep.subr.bf16.mxu1 %v8440_v39  ;;  %v228_v37 = vld [vmem:[#allocation5 + $0x4e0] sm:$0xff]  ;;  %v225_v38 = vld [vmem:[#allocation5 + $0x4c8] sm:$0xff]  ;;  %v8496_v39 = vcombine.high %v217_v30, %v221_v32 }
  0x7a   :  { %v8502_v43 = vcombine.high %v224_v36, %v228_v37  ;;  %v8501_v49 = vcombine.low %v224_v36, %v228_v37  ;;  %v8503_v50 = vcombine.low %v225_v38, %v229_v40  ;;  %v285_v37 = vld [vmem:[#allocation5 + $0x6a8] sm:$0xff] }
  0x7c   :  { %6355 = vmatpush1.bf16.msra.mxu0 %v8437_v44  ;;  %6683 = vmatpush1.bf16.msra.mxu1 %v8439_v45  ;;  %v232_v44 = vld [vmem:[#allocation5 + $0x500] sm:$0xff] }
  0x7d   :  { %6356 = vmatprep.subr.bf16.mxu0 %v8446_v46  ;;  %6684 = vmatprep.subr.bf16.mxu1 %v8448_v47  ;;  %v236_v45 = vld [vmem:[#allocation5 + $0x520] sm:$0xff]  ;;  %v233_v46 = vld [vmem:[#allocation5 + $0x508] sm:$0xff]  ;;  %v8504_v47 = vcombine.high %v225_v38, %v229_v40 }
  0x7e   :  { %v8510_v51 = vcombine.high %v232_v44, %v236_v45  ;;  %v8509_v58 = vcombine.low %v232_v44, %v236_v45  ;;  %v8511_v60 = vcombine.low %v233_v46, %v237_v48  ;;  %v293_v45 = vld [vmem:[#allocation5 + $0x6e8] sm:$0xff] }
  0x80   :  { %6357 = vmatpush1.bf16.msra.mxu0 %v8445_v52  ;;  %6685 = vmatpush1.bf16.msra.mxu1 %v8447_v54  ;;  %v240_v52 = vld [vmem:[#allocation5 + $0x540] sm:$0xff] }
  0x81   :  { %6358 = vmatprep.subr.bf16.mxu0 %v8454_v55  ;;  %6686 = vmatprep.subr.bf16.mxu1 %v8456_v56  ;;  %v244_v54 = vld [vmem:[#allocation5 + $0x560] sm:$0xff]  ;;  %v241_v55 = vld [vmem:[#allocation5 + $0x548] sm:$0xff]  ;;  %v8512_v56 = vcombine.high %v233_v46, %v237_v48 }
  0x82   :  { %v8518_v61 = vcombine.high %v240_v52, %v244_v54  ;;  %v8517_v4 = vcombine.low %v240_v52, %v244_v54  ;;  %v8519_v5 = vcombine.low %v241_v55, %v245_v57  ;;  %v301_v54 = vld [vmem:[#allocation5 + $0x728] sm:$0xff] }
  0x84   :  { %6359 = vmatpush1.bf16.msra.mxu0 %v8453_v62  ;;  %6687 = vmatpush1.bf16.msra.mxu1 %v8455_v0  ;;  %v248_v62 = vld [vmem:[#allocation5 + $0x580] sm:$0xff] }
  0x85   :  { %6360 = vmatprep.subr.bf16.mxu0 %v8462_v1  ;;  %6688 = vmatprep.subr.bf16.mxu1 %v8464_v2  ;;  %v252_v0 = vld [vmem:[#allocation5 + $0x5a0] sm:$0xff]  ;;  %v249_v1 = vld [vmem:[#allocation5 + $0x588] sm:$0xff]  ;;  %v8520_v2 = vcombine.high %v241_v55, %v245_v57 }
  0x86   :  { %v8526_v6 = vcombine.high %v248_v62, %v252_v0  ;;  %v8525_v13 = vcombine.low %v248_v62, %v252_v0  ;;  %v8527_v14 = vcombine.low %v249_v1, %v253_v3  ;;  %v309_v0 = vld [vmem:[#allocation5 + $0x768] sm:$0xff] }
  0x88   :  { %6361 = vmatpush1.bf16.msra.mxu0 %v8461_v7  ;;  %6689 = vmatpush1.bf16.msra.mxu1 %v8463_v8  ;;  %v256_v7 = vld [vmem:[#allocation5 + $0x5c0] sm:$0xff] }
  0x89   :  { %6362 = vmatprep.subr.bf16.mxu0 %v8470_v10  ;;  %6690 = vmatprep.subr.bf16.mxu1 %v8472_v11  ;;  %v260_v8 = vld [vmem:[#allocation5 + $0x5e0] sm:$0xff]  ;;  %v257_v10 = vld [vmem:[#allocation5 + $0x5c8] sm:$0xff]  ;;  %v8528_v11 = vcombine.high %v249_v1, %v253_v3 }
  0x8a   :  { %v8534_v15 = vcombine.high %v256_v7, %v260_v8  ;;  %v8533_v21 = vcombine.low %v256_v7, %v260_v8  ;;  %v8535_v23 = vcombine.low %v257_v10, %v261_v12  ;;  %v317_v8 = vld [vmem:[#allocation5 + $0x7a8] sm:$0xff] }
  0x8c   :  { %6363 = vmatpush1.bf16.msra.mxu0 %v8469_v16  ;;  %6691 = vmatpush1.bf16.msra.mxu1 %v8471_v17  ;;  %v264_v16 = vld [vmem:[#allocation5 + $0x600] sm:$0xff] }
  0x8d   :  { %6373 = vmatprep.subr.bf16.mxu0 %v8478_v18  ;;  %6701 = vmatprep.subr.bf16.mxu1 %v8480_v19  ;;  %v268_v17 = vld [vmem:[#allocation5 + $0x620] sm:$0xff]  ;;  %v265_v18 = vld [vmem:[#allocation5 + $0x608] sm:$0xff]  ;;  %v8536_v19 = vcombine.high %v257_v10, %v261_v12 }
  0x8e   :  { %v8542_v24 = vcombine.high %v264_v16, %v268_v17  ;;  %v8544_v28 = vcombine.high %v265_v18, %v269_v20  ;;  %v8541_v30 = vcombine.low %v264_v16, %v268_v17  ;;  %v325_v17 = vld [vmem:[#allocation5 + $0x7e8] sm:$0xff] }
  0x8f   :  { %6365 = vmatmul.mubr.bf16.vlgmr.msra.gmra.mrb[0].mxu0 %v9932_v22  ;;  %6693 = vmatmul.mubr.bf16.vlgmr.msra.gmra.mrb[0].mxu1 %v9932_v22 }
  0x90   :  { %6374 = vmatpush1.bf16.msra.mxu0 %v8477_v25  ;;  %6702 = vmatpush1.bf16.msra.mxu1 %v8479_v26  ;;  %v272_v25 = vld [vmem:[#allocation5 + $0x640] sm:$0xff] }
  0x91   :  { %6375 = vmatprep.subr.bf16.mxu0 %v8486_v27  ;;  %6703 = vmatprep.subr.bf16.mxu1 %v8488_v31  ;;  %v276_v26 = vld [vmem:[#allocation5 + $0x660] sm:$0xff]  ;;  %v273_v27 = vld [vmem:[#allocation5 + $0x648] sm:$0xff]  ;;  %v8543_v31 = vcombine.low %v265_v18, %v269_v20  ;;  %v1098_v18 = vcombine.high %v9917_v59, %v9917_v59 }
  0x92   :  { %6405 = vmatprep.mubr.bf16.mxu0 %v9936_v33  ;;  %6733 = vmatprep.mubr.bf16.mxu1 %v9936_v33  ;;  %v8550_v32 = vcombine.high %v272_v25, %v276_v26  ;;  %v8552_v36 = vcombine.high %v273_v27, %v277_v29  ;;  %v8549_v38 = vcombine.low %v272_v25, %v276_v26  ;;  %v329_v25 = vld [vmem:[#allocation5 + $0x808] sm:$0xff] }
  0x94   :  { %6376 = vmatpush1.bf16.msra.mxu0 %v8485_v63  ;;  %6704 = vmatpush1.bf16.msra.mxu1 %v8487_v34  ;;  %v280_v63 = vld [vmem:[#allocation5 + $0x680] sm:$0xff] }
  0x95   :  { %6377 = vmatprep.subr.bf16.mxu0 %v8494_v35  ;;  %6705 = vmatprep.subr.bf16.mxu1 %v8496_v39  ;;  %v284_v34 = vld [vmem:[#allocation5 + $0x6a0] sm:$0xff]  ;;  %v281_v35 = vld [vmem:[#allocation5 + $0x688] sm:$0xff]  ;;  %v8551_v39 = vcombine.low %v273_v27, %v277_v29 }
  0x96   :  { %v8558_v40 = vcombine.high %v280_v63, %v284_v34  ;;  %v8560_v44 = vcombine.high %v281_v35, %v285_v37  ;;  %v8557_v46 = vcombine.low %v280_v63, %v284_v34  ;;  %v333_v27 = vld [vmem:[#allocation5 + $0x828] sm:$0xff] }
  0x97   :  { %v337_v63 = vld [vmem:[#allocation5 + $0x848] sm:$0xff]  ;;  %v8608_v34 = vcombine.high %v329_v25, %v333_v27 }
  0x98   :  { %6378 = vmatpush1.bf16.msra.mxu0 %v8493_v41  ;;  %6706 = vmatpush1.bf16.msra.mxu1 %v8495_v42  ;;  %v288_v41 = vld [vmem:[#allocation5 + $0x6c0] sm:$0xff] }
  0x99   :  { %6379 = vmatprep.subr.bf16.mxu0 %v8502_v43  ;;  %6707 = vmatprep.subr.bf16.mxu1 %v8504_v47  ;;  %v292_v42 = vld [vmem:[#allocation5 + $0x6e0] sm:$0xff]  ;;  %v289_v43 = vld [vmem:[#allocation5 + $0x6c8] sm:$0xff]  ;;  %v8559_v47 = vcombine.low %v281_v35, %v285_v37  ;;  %v9951_v37 = vcombine.high %v9932_v22, %v9932_v22 }
  0x9a   :  { %v8566_v48 = vcombine.high %v288_v41, %v292_v42  ;;  %v8568_v52 = vcombine.high %v289_v43, %v293_v45  ;;  %v8565_v55 = vcombine.low %v288_v41, %v292_v42  ;;  %v341_v35 = vld [vmem:[#allocation5 + $0x868] sm:$0xff]  ;;  %v344_v42 = vld [vmem:[#allocation5 + $0x880] sm:$0xff] }
  0x9b   :  { %v8616_v41 = vcombine.high %v337_v63, %v341_v35 }
  0x9c   :  { %6380 = vmatpush1.bf16.msra.mxu0 %v8501_v49  ;;  %6708 = vmatpush1.bf16.msra.mxu1 %v8503_v50  ;;  %v296_v49 = vld [vmem:[#allocation5 + $0x700] sm:$0xff] }
  0x9d   :  { %6381 = vmatprep.subr.bf16.mxu0 %v8510_v51  ;;  %6709 = vmatprep.subr.bf16.mxu1 %v8512_v56  ;;  %v300_v50 = vld [vmem:[#allocation5 + $0x720] sm:$0xff]  ;;  %v297_v51 = vld [vmem:[#allocation5 + $0x708] sm:$0xff]  ;;  %v8567_v56 = vcombine.low %v289_v43, %v293_v45 }
  0x9e   :  { %v8574_v57 = vcombine.high %v296_v49, %v300_v50  ;;  %v8576_v62 = vcombine.high %v297_v51, %v301_v54  ;;  %v8573_v1 = vcombine.low %v296_v49, %v300_v50  ;;  %v348_v43 = vld [vmem:[#allocation5 + $0x8a0] sm:$0xff]  ;;  %v345_v45 = vld [vmem:[#allocation5 + $0x888] sm:$0xff] }
  0x9f   :  { %v8622_v49 = vcombine.high %v344_v42, %v348_v43 }
  0xa0   :  { %6382 = vmatpush1.bf16.msra.mxu0 %v8509_v58  ;;  %6710 = vmatpush1.bf16.msra.mxu1 %v8511_v60  ;;  %v304_v58 = vld [vmem:[#allocation5 + $0x740] sm:$0xff] }
  0xa1   :  { %6383 = vmatprep.subr.bf16.mxu0 %v8518_v61  ;;  %6711 = vmatprep.subr.bf16.mxu1 %v8520_v2  ;;  %v308_v60 = vld [vmem:[#allocation5 + $0x760] sm:$0xff]  ;;  %v305_v61 = vld [vmem:[#allocation5 + $0x748] sm:$0xff]  ;;  %v8575_v2 = vcombine.low %v297_v51, %v301_v54 }
  0xa2   :  { %v8582_v3 = vcombine.high %v304_v58, %v308_v60  ;;  %v8584_v7 = vcombine.high %v305_v61, %v309_v0  ;;  %v8581_v10 = vcombine.low %v304_v58, %v308_v60  ;;  %v352_v51 = vld [vmem:[#allocation5 + $0x8c0] sm:$0xff]  ;;  %v353_v54 = vld [vmem:[#allocation5 + $0x8c8] sm:$0xff] }
  0xa4   :  { %6384 = vmatpush1.bf16.msra.mxu0 %v8517_v4  ;;  %6712 = vmatpush1.bf16.msra.mxu1 %v8519_v5  ;;  %v312_v4 = vld [vmem:[#allocation5 + $0x780] sm:$0xff] }
  0xa5   :  { %6385 = vmatprep.subr.bf16.mxu0 %v8526_v6  ;;  %6713 = vmatprep.subr.bf16.mxu1 %v8528_v11  ;;  %v316_v5 = vld [vmem:[#allocation5 + $0x7a0] sm:$0xff]  ;;  %v313_v6 = vld [vmem:[#allocation5 + $0x788] sm:$0xff]  ;;  %v8583_v11 = vcombine.low %v305_v61, %v309_v0 }
  0xa6   :  { %v8590_v12 = vcombine.high %v312_v4, %v316_v5  ;;  %v8592_v16 = vcombine.high %v313_v6, %v317_v8  ;;  %v8591_v20 = vcombine.low %v313_v6, %v317_v8  ;;  %v360_v61 = vld [vmem:[#allocation5 + $0x900] sm:$0xff]  ;;  %v361_v0 = vld [vmem:[#allocation5 + $0x908] sm:$0xff] }
  0xa7   :  { %v368_v6 = vld [vmem:[#allocation5 + $0x940] sm:$0xff]  ;;  %v369_v8 = vld [vmem:[#allocation5 + $0x948] sm:$0xff] }
  0xa8   :  { %6386 = vmatpush1.bf16.msra.mxu0 %v8525_v13  ;;  %6714 = vmatpush1.bf16.msra.mxu1 %v8527_v14  ;;  %v320_v13 = vld [vmem:[#allocation5 + $0x7c0] sm:$0xff] }
  0xa9   :  { %6387 = vmatprep.subr.bf16.mxu0 %v8534_v15  ;;  %6715 = vmatprep.subr.bf16.mxu1 %v8536_v19  ;;  %v324_v14 = vld [vmem:[#allocation5 + $0x7e0] sm:$0xff]  ;;  %v321_v15 = vld [vmem:[#allocation5 + $0x7c8] sm:$0xff]  ;;  %v8589_v19 = vcombine.low %v312_v4, %v316_v5 }
  0xaa   :  { %v8600_v26 = vcombine.high %v321_v15, %v325_v17  ;;  %v8597_v29 = vcombine.low %v320_v13, %v324_v14  ;;  %v8599_v59 = vcombine.low %v321_v15, %v325_v17  ;;  %v376_v15 = vld [vmem:[#allocation5 + $0x980] sm:$0xff]  ;;  %v377_v17 = vld [vmem:[#allocation5 + $0x988] sm:$0xff] }
  0xac   :  { %6388 = vmatpush1.bf16.msra.mxu0 %v8533_v21  ;;  %6716 = vmatpush1.bf16.msra.mxu1 %v8535_v23  ;;  %v8598_v21 = vcombine.high %v320_v13, %v324_v14  ;;  %v328_v23 = vld [vmem:[#allocation5 + $0x800] sm:$0xff] }
  0xad   :  { %6389 = vmatprep.subr.bf16.mxu0 %v8542_v24  ;;  %6717 = vmatprep.subr.bf16.mxu1 %v8544_v28  ;;  %v332_v24 = vld [vmem:[#allocation5 + $0x820] sm:$0xff]  ;;  %v9945_v28 = vrot.slane %v1098_v18, %v9915_v53  ;;  %v381_v18 = vld [vmem:[#allocation5 + $0x9a8] sm:$0xff] }
  0xb0   :  { %6390 = vmatpush1.bf16.msra.mxu0 %v8541_v30  ;;  %6718 = vmatpush1.bf16.msra.mxu1 %v8543_v31  ;;  %v8606_v30 = vcombine.high %v328_v23, %v332_v24  ;;  %v336_v31 = vld [vmem:[#allocation5 + $0x840] sm:$0xff] }
  0xb1   :  { %6391 = vmatprep.subr.bf16.mxu0 %v8550_v32  ;;  %6719 = vmatprep.subr.bf16.mxu1 %v8552_v36  ;;  %v340_v32 = vld [vmem:[#allocation5 + $0x860] sm:$0xff]  ;;  %v1114_v36 = vcombine.high %v9945_v28, %v9945_v28 }
  0xb4   :  { %6392 = vmatpush1.bf16.msra.mxu0 %v8549_v38  ;;  %6720 = vmatpush1.bf16.msra.mxu1 %v8551_v39  ;;  %v8605_v38 = vcombine.low %v328_v23, %v332_v24  ;;  %v8607_v39 = vcombine.low %v329_v25, %v333_v27  ;;  %v8656_v23 = vcombine.high %v377_v17, %v381_v18  ;;  %v384_v24 = vld [vmem:[#allocation5 + $0x9c0] sm:$0xff]  ;;  %v389_v27 = vld [vmem:[#allocation5 + $0x9e8] sm:$0xff] }
  0xb5   :  { %6393 = vmatprep.subr.bf16.mxu0 %v8558_v40  ;;  %6721 = vmatprep.subr.bf16.mxu1 %v8560_v44  ;;  %v8614_v40 = vcombine.high %v336_v31, %v340_v32  ;;  %v9954_v44 = vrot.slane %v1114_v36, %v9915_v53  ;;  %v388_v25 = vld [vmem:[#allocation5 + $0x9e0] sm:$0xff] }
  0xb6   :  { %v8661_v36 = vcombine.low %v384_v24, %v388_v25 }
  0xb8   :  { %6394 = vmatpush1.bf16.msra.mxu0 %v8557_v46  ;;  %6722 = vmatpush1.bf16.msra.mxu1 %v8559_v47  ;;  %v349_v46 = vld [vmem:[#allocation5 + $0x8a8] sm:$0xff]  ;;  %v8613_v47 = vcombine.low %v336_v31, %v340_v32  ;;  %v392_v32 = vld [vmem:[#allocation5 + $0xa00] sm:$0xff] }
  0xb9   :  { %6395 = vmatprep.subr.bf16.mxu0 %v8566_v48  ;;  %6723 = vmatprep.subr.bf16.mxu1 %v8568_v52  ;;  %v8615_v48 = vcombine.low %v337_v63, %v341_v35  ;;  %v8624_v50 = vcombine.high %v345_v45, %v349_v46  ;;  %v356_v52 = vld [vmem:[#allocation5 + $0x8e0] sm:$0xff]  ;;  %v397_v35 = vld [vmem:[#allocation5 + $0xa28] sm:$0xff] }
  0xba   :  { %v8630_v58 = vcombine.high %v352_v51, %v356_v52  ;;  %v396_v63 = vld [vmem:[#allocation5 + $0xa20] sm:$0xff] }
  0xbc   :  { %6396 = vmatpush1.bf16.msra.mxu0 %v8565_v55  ;;  %6724 = vmatpush1.bf16.msra.mxu1 %v8567_v56  ;;  %v357_v55 = vld [vmem:[#allocation5 + $0x8e8] sm:$0xff]  ;;  %v8621_v56 = vcombine.low %v344_v42, %v348_v43  ;;  %v404_v42 = vld [vmem:[#allocation5 + $0xa60] sm:$0xff] }
  0xbd   :  { %6397 = vmatprep.subr.bf16.mxu0 %v8574_v57  ;;  %6725 = vmatprep.subr.bf16.mxu1 %v8576_v62  ;;  %v8623_v57 = vcombine.low %v345_v45, %v349_v46  ;;  %v8632_v60 = vcombine.high %v353_v54, %v357_v55  ;;  %v364_v62 = vld [vmem:[#allocation5 + $0x920] sm:$0xff]  ;;  %v401_v43 = vld [vmem:[#allocation5 + $0xa48] sm:$0xff]  ;;  %v8669_v46 = vcombine.low %v392_v32, %v396_v63 }
  0xbe   :  { %v8638_v4 = vcombine.high %v360_v61, %v364_v62  ;;  %v405_v45 = vld [vmem:[#allocation5 + $0xa68] sm:$0xff] }
  0xc0   :  { %6398 = vmatpush1.bf16.msra.mxu0 %v8573_v1  ;;  %6726 = vmatpush1.bf16.msra.mxu1 %v8575_v2  ;;  %v365_v1 = vld [vmem:[#allocation5 + $0x928] sm:$0xff]  ;;  %v8629_v2 = vcombine.low %v352_v51, %v356_v52  ;;  %v412_v51 = vld [vmem:[#allocation5 + $0xaa0] sm:$0xff] }
  0xc1   :  { %6399 = vmatprep.subr.bf16.mxu0 %v8582_v3  ;;  %6727 = vmatprep.subr.bf16.mxu1 %v8584_v7  ;;  %v8631_v3 = vcombine.low %v353_v54, %v357_v55  ;;  %v8640_v5 = vcombine.high %v361_v0, %v365_v1  ;;  %v372_v7 = vld [vmem:[#allocation5 + $0x960] sm:$0xff]  ;;  %v409_v52 = vld [vmem:[#allocation5 + $0xa88] sm:$0xff] }
  0xc2   :  { %v8646_v13 = vcombine.high %v368_v6, %v372_v7  ;;  %v413_v54 = vld [vmem:[#allocation5 + $0xaa8] sm:$0xff] }
  0xc4   :  { %6400 = vmatpush1.bf16.msra.mxu0 %v8581_v10  ;;  %6728 = vmatpush1.bf16.msra.mxu1 %v8583_v11  ;;  %v373_v10 = vld [vmem:[#allocation5 + $0x968] sm:$0xff]  ;;  %v8637_v11 = vcombine.low %v360_v61, %v364_v62  ;;  %v420_v61 = vld [vmem:[#allocation5 + $0xae0] sm:$0xff] }
  0xc5   :  { %6401 = vmatprep.subr.bf16.mxu0 %v8590_v12  ;;  %6729 = vmatprep.subr.bf16.mxu1 %v8592_v16  ;;  %v8639_v12 = vcombine.low %v361_v0, %v365_v1  ;;  %v8648_v14 = vcombine.high %v369_v8, %v373_v10  ;;  %v380_v16 = vld [vmem:[#allocation5 + $0x9a0] sm:$0xff]  ;;  %v417_v62 = vld [vmem:[#allocation5 + $0xac8] sm:$0xff] }
  0xc6   :  { %v421_v0 = vld [vmem:[#allocation5 + $0xae8] sm:$0xff] }
  0xc8   :  { %6402 = vmatpush1.bf16.msra.mxu0 %v8589_v19  ;;  %6730 = vmatpush1.bf16.msra.mxu1 %v8591_v20  ;;  %v8645_v19 = vcombine.low %v368_v6, %v372_v7  ;;  %v8647_v20 = vcombine.low %v369_v8, %v373_v10  ;;  %v428_v6 = vld [vmem:[#allocation5 + $0xb20] sm:$0xff]  ;;  %v425_v7 = vld [vmem:[#allocation5 + $0xb08] sm:$0xff] }
  0xc9   :  { %6403 = vmatprep.subr.bf16.mxu0 %v8598_v21  ;;  %6731 = vmatprep.subr.bf16.mxu1 %v8600_v26  ;;  %v8654_v21 = vcombine.high %v376_v15, %v380_v16  ;;  %v385_v26 = vld [vmem:[#allocation5 + $0x9c8] sm:$0xff] }
  0xca   :  { %v8664_v31 = vcombine.high %v385_v26, %v389_v27  ;;  %v429_v8 = vld [vmem:[#allocation5 + $0xb28] sm:$0xff] }
  0xcc   :  { %6404 = vmatpush1.bf16.msra.mxu0 %v8597_v29  ;;  %6732 = vmatpush1.bf16.msra.mxu1 %v8599_v59  ;;  %v8653_v29 = vcombine.low %v376_v15, %v380_v16  ;;  %v8655_v59 = vcombine.low %v377_v17, %v381_v18  ;;  %v436_v15 = vld [vmem:[#allocation5 + $0xb60] sm:$0xff]  ;;  %v433_v16 = vld [vmem:[#allocation5 + $0xb48] sm:$0xff] }
  0xcd   :  { %6414 = vmatprep.subr.bf16.mxu0 %v8606_v30  ;;  %6742 = vmatprep.subr.bf16.mxu1 %v8608_v34  ;;  %v8662_v30 = vcombine.high %v384_v24, %v388_v25  ;;  %v393_v34 = vld [vmem:[#allocation5 + $0xa08] sm:$0xff]  ;;  %v444_v24 = vld [vmem:[#allocation5 + $0xba0] sm:$0xff] }
  0xce   :  { %v437_v17 = vld [vmem:[#allocation5 + $0xb68] sm:$0xff] }
  0xcf   :  { %6406 = vmatmul.mubr.bf16.vlgmr.msra.gmra.mrb[0].mxu0 %v9951_v37  ;;  %6734 = vmatmul.mubr.bf16.vlgmr.msra.gmra.mrb[0].mxu1 %v9951_v37  ;;  %v441_v25 = vld [vmem:[#allocation5 + $0xb88] sm:$0xff] }
  0xd0   :  { %6415 = vmatpush1.bf16.msra.mxu0 %v8605_v38  ;;  %6743 = vmatpush1.bf16.msra.mxu1 %v8607_v39  ;;  %v8663_v38 = vcombine.low %v385_v26, %v389_v27  ;;  %v8670_v39 = vcombine.high %v392_v32, %v396_v63  ;;  %v445_v26 = vld [vmem:[#allocation5 + $0xba8] sm:$0xff]  ;;  %v452_v32 = vld [vmem:[#allocation5 + $0xbe0] sm:$0xff] }
  0xd1   :  { %6416 = vmatprep.subr.bf16.mxu0 %v8614_v40  ;;  %6744 = vmatprep.subr.bf16.mxu1 %v8616_v41  ;;  %v8672_v40 = vcombine.high %v393_v34, %v397_v35  ;;  %v400_v41 = vld [vmem:[#allocation5 + $0xa40] sm:$0xff]  ;;  %v449_v63 = vld [vmem:[#allocation5 + $0xbc8] sm:$0xff] }
  0xd2   :  { %6446 = vmatprep.mubr.bf16.mxu0 %v9954_v44  ;;  %6774 = vmatprep.mubr.bf16.mxu1 %v9954_v44  ;;  %v8677_v55 = vcombine.low %v400_v41, %v404_v42 }
  0xd4   :  { %6417 = vmatpush1.bf16.msra.mxu0 %v8613_v47  ;;  %6745 = vmatpush1.bf16.msra.mxu1 %v8615_v48  ;;  %v8671_v47 = vcombine.low %v393_v34, %v397_v35  ;;  %v8678_v48 = vcombine.high %v400_v41, %v404_v42  ;;  %v453_v34 = vld [vmem:[#allocation5 + $0xbe8] sm:$0xff]  ;;  %v460_v41 = vld [vmem:[#allocation5 + $0xc20] sm:$0xff] }
  0xd5   :  { %6418 = vmatprep.subr.bf16.mxu0 %v8622_v49  ;;  %6746 = vmatprep.subr.bf16.mxu1 %v8624_v50  ;;  %v8680_v49 = vcombine.high %v401_v43, %v405_v45  ;;  %v408_v50 = vld [vmem:[#allocation5 + $0xa80] sm:$0xff]  ;;  %v457_v42 = vld [vmem:[#allocation5 + $0xc08] sm:$0xff] }
  0xd6   :  { %v8685_v1 = vcombine.low %v408_v50, %v412_v51 }
  0xd8   :  { %6419 = vmatpush1.bf16.msra.mxu0 %v8621_v56  ;;  %6747 = vmatpush1.bf16.msra.mxu1 %v8623_v57  ;;  %v8679_v56 = vcombine.low %v401_v43, %v405_v45  ;;  %v8686_v57 = vcombine.high %v408_v50, %v412_v51  ;;  %v461_v43 = vld [vmem:[#allocation5 + $0xc28] sm:$0xff]  ;;  %v468_v50 = vld [vmem:[#allocation5 + $0xc60] sm:$0xff]  ;;  %v9962_v51 = vrot.slane %v9945_v28, %v9915_v53 }
  0xd9   :  { %6420 = vmatprep.subr.bf16.mxu0 %v8630_v58  ;;  %6748 = vmatprep.subr.bf16.mxu1 %v8632_v60  ;;  %v8688_v58 = vcombine.high %v409_v52, %v413_v54  ;;  %v416_v60 = vld [vmem:[#allocation5 + $0xac0] sm:$0xff]  ;;  %v473_v28 = vld [vmem:[#allocation5 + $0xc88] sm:$0xff] }
  0xda   :  { %v8693_v10 = vcombine.low %v416_v60, %v420_v61 }
  0xdc   :  { %6421 = vmatpush1.bf16.msra.mxu0 %v8629_v2  ;;  %6749 = vmatpush1.bf16.msra.mxu1 %v8631_v3  ;;  %v8687_v2 = vcombine.low %v409_v52, %v413_v54  ;;  %v8694_v3 = vcombine.high %v416_v60, %v420_v61  ;;  %v465_v52 = vld [vmem:[#allocation5 + $0xc48] sm:$0xff]  ;;  %v472_v60 = vld [vmem:[#allocation5 + $0xc80] sm:$0xff] }
  0xdd   :  { %6422 = vmatprep.subr.bf16.mxu0 %v8638_v4  ;;  %6750 = vmatprep.subr.bf16.mxu1 %v8640_v5  ;;  %v8696_v4 = vcombine.high %v417_v62, %v421_v0  ;;  %v424_v5 = vld [vmem:[#allocation5 + $0xb00] sm:$0xff]  ;;  %v469_v54 = vld [vmem:[#allocation5 + $0xc68] sm:$0xff] }
  0xde   :  { %v8701_v18 = vcombine.low %v424_v5, %v428_v6  ;;  %v476_v61 = vld [vmem:[#allocation5 + $0xca0] sm:$0xff] }
  0xe0   :  { %6423 = vmatpush1.bf16.msra.mxu0 %v8637_v11  ;;  %6751 = vmatpush1.bf16.msra.mxu1 %v8639_v12  ;;  %v8695_v11 = vcombine.low %v417_v62, %v421_v0  ;;  %v8702_v12 = vcombine.high %v424_v5, %v428_v6  ;;  %v9966_v62 = vcombine.high %v9954_v44, %v9954_v44  ;;  %v477_v0 = vld [vmem:[#allocation5 + $0xca8] sm:$0xff]  ;;  %v480_v5 = vld [vmem:[#allocation5 + $0xcc0] sm:$0xff] }
  0xe1   :  { %6424 = vmatprep.subr.bf16.mxu0 %v8646_v13  ;;  %6752 = vmatprep.subr.bf16.mxu1 %v8648_v14  ;;  %v8704_v13 = vcombine.high %v425_v7, %v429_v8  ;;  %v432_v14 = vld [vmem:[#allocation5 + $0xb40] sm:$0xff] }
  0xe2   :  { %v8709_v27 = vcombine.low %v432_v14, %v436_v15  ;;  %v484_v6 = vld [vmem:[#allocation5 + $0xce0] sm:$0xff] }
  0xe4   :  { %6425 = vmatpush1.bf16.msra.mxu0 %v8645_v19  ;;  %6753 = vmatpush1.bf16.msra.mxu1 %v8647_v20  ;;  %v8703_v19 = vcombine.low %v425_v7, %v429_v8  ;;  %v8710_v20 = vcombine.high %v432_v14, %v436_v15  ;;  %v481_v7 = vld [vmem:[#allocation5 + $0xcc8] sm:$0xff]  ;;  %v488_v14 = vld [vmem:[#allocation5 + $0xd00] sm:$0xff] }
  0xe5   :  { %6426 = vmatprep.subr.bf16.mxu0 %v8654_v21  ;;  %6754 = vmatprep.subr.bf16.mxu1 %v8656_v23  ;;  %v8712_v21 = vcombine.high %v433_v16, %v437_v17  ;;  %v440_v23 = vld [vmem:[#allocation5 + $0xb80] sm:$0xff]  ;;  %v485_v8 = vld [vmem:[#allocation5 + $0xce8] sm:$0xff] }
  0xe6   :  { %v8717_v35 = vcombine.low %v440_v23, %v444_v24  ;;  %v492_v15 = vld [vmem:[#allocation5 + $0xd20] sm:$0xff] }
  0xe8   :  { %6427 = vmatpush1.bf16.msra.mxu0 %v8653_v29  ;;  %6755 = vmatpush1.bf16.msra.mxu1 %v8655_v59  ;;  %v8711_v29 = vcombine.low %v433_v16, %v437_v17  ;;  %v8718_v59 = vcombine.high %v440_v23, %v444_v24  ;;  %v489_v16 = vld [vmem:[#allocation5 + $0xd08] sm:$0xff]  ;;  %v496_v23 = vld [vmem:[#allocation5 + $0xd40] sm:$0xff] }
  0xe9   :  { %6428 = vmatprep.subr.bf16.mxu0 %v8662_v30  ;;  %6756 = vmatprep.subr.bf16.mxu1 %v8664_v31  ;;  %v8720_v30 = vcombine.high %v441_v25, %v445_v26  ;;  %v448_v31 = vld [vmem:[#allocation5 + $0xbc0] sm:$0xff]  ;;  %v493_v17 = vld [vmem:[#allocation5 + $0xd28] sm:$0xff] }
  0xea   :  { %v8725_v45 = vcombine.low %v448_v31, %v452_v32  ;;  %v500_v24 = vld [vmem:[#allocation5 + $0xd60] sm:$0xff] }
  0xec   :  { %6429 = vmatpush1.bf16.msra.mxu0 %v8661_v36  ;;  %6757 = vmatpush1.bf16.msra.mxu1 %v8663_v38  ;;  %v8719_v36 = vcombine.low %v441_v25, %v445_v26  ;;  %v8726_v38 = vcombine.high %v448_v31, %v452_v32  ;;  %v497_v25 = vld [vmem:[#allocation5 + $0xd48] sm:$0xff]  ;;  %v504_v31 = vld [vmem:[#allocation5 + $0xd80] sm:$0xff] }
  0xed   :  { %6430 = vmatprep.subr.bf16.mxu0 %v8670_v39  ;;  %6758 = vmatprep.subr.bf16.mxu1 %v8672_v40  ;;  %v8728_v39 = vcombine.high %v449_v63, %v453_v34  ;;  %v456_v40 = vld [vmem:[#allocation5 + $0xc00] sm:$0xff]  ;;  %v501_v26 = vld [vmem:[#allocation5 + $0xd68] sm:$0xff] }
  0xee   :  { %v508_v32 = vld [vmem:[#allocation5 + $0xda0] sm:$0xff] }
  0xf0   :  { %6431 = vmatpush1.bf16.msra.mxu0 %v8669_v46  ;;  %6759 = vmatpush1.bf16.msra.mxu1 %v8671_v47  ;;  %v8727_v46 = vcombine.low %v449_v63, %v453_v34  ;;  %v8734_v47 = vcombine.high %v456_v40, %v460_v41  ;;  %v505_v63 = vld [vmem:[#allocation5 + $0xd88] sm:$0xff] }
  0xf1   :  { %6432 = vmatprep.subr.bf16.mxu0 %v8678_v48  ;;  %6760 = vmatprep.subr.bf16.mxu1 %v8680_v49  ;;  %v8736_v48 = vcombine.high %v457_v42, %v461_v43  ;;  %v464_v49 = vld [vmem:[#allocation5 + $0xc40] sm:$0xff]  ;;  %v509_v34 = vld [vmem:[#allocation5 + $0xda8] sm:$0xff] }
  0xf4   :  { %6433 = vmatpush1.bf16.msra.mxu0 %v8677_v55  ;;  %6761 = vmatpush1.bf16.msra.mxu1 %v8679_v56  ;;  %v8733_v55 = vcombine.low %v456_v40, %v460_v41  ;;  %v8735_v56 = vcombine.low %v457_v42, %v461_v43  ;;  %v512_v40 = vld [vmem:[#allocation5 + $0xdc0] sm:$0xff]  ;;  %v513_v42 = vld [vmem:[#allocation5 + $0xdc8] sm:$0xff] }
  0xf5   :  { %6434 = vmatprep.subr.bf16.mxu0 %v8686_v57  ;;  %6762 = vmatprep.subr.bf16.mxu1 %v8688_v58  ;;  %v8742_v57 = vcombine.high %v464_v49, %v468_v50  ;;  %v8744_v58 = vcombine.high %v465_v52, %v469_v54  ;;  %v516_v41 = vld [vmem:[#allocation5 + $0xde0] sm:$0xff]  ;;  %v517_v43 = vld [vmem:[#allocation5 + $0xde8] sm:$0xff] }
  0xf8   :  { %6435 = vmatpush1.bf16.msra.mxu0 %v8685_v1  ;;  %6763 = vmatpush1.bf16.msra.mxu1 %v8687_v2  ;;  %v8741_v1 = vcombine.low %v464_v49, %v468_v50  ;;  %v8743_v2 = vcombine.low %v465_v52, %v469_v54  ;;  %v520_v49 = vld [vmem:[#allocation5 + $0xe00] sm:$0xff]  ;;  %v521_v52 = vld [vmem:[#allocation5 + $0xe08] sm:$0xff] }
  0xf9   :  { %6436 = vmatprep.subr.bf16.mxu0 %v8694_v3  ;;  %6764 = vmatprep.subr.bf16.mxu1 %v8696_v4  ;;  %v8750_v3 = vcombine.high %v472_v60, %v476_v61  ;;  %v8752_v4 = vcombine.high %v473_v28, %v477_v0  ;;  %v524_v50 = vld [vmem:[#allocation5 + $0xe20] sm:$0xff]  ;;  %v525_v54 = vld [vmem:[#allocation5 + $0xe28] sm:$0xff] }
  0xfc   :  { %6437 = vmatpush1.bf16.msra.mxu0 %v8693_v10  ;;  %6765 = vmatpush1.bf16.msra.mxu1 %v8695_v11  ;;  %v8749_v10 = vcombine.low %v472_v60, %v476_v61  ;;  %v8751_v11 = vcombine.low %v473_v28, %v477_v0  ;;  %v528_v60 = vld [vmem:[#allocation5 + $0xe40] sm:$0xff]  ;;  %v529_v28 = vld [vmem:[#allocation5 + $0xe48] sm:$0xff] }
  0xfd   :  { %6438 = vmatprep.subr.bf16.mxu0 %v8702_v12  ;;  %6766 = vmatprep.subr.bf16.mxu1 %v8704_v13  ;;  %v8758_v12 = vcombine.high %v480_v5, %v484_v6  ;;  %v8760_v13 = vcombine.high %v481_v7, %v485_v8  ;;  %v532_v61 = vld [vmem:[#allocation5 + $0xe60] sm:$0xff]  ;;  %v533_v0 = vld [vmem:[#allocation5 + $0xe68] sm:$0xff] }
 0x100   :  { %6439 = vmatpush1.bf16.msra.mxu0 %v8701_v18  ;;  %6767 = vmatpush1.bf16.msra.mxu1 %v8703_v19  ;;  %v8757_v18 = vcombine.low %v480_v5, %v484_v6  ;;  %v8759_v19 = vcombine.low %v481_v7, %v485_v8  ;;  %v536_v5 = vld [vmem:[#allocation5 + $0xe80] sm:$0xff]  ;;  %v537_v7 = vld [vmem:[#allocation5 + $0xe88] sm:$0xff] }
 0x101   :  { %6440 = vmatprep.subr.bf16.mxu0 %v8710_v20  ;;  %6768 = vmatprep.subr.bf16.mxu1 %v8712_v21  ;;  %v8766_v20 = vcombine.high %v488_v14, %v492_v15  ;;  %v8768_v21 = vcombine.high %v489_v16, %v493_v17  ;;  %v540_v6 = vld [vmem:[#allocation5 + $0xea0] sm:$0xff]  ;;  %v541_v8 = vld [vmem:[#allocation5 + $0xea8] sm:$0xff] }
 0x104   :  { %6441 = vmatpush1.bf16.msra.mxu0 %v8709_v27  ;;  %6769 = vmatpush1.bf16.msra.mxu1 %v8711_v29  ;;  %v8765_v27 = vcombine.low %v488_v14, %v492_v15  ;;  %v8767_v29 = vcombine.low %v489_v16, %v493_v17  ;;  %v544_v14 = vld [vmem:[#allocation5 + $0xec0] sm:$0xff]  ;;  %v545_v16 = vld [vmem:[#allocation5 + $0xec8] sm:$0xff] }
 0x105   :  { %6442 = vmatprep.subr.bf16.mxu0 %v8718_v59  ;;  %6770 = vmatprep.subr.bf16.mxu1 %v8720_v30  ;;  %v8774_v59 = vcombine.high %v496_v23, %v500_v24  ;;  %v8776_v30 = vcombine.high %v497_v25, %v501_v26  ;;  %v548_v15 = vld [vmem:[#allocation5 + $0xee0] sm:$0xff]  ;;  %v549_v17 = vld [vmem:[#allocation5 + $0xee8] sm:$0xff] }
 0x108   :  { %6443 = vmatpush1.bf16.msra.mxu0 %v8717_v35  ;;  %6771 = vmatpush1.bf16.msra.mxu1 %v8719_v36  ;;  %v8773_v35 = vcombine.low %v496_v23, %v500_v24  ;;  %v8775_v36 = vcombine.low %v497_v25, %v501_v26  ;;  %v552_v23 = vld [vmem:[#allocation5 + $0xf00] sm:$0xff]  ;;  %v553_v25 = vld [vmem:[#allocation5 + $0xf08] sm:$0xff] }
 0x109   :  { %6444 = vmatprep.subr.bf16.mxu0 %v8726_v38  ;;  %6772 = vmatprep.subr.bf16.mxu1 %v8728_v39  ;;  %v8782_v38 = vcombine.high %v504_v31, %v508_v32  ;;  %v8784_v39 = vcombine.high %v505_v63, %v509_v34  ;;  %v556_v24 = vld [vmem:[#allocation5 + $0xf20] sm:$0xff]  ;;  %v557_v26 = vld [vmem:[#allocation5 + $0xf28] sm:$0xff] }
 0x10c   :  { %6445 = vmatpush1.bf16.msra.mxu0 %v8725_v45  ;;  %6773 = vmatpush1.bf16.msra.mxu1 %v8727_v46  ;;  %v8781_v45 = vcombine.low %v504_v31, %v508_v32  ;;  %v8783_v46 = vcombine.low %v505_v63, %v509_v34  ;;  %v560_v31 = vld [vmem:[#allocation5 + $0xf40] sm:$0xff]  ;;  %v561_v63 = vld [vmem:[#allocation5 + $0xf48] sm:$0xff] }
 0x10d   :  { %6455 = vmatprep.subr.bf16.mxu0 %v8734_v47  ;;  %6783 = vmatprep.subr.bf16.mxu1 %v8736_v48  ;;  %v8790_v47 = vcombine.high %v512_v40, %v516_v41  ;;  %v8792_v48 = vcombine.high %v513_v42, %v517_v43  ;;  %v564_v32 = vld [vmem:[#allocation5 + $0xf60] sm:$0xff]  ;;  %v565_v34 = vld [vmem:[#allocation5 + $0xf68] sm:$0xff] }
 0x10f   :  { %6447 = vmatmul.mubr.bf16.vlgmr.msra.gmra.mrb[0].mxu0 %v9962_v51  ;;  %6775 = vmatmul.mubr.bf16.vlgmr.msra.gmra.mrb[0].mxu1 %v9962_v51 }
 0x110   :  { %6456 = vmatpush1.bf16.msra.mxu0 %v8733_v55  ;;  %6784 = vmatpush1.bf16.msra.mxu1 %v8735_v56  ;;  %v8789_v55 = vcombine.low %v512_v40, %v516_v41  ;;  %v8791_v56 = vcombine.low %v513_v42, %v517_v43  ;;  %v568_v40 = vld [vmem:[#allocation5 + $0xf80] sm:$0xff]  ;;  %v569_v42 = vld [vmem:[#allocation5 + $0xf88] sm:$0xff] }
 0x111   :  { %6457 = vmatprep.subr.bf16.mxu0 %v8742_v57  ;;  %6785 = vmatprep.subr.bf16.mxu1 %v8744_v58  ;;  %v8798_v57 = vcombine.high %v520_v49, %v524_v50  ;;  %v8800_v58 = vcombine.high %v521_v52, %v525_v54  ;;  %v572_v41 = vld [vmem:[#allocation5 + $0xfa0] sm:$0xff]  ;;  %v573_v43 = vld [vmem:[#allocation5 + $0xfa8] sm:$0xff] }
 0x112   :  { %6487 = vmatprep.mubr.bf16.mxu0 %v9966_v62  ;;  %6815 = vmatprep.mubr.bf16.mxu1 %v9966_v62 }
 0x114   :  { %6458 = vmatpush1.bf16.msra.mxu0 %v8741_v1  ;;  %6786 = vmatpush1.bf16.msra.mxu1 %v8743_v2  ;;  %v8797_v1 = vcombine.low %v520_v49, %v524_v50  ;;  %v8799_v2 = vcombine.low %v521_v52, %v525_v54  ;;  %v576_v49 = vld [vmem:[#allocation5 + $0xfc0] sm:$0xff]  ;;  %v577_v52 = vld [vmem:[#allocation5 + $0xfc8] sm:$0xff] }
 0x115   :  { %6459 = vmatprep.subr.bf16.mxu0 %v8750_v3  ;;  %6787 = vmatprep.subr.bf16.mxu1 %v8752_v4  ;;  %v8806_v3 = vcombine.high %v528_v60, %v532_v61  ;;  %v8808_v4 = vcombine.high %v529_v28, %v533_v0  ;;  %v580_v50 = vld [vmem:[#allocation5 + $0xfe0] sm:$0xff]  ;;  %v581_v54 = vld [vmem:[#allocation5 + $0xfe8] sm:$0xff] }
 0x118   :  { %6460 = vmatpush1.bf16.msra.mxu0 %v8749_v10  ;;  %6788 = vmatpush1.bf16.msra.mxu1 %v8751_v11  ;;  %v8805_v10 = vcombine.low %v528_v60, %v532_v61  ;;  %v8807_v11 = vcombine.low %v529_v28, %v533_v0  ;;  %v8856_v60 = vcombine.high %v577_v52, %v581_v54  ;;  %v584_v61 = vld [vmem:[#allocation5 + $0x1000] sm:$0xff] }
 0x119   :  { %6461 = vmatprep.subr.bf16.mxu0 %v8758_v12  ;;  %6789 = vmatprep.subr.bf16.mxu1 %v8760_v13  ;;  %v8814_v12 = vcombine.high %v536_v5, %v540_v6  ;;  %v8816_v13 = vcombine.high %v537_v7, %v541_v8  ;;  %v588_v28 = vld [vmem:[#allocation5 + $0x1020] sm:$0xff] }
 0x11c   :  { %6462 = vmatpush1.bf16.msra.mxu0 %v8757_v18  ;;  %6790 = vmatpush1.bf16.msra.mxu1 %v8759_v19  ;;  %v8813_v18 = vcombine.low %v536_v5, %v540_v6  ;;  %v8815_v19 = vcombine.low %v537_v7, %v541_v8  ;;  %v8862_v5 = vcombine.high %v584_v61, %v588_v28  ;;  %v592_v7 = vld [vmem:[#allocation5 + $0x1040] sm:$0xff] }
 0x11d   :  { %6463 = vmatprep.subr.bf16.mxu0 %v8766_v20  ;;  %6791 = vmatprep.subr.bf16.mxu1 %v8768_v21  ;;  %v8822_v20 = vcombine.high %v544_v14, %v548_v15  ;;  %v8824_v21 = vcombine.high %v545_v16, %v549_v17  ;;  %v596_v8 = vld [vmem:[#allocation5 + $0x1060] sm:$0xff] }
 0x120   :  { %6464 = vmatpush1.bf16.msra.mxu0 %v8765_v27  ;;  %6792 = vmatpush1.bf16.msra.mxu1 %v8767_v29  ;;  %v8821_v27 = vcombine.low %v544_v14, %v548_v15  ;;  %v8823_v29 = vcombine.low %v545_v16, %v549_v17  ;;  %v8861_v14 = vcombine.low %v584_v61, %v588_v28  ;;  %v637_v61 = vld [vmem:[#allocation5 + $0x11a8] sm:$0xff] }
 0x121   :  { %6465 = vmatprep.subr.bf16.mxu0 %v8774_v59  ;;  %6793 = vmatprep.subr.bf16.mxu1 %v8776_v30  ;;  %v8830_v59 = vcombine.high %v552_v23, %v556_v24  ;;  %v8832_v30 = vcombine.high %v553_v25, %v557_v26  ;;  %v8870_v16 = vcombine.high %v592_v7, %v596_v8 }
 0x124   :  { %6466 = vmatpush1.bf16.msra.mxu0 %v8773_v35  ;;  %6794 = vmatpush1.bf16.msra.mxu1 %v8775_v36  ;;  %v8829_v35 = vcombine.low %v552_v23, %v556_v24  ;;  %v8831_v36 = vcombine.low %v553_v25, %v557_v26  ;;  %v605_v23 = vld [vmem:[#allocation5 + $0x10a8] sm:$0xff]  ;;  %v8869_v24 = vcombine.low %v592_v7, %v596_v8 }
 0x125   :  { %6467 = vmatprep.subr.bf16.mxu0 %v8782_v38  ;;  %6795 = vmatprep.subr.bf16.mxu1 %v8784_v39  ;;  %v8838_v38 = vcombine.high %v560_v31, %v564_v32  ;;  %v8840_v39 = vcombine.high %v561_v63, %v565_v34  ;;  %v645_v7 = vld [vmem:[#allocation5 + $0x11e8] sm:$0xff] }
 0x128   :  { %6468 = vmatpush1.bf16.msra.mxu0 %v8781_v45  ;;  %6796 = vmatpush1.bf16.msra.mxu1 %v8783_v46  ;;  %v8837_v45 = vcombine.low %v560_v31, %v564_v32  ;;  %v8839_v46 = vcombine.low %v561_v63, %v565_v34  ;;  %v613_v31 = vld [vmem:[#allocation5 + $0x10e8] sm:$0xff] }
 0x129   :  { %6469 = vmatprep.subr.bf16.mxu0 %v8790_v47  ;;  %6797 = vmatprep.subr.bf16.mxu1 %v8792_v48  ;;  %v8846_v47 = vcombine.high %v568_v40, %v572_v41  ;;  %v8848_v48 = vcombine.high %v569_v42, %v573_v43 }
 0x12c   :  { %6470 = vmatpush1.bf16.msra.mxu0 %v8789_v55  ;;  %6798 = vmatpush1.bf16.msra.mxu1 %v8791_v56  ;;  %v9972_v55 = vld [vmem:[#allocation2 + $0x8] sm:$0xff]  ;;  %v8845_v56 = vcombine.low %v568_v40, %v572_v41  ;;  %v621_v40 = vld [vmem:[#allocation5 + $0x1128] sm:$0xff] }
 0x12d   :  { %6471 = vmatprep.subr.bf16.mxu0 %v8798_v57  ;;  %6799 = vmatprep.subr.bf16.mxu1 %v8800_v58  ;;  %v8847_v57 = vcombine.low %v569_v42, %v573_v43  ;;  %v8854_v58 = vcombine.high %v576_v49, %v580_v50  ;;  %v9976_v0 = vrot.slane %v9972_v55, %v9915_v53 }
 0x130   :  { %6472 = vmatpush1.bf16.msra.mxu0 %v8797_v1  ;;  %6800 = vmatpush1.bf16.msra.mxu1 %v8799_v2  ;;  %v585_v1 = vld [vmem:[#allocation5 + $0x1008] sm:$0xff] }
 0x131   :  { %6473 = vmatprep.subr.bf16.mxu0 %v8806_v3  ;;  %6801 = vmatprep.subr.bf16.mxu1 %v8808_v4  ;;  %v589_v2 = vld [vmem:[#allocation5 + $0x1028] sm:$0xff]  ;;  %v8853_v3 = vcombine.low %v576_v49, %v580_v50  ;;  %v8855_v4 = vcombine.low %v577_v52, %v581_v54 }
 0x132   :  { %v8864_v6 = vcombine.high %v585_v1, %v589_v2  ;;  %v8863_v15 = vcombine.low %v585_v1, %v589_v2  ;;  %v629_v49 = vld [vmem:[#allocation5 + $0x1168] sm:$0xff] }
 0x134   :  { %6474 = vmatpush1.bf16.msra.mxu0 %v8805_v10  ;;  %6802 = vmatpush1.bf16.msra.mxu1 %v8807_v11  ;;  %v1162_v10 = vcombine.high %v9976_v0, %v9976_v0  ;;  %v9982_v11 = vcombine.high %v9962_v51, %v9962_v51 }
 0x135   :  { %6475 = vmatprep.subr.bf16.mxu0 %v8814_v12  ;;  %6803 = vmatprep.subr.bf16.mxu1 %v8816_v13  ;;  %v593_v12 = vld [vmem:[#allocation5 + $0x1048] sm:$0xff] }
 0x136   :  { %v597_v13 = vld [vmem:[#allocation5 + $0x1068] sm:$0xff] }
 0x137   :  { %v8872_v17 = vcombine.high %v593_v12, %v597_v13  ;;  %v8871_v25 = vcombine.low %v593_v12, %v597_v13 }
 0x138   :  { %6476 = vmatpush1.bf16.msra.mxu0 %v8813_v18  ;;  %6804 = vmatpush1.bf16.msra.mxu1 %v8815_v19  ;;  %v600_v18 = vld [vmem:[#allocation5 + $0x1080] sm:$0xff] }
 0x139   :  { %6477 = vmatprep.subr.bf16.mxu0 %v8822_v20  ;;  %6805 = vmatprep.subr.bf16.mxu1 %v8824_v21  ;;  %v604_v19 = vld [vmem:[#allocation5 + $0x10a0] sm:$0xff]  ;;  %v9985_v20 = vrot.slane %v1162_v10, %v9915_v53  ;;  %v601_v21 = vld [vmem:[#allocation5 + $0x1088] sm:$0xff] }
 0x13a   :  { %v8878_v26 = vcombine.high %v600_v18, %v604_v19  ;;  %v8877_v32 = vcombine.low %v600_v18, %v604_v19  ;;  %v8879_v63 = vcombine.low %v601_v21, %v605_v23 }
 0x13c   :  { %6478 = vmatpush1.bf16.msra.mxu0 %v8821_v27  ;;  %6806 = vmatpush1.bf16.msra.mxu1 %v8823_v29  ;;  %v8880_v27 = vcombine.high %v601_v21, %v605_v23  ;;  %v608_v29 = vld [vmem:[#allocation5 + $0x10c0] sm:$0xff] }
 0x13d   :  { %6479 = vmatprep.subr.bf16.mxu0 %v8830_v59  ;;  %6807 = vmatprep.subr.bf16.mxu1 %v8832_v30  ;;  %v612_v59 = vld [vmem:[#allocation5 + $0x10e0] sm:$0xff]  ;;  %v609_v30 = vld [vmem:[#allocation5 + $0x10c8] sm:$0xff] }
 0x13e   :  { %v8886_v34 = vcombine.high %v608_v29, %v612_v59  ;;  %v8885_v41 = vcombine.low %v608_v29, %v612_v59  ;;  %v8887_v42 = vcombine.low %v609_v30, %v613_v31 }
 0x140   :  { %6480 = vmatpush1.bf16.msra.mxu0 %v8829_v35  ;;  %6808 = vmatpush1.bf16.msra.mxu1 %v8831_v36  ;;  %v8888_v35 = vcombine.high %v609_v30, %v613_v31  ;;  %v616_v36 = vld [vmem:[#allocation5 + $0x1100] sm:$0xff] }
 0x141   :  { %6481 = vmatprep.subr.bf16.mxu0 %v8838_v38  ;;  %6809 = vmatprep.subr.bf16.mxu1 %v8840_v39  ;;  %v620_v38 = vld [vmem:[#allocation5 + $0x1120] sm:$0xff]  ;;  %v617_v39 = vld [vmem:[#allocation5 + $0x1108] sm:$0xff] }
 0x142   :  { %v8894_v43 = vcombine.high %v616_v36, %v620_v38  ;;  %v8893_v50 = vcombine.low %v616_v36, %v620_v38  ;;  %v8895_v52 = vcombine.low %v617_v39, %v621_v40 }
 0x144   :  { %6482 = vmatpush1.bf16.msra.mxu0 %v8837_v45  ;;  %6810 = vmatpush1.bf16.msra.mxu1 %v8839_v46  ;;  %v8896_v45 = vcombine.high %v617_v39, %v621_v40  ;;  %v624_v46 = vld [vmem:[#allocation5 + $0x1140] sm:$0xff] }
 0x145   :  { %6483 = vmatprep.subr.bf16.mxu0 %v8846_v47  ;;  %6811 = vmatprep.subr.bf16.mxu1 %v8848_v48  ;;  %v628_v47 = vld [vmem:[#allocation5 + $0x1160] sm:$0xff]  ;;  %v625_v48 = vld [vmem:[#allocation5 + $0x1148] sm:$0xff] }
 0x146   :  { %v8902_v54 = vcombine.high %v624_v46, %v628_v47  ;;  %v8901_v28 = vcombine.low %v624_v46, %v628_v47  ;;  %v8903_v1 = vcombine.low %v625_v48, %v629_v49 }
 0x148   :  { %6484 = vmatpush1.bf16.msra.mxu0 %v8845_v56  ;;  %6812 = vmatpush1.bf16.msra.mxu1 %v8847_v57  ;;  %v8904_v56 = vcombine.high %v625_v48, %v629_v49  ;;  %v632_v57 = vld [vmem:[#allocation5 + $0x1180] sm:$0xff] }
 0x149   :  { %6485 = vmatprep.subr.bf16.mxu0 %v8854_v58  ;;  %6813 = vmatprep.subr.bf16.mxu1 %v8856_v60  ;;  %v636_v58 = vld [vmem:[#allocation5 + $0x11a0] sm:$0xff]  ;;  %v633_v60 = vld [vmem:[#allocation5 + $0x1188] sm:$0xff] }
 0x14a   :  { %v8910_v2 = vcombine.high %v632_v57, %v636_v58  ;;  %v8909_v8 = vcombine.low %v632_v57, %v636_v58  ;;  %v8911_v10 = vcombine.low %v633_v60, %v637_v61 }
 0x14c   :  { %6486 = vmatpush1.bf16.msra.mxu0 %v8853_v3  ;;  %6814 = vmatpush1.bf16.msra.mxu1 %v8855_v4  ;;  %v8912_v3 = vcombine.high %v633_v60, %v637_v61  ;;  %v640_v4 = vld [vmem:[#allocation5 + $0x11c0] sm:$0xff] }
 0x14d   :  { %6496 = vmatprep.subr.bf16.mxu0 %v8862_v5  ;;  %6824 = vmatprep.subr.bf16.mxu1 %v8864_v6  ;;  %v644_v5 = vld [vmem:[#allocation5 + $0x11e0] sm:$0xff]  ;;  %v641_v6 = vld [vmem:[#allocation5 + $0x11c8] sm:$0xff] }
 0x14e   :  { %v8918_v12 = vcombine.high %v640_v4, %v644_v5  ;;  %v8920_v13 = vcombine.high %v641_v6, %v645_v7  ;;  %v8917_v18 = vcombine.low %v640_v4, %v644_v5  ;;  %v8919_v19 = vcombine.low %v641_v6, %v645_v7 }
 0x14f   :  { %6488 = vmatmul.mubr.bf16.vlgmr.msra.gmra.mrb[0].mxu0 %v9982_v11  ;;  %6816 = vmatmul.mubr.bf16.vlgmr.msra.gmra.mrb[0].mxu1 %v9982_v11 }
 0x150   :  { %6497 = vmatpush1.bf16.msra.mxu0 %v8861_v14  ;;  %6825 = vmatpush1.bf16.msra.mxu1 %v8863_v15  ;;  %v648_v14 = vld [vmem:[#allocation5 + $0x1200] sm:$0xff] }
 0x151   :  { %6498 = vmatprep.subr.bf16.mxu0 %v8870_v16  ;;  %6826 = vmatprep.subr.bf16.mxu1 %v8872_v17  ;;  %v652_v15 = vld [vmem:[#allocation5 + $0x1220] sm:$0xff]  ;;  %v649_v16 = vld [vmem:[#allocation5 + $0x1208] sm:$0xff] }
 0x152   :  { %6528 = vmatprep.mubr.bf16.mxu0 %v9985_v20  ;;  %6856 = vmatprep.mubr.bf16.mxu1 %v9985_v20  ;;  %v653_v17 = vld [vmem:[#allocation5 + $0x1228] sm:$0xff]  ;;  %v8926_v21 = vcombine.high %v648_v14, %v652_v15  ;;  %v8925_v29 = vcombine.low %v648_v14, %v652_v15 }
 0x153   :  { %v8928_v23 = vcombine.high %v649_v16, %v653_v17  ;;  %v8927_v59 = vcombine.low %v649_v16, %v653_v17 }
 0x154   :  { %6499 = vmatpush1.bf16.msra.mxu0 %v8869_v24  ;;  %6827 = vmatpush1.bf16.msra.mxu1 %v8871_v25  ;;  %v656_v24 = vld [vmem:[#allocation5 + $0x1240] sm:$0xff] }
 0x155   :  { %6500 = vmatprep.subr.bf16.mxu0 %v8878_v26  ;;  %6828 = vmatprep.subr.bf16.mxu1 %v8880_v27  ;;  %v660_v25 = vld [vmem:[#allocation5 + $0x1260] sm:$0xff]  ;;  %v657_v26 = vld [vmem:[#allocation5 + $0x1248] sm:$0xff] }
 0x156   :  { %v661_v27 = vld [vmem:[#allocation5 + $0x1268] sm:$0xff]  ;;  %v8934_v30 = vcombine.high %v656_v24, %v660_v25  ;;  %v8933_v36 = vcombine.low %v656_v24, %v660_v25 }
 0x157   :  { %v8936_v31 = vcombine.high %v657_v26, %v661_v27  ;;  %v8935_v38 = vcombine.low %v657_v26, %v661_v27 }
 0x158   :  { %6501 = vmatpush1.bf16.msra.mxu0 %v8877_v32  ;;  %6829 = vmatpush1.bf16.msra.mxu1 %v8879_v63  ;;  %v664_v32 = vld [vmem:[#allocation5 + $0x1280] sm:$0xff] }
 0x159   :  { %6502 = vmatprep.subr.bf16.mxu0 %v8886_v34  ;;  %6830 = vmatprep.subr.bf16.mxu1 %v8888_v35  ;;  %v668_v63 = vld [vmem:[#allocation5 + $0x12a0] sm:$0xff]  ;;  %v665_v34 = vld [vmem:[#allocation5 + $0x1288] sm:$0xff] }
 0x15a   :  { %v669_v35 = vld [vmem:[#allocation5 + $0x12a8] sm:$0xff]  ;;  %v8942_v39 = vcombine.high %v664_v32, %v668_v63  ;;  %v8941_v46 = vcombine.low %v664_v32, %v668_v63 }
 0x15b   :  { %v8944_v40 = vcombine.high %v665_v34, %v669_v35  ;;  %v8943_v47 = vcombine.low %v665_v34, %v669_v35 }
 0x15c   :  { %6503 = vmatpush1.bf16.msra.mxu0 %v8885_v41  ;;  %6831 = vmatpush1.bf16.msra.mxu1 %v8887_v42  ;;  %v672_v41 = vld [vmem:[#allocation5 + $0x12c0] sm:$0xff] }
 0x15d   :  { %6504 = vmatprep.subr.bf16.mxu0 %v8894_v43  ;;  %6832 = vmatprep.subr.bf16.mxu1 %v8896_v45  ;;  %v676_v42 = vld [vmem:[#allocation5 + $0x12e0] sm:$0xff]  ;;  %v673_v43 = vld [vmem:[#allocation5 + $0x12c8] sm:$0xff] }
 0x15e   :  { %v677_v45 = vld [vmem:[#allocation5 + $0x12e8] sm:$0xff]  ;;  %v8950_v48 = vcombine.high %v672_v41, %v676_v42  ;;  %v8949_v57 = vcombine.low %v672_v41, %v676_v42 }
 0x15f   :  { %v8952_v49 = vcombine.high %v673_v43, %v677_v45  ;;  %v8951_v58 = vcombine.low %v673_v43, %v677_v45  ;;  %v725_v41 = vld [vmem:[#allocation5 + $0x1468] sm:$0xff] }
 0x160   :  { %6505 = vmatpush1.bf16.msra.mxu0 %v8893_v50  ;;  %6833 = vmatpush1.bf16.msra.mxu1 %v8895_v52  ;;  %v680_v50 = vld [vmem:[#allocation5 + $0x1300] sm:$0xff] }
 0x161   :  { %6506 = vmatprep.subr.bf16.mxu0 %v8902_v54  ;;  %6834 = vmatprep.subr.bf16.mxu1 %v8904_v56  ;;  %v684_v52 = vld [vmem:[#allocation5 + $0x1320] sm:$0xff]  ;;  %v681_v54 = vld [vmem:[#allocation5 + $0x1308] sm:$0xff] }
 0x162   :  { %v685_v56 = vld [vmem:[#allocation5 + $0x1328] sm:$0xff]  ;;  %v8958_v60 = vcombine.high %v680_v50, %v684_v52  ;;  %v8957_v4 = vcombine.low %v680_v50, %v684_v52 }
 0x163   :  { %v8960_v61 = vcombine.high %v681_v54, %v685_v56  ;;  %v8959_v5 = vcombine.low %v681_v54, %v685_v56  ;;  %v733_v50 = vld [vmem:[#allocation5 + $0x14a8] sm:$0xff] }
 0x164   :  { %6507 = vmatpush1.bf16.msra.mxu0 %v8901_v28  ;;  %6835 = vmatpush1.bf16.msra.mxu1 %v8903_v1  ;;  %v688_v28 = vld [vmem:[#allocation5 + $0x1340] sm:$0xff] }
 0x165   :  { %6508 = vmatprep.subr.bf16.mxu0 %v8910_v2  ;;  %6836 = vmatprep.subr.bf16.mxu1 %v8912_v3  ;;  %v692_v1 = vld [vmem:[#allocation5 + $0x1360] sm:$0xff]  ;;  %v689_v2 = vld [vmem:[#allocation5 + $0x1348] sm:$0xff] }
 0x166   :  { %v693_v3 = vld [vmem:[#allocation5 + $0x1368] sm:$0xff]  ;;  %v8966_v6 = vcombine.high %v688_v28, %v692_v1  ;;  %v8965_v14 = vcombine.low %v688_v28, %v692_v1 }
 0x167   :  { %v8968_v7 = vcombine.high %v689_v2, %v693_v3  ;;  %v8967_v15 = vcombine.low %v689_v2, %v693_v3  ;;  %v741_v28 = vld [vmem:[#allocation5 + $0x14e8] sm:$0xff] }
 0x168   :  { %6509 = vmatpush1.bf16.msra.mxu0 %v8909_v8  ;;  %6837 = vmatpush1.bf16.msra.mxu1 %v8911_v10  ;;  %v696_v8 = vld [vmem:[#allocation5 + $0x1380] sm:$0xff] }
 0x169   :  { %6510 = vmatprep.subr.bf16.mxu0 %v8918_v12  ;;  %6838 = vmatprep.subr.bf16.mxu1 %v8920_v13  ;;  %v700_v10 = vld [vmem:[#allocation5 + $0x13a0] sm:$0xff]  ;;  %v697_v12 = vld [vmem:[#allocation5 + $0x1388] sm:$0xff] }
 0x16a   :  { %v701_v13 = vld [vmem:[#allocation5 + $0x13a8] sm:$0xff]  ;;  %v8974_v16 = vcombine.high %v696_v8, %v700_v10  ;;  %v8973_v24 = vcombine.low %v696_v8, %v700_v10 }
 0x16b   :  { %v8976_v17 = vcombine.high %v697_v12, %v701_v13  ;;  %v8975_v25 = vcombine.low %v697_v12, %v701_v13  ;;  %v749_v8 = vld [vmem:[#allocation5 + $0x1528] sm:$0xff] }
 0x16c   :  { %6511 = vmatpush1.bf16.msra.mxu0 %v8917_v18  ;;  %6839 = vmatpush1.bf16.msra.mxu1 %v8919_v19  ;;  %v704_v18 = vld [vmem:[#allocation5 + $0x13c0] sm:$0xff] }
 0x16d   :  { %6512 = vmatprep.subr.bf16.mxu0 %v8926_v21  ;;  %6840 = vmatprep.subr.bf16.mxu1 %v8928_v23  ;;  %v708_v19 = vld [vmem:[#allocation5 + $0x13e0] sm:$0xff]  ;;  %v705_v21 = vld [vmem:[#allocation5 + $0x13c8] sm:$0xff] }
 0x16e   :  { %v709_v23 = vld [vmem:[#allocation5 + $0x13e8] sm:$0xff]  ;;  %v8982_v26 = vcombine.high %v704_v18, %v708_v19  ;;  %v8981_v32 = vcombine.low %v704_v18, %v708_v19 }
 0x16f   :  { %v8984_v27 = vcombine.high %v705_v21, %v709_v23  ;;  %v8983_v63 = vcombine.low %v705_v21, %v709_v23  ;;  %v757_v18 = vld [vmem:[#allocation5 + $0x1568] sm:$0xff] }
 0x170   :  { %6513 = vmatpush1.bf16.msra.mxu0 %v8925_v29  ;;  %6841 = vmatpush1.bf16.msra.mxu1 %v8927_v59  ;;  %v712_v29 = vld [vmem:[#allocation5 + $0x1400] sm:$0xff] }
 0x171   :  { %6514 = vmatprep.subr.bf16.mxu0 %v8934_v30  ;;  %6842 = vmatprep.subr.bf16.mxu1 %v8936_v31  ;;  %v716_v59 = vld [vmem:[#allocation5 + $0x1420] sm:$0xff]  ;;  %v713_v30 = vld [vmem:[#allocation5 + $0x1408] sm:$0xff] }
 0x172   :  { %v717_v31 = vld [vmem:[#allocation5 + $0x1428] sm:$0xff]  ;;  %v8990_v34 = vcombine.high %v712_v29, %v716_v59  ;;  %v8989_v42 = vcombine.low %v712_v29, %v716_v59 }
 0x173   :  { %v8992_v35 = vcombine.high %v713_v30, %v717_v31  ;;  %v8991_v43 = vcombine.low %v713_v30, %v717_v31  ;;  %v765_v29 = vld [vmem:[#allocation5 + $0x15a8] sm:$0xff] }
 0x174   :  { %6515 = vmatpush1.bf16.msra.mxu0 %v8933_v36  ;;  %6843 = vmatpush1.bf16.msra.mxu1 %v8935_v38  ;;  %v720_v36 = vld [vmem:[#allocation5 + $0x1440] sm:$0xff] }
 0x175   :  { %6516 = vmatprep.subr.bf16.mxu0 %v8942_v39  ;;  %6844 = vmatprep.subr.bf16.mxu1 %v8944_v40  ;;  %v724_v38 = vld [vmem:[#allocation5 + $0x1460] sm:$0xff]  ;;  %v9993_v39 = vrot.slane %v9976_v0, %v9915_v53  ;;  %v721_v40 = vld [vmem:[#allocation5 + $0x1448] sm:$0xff] }
 0x176   :  { %v8998_v45 = vcombine.high %v720_v36, %v724_v38  ;;  %v729_v0 = vld [vmem:[#allocation5 + $0x1488] sm:$0xff]  ;;  %v8997_v52 = vcombine.low %v720_v36, %v724_v38  ;;  %v8999_v54 = vcombine.low %v721_v40, %v725_v41 }
 0x177   :  { %v9007_v2 = vcombine.low %v729_v0, %v733_v50  ;;  %v773_v36 = vld [vmem:[#allocation5 + $0x15e8] sm:$0xff] }
 0x178   :  { %6517 = vmatpush1.bf16.msra.mxu0 %v8941_v46  ;;  %6845 = vmatpush1.bf16.msra.mxu1 %v8943_v47  ;;  %v9000_v46 = vcombine.high %v721_v40, %v725_v41  ;;  %v728_v47 = vld [vmem:[#allocation5 + $0x1480] sm:$0xff] }
 0x179   :  { %6518 = vmatprep.subr.bf16.mxu0 %v8950_v48  ;;  %6846 = vmatprep.subr.bf16.mxu1 %v8952_v49  ;;  %v732_v48 = vld [vmem:[#allocation5 + $0x14a0] sm:$0xff]  ;;  %v9997_v49 = vcombine.high %v9985_v20, %v9985_v20 }
 0x17a   :  { %v9006_v56 = vcombine.high %v728_v47, %v732_v48  ;;  %v9005_v1 = vcombine.low %v728_v47, %v732_v48  ;;  %v781_v47 = vld [vmem:[#allocation5 + $0x1628] sm:$0xff] }
 0x17c   :  { %6519 = vmatpush1.bf16.msra.mxu0 %v8949_v57  ;;  %6847 = vmatpush1.bf16.msra.mxu1 %v8951_v58  ;;  %v9008_v57 = vcombine.high %v729_v0, %v733_v50  ;;  %v736_v58 = vld [vmem:[#allocation5 + $0x14c0] sm:$0xff] }
 0x17d   :  { %6520 = vmatprep.subr.bf16.mxu0 %v8958_v60  ;;  %6848 = vmatprep.subr.bf16.mxu1 %v8960_v61  ;;  %v740_v60 = vld [vmem:[#allocation5 + $0x14e0] sm:$0xff]  ;;  %v737_v61 = vld [vmem:[#allocation5 + $0x14c8] sm:$0xff] }
 0x17e   :  { %v9014_v3 = vcombine.high %v736_v58, %v740_v60  ;;  %v9013_v10 = vcombine.low %v736_v58, %v740_v60  ;;  %v9015_v12 = vcombine.low %v737_v61, %v741_v28  ;;  %v789_v58 = vld [vmem:[#allocation5 + $0x1668] sm:$0xff] }
 0x180   :  { %6521 = vmatpush1.bf16.msra.mxu0 %v8957_v4  ;;  %6849 = vmatpush1.bf16.msra.mxu1 %v8959_v5  ;;  %v9016_v4 = vcombine.high %v737_v61, %v741_v28  ;;  %v744_v5 = vld [vmem:[#allocation5 + $0x1500] sm:$0xff] }
 0x181   :  { %6522 = vmatprep.subr.bf16.mxu0 %v8966_v6  ;;  %6850 = vmatprep.subr.bf16.mxu1 %v8968_v7  ;;  %v748_v6 = vld [vmem:[#allocation5 + $0x1520] sm:$0xff]  ;;  %v745_v7 = vld [vmem:[#allocation5 + $0x1508] sm:$0xff] }
 0x182   :  { %v9022_v13 = vcombine.high %v744_v5, %v748_v6  ;;  %v9021_v19 = vcombine.low %v744_v5, %v748_v6  ;;  %v9023_v21 = vcombine.low %v745_v7, %v749_v8  ;;  %v797_v5 = vld [vmem:[#allocation5 + $0x16a8] sm:$0xff] }
 0x184   :  { %6523 = vmatpush1.bf16.msra.mxu0 %v8965_v14  ;;  %6851 = vmatpush1.bf16.msra.mxu1 %v8967_v15  ;;  %v9024_v14 = vcombine.high %v745_v7, %v749_v8  ;;  %v752_v15 = vld [vmem:[#allocation5 + $0x1540] sm:$0xff] }
 0x185   :  { %6524 = vmatprep.subr.bf16.mxu0 %v8974_v16  ;;  %6852 = vmatprep.subr.bf16.mxu1 %v8976_v17  ;;  %v756_v16 = vld [vmem:[#allocation5 + $0x1560] sm:$0xff]  ;;  %v753_v17 = vld [vmem:[#allocation5 + $0x1548] sm:$0xff] }
 0x186   :  { %v9030_v23 = vcombine.high %v752_v15, %v756_v16  ;;  %v9029_v59 = vcombine.low %v752_v15, %v756_v16  ;;  %v9031_v30 = vcombine.low %v753_v17, %v757_v18  ;;  %v805_v15 = vld [vmem:[#allocation5 + $0x16e8] sm:$0xff] }
 0x188   :  { %6525 = vmatpush1.bf16.msra.mxu0 %v8973_v24  ;;  %6853 = vmatpush1.bf16.msra.mxu1 %v8975_v25  ;;  %v9032_v24 = vcombine.high %v753_v17, %v757_v18  ;;  %v760_v25 = vld [vmem:[#allocation5 + $0x1580] sm:$0xff] }
 0x189   :  { %6526 = vmatprep.subr.bf16.mxu0 %v8982_v26  ;;  %6854 = vmatprep.subr.bf16.mxu1 %v8984_v27  ;;  %v764_v26 = vld [vmem:[#allocation5 + $0x15a0] sm:$0xff]  ;;  %v761_v27 = vld [vmem:[#allocation5 + $0x1588] sm:$0xff] }
 0x18a   :  { %v9038_v31 = vcombine.high %v760_v25, %v764_v26  ;;  %v9037_v38 = vcombine.low %v760_v25, %v764_v26  ;;  %v9039_v40 = vcombine.low %v761_v27, %v765_v29  ;;  %v813_v25 = vld [vmem:[#allocation5 + $0x1728] sm:$0xff] }
 0x18c   :  { %6527 = vmatpush1.bf16.msra.mxu0 %v8981_v32  ;;  %6855 = vmatpush1.bf16.msra.mxu1 %v8983_v63  ;;  %v9040_v32 = vcombine.high %v761_v27, %v765_v29  ;;  %v768_v63 = vld [vmem:[#allocation5 + $0x15c0] sm:$0xff] }
 0x18d   :  { %6537 = vmatprep.subr.bf16.mxu0 %v8990_v34  ;;  %6865 = vmatprep.subr.bf16.mxu1 %v8992_v35  ;;  %v772_v34 = vld [vmem:[#allocation5 + $0x15e0] sm:$0xff]  ;;  %v769_v35 = vld [vmem:[#allocation5 + $0x15c8] sm:$0xff] }
 0x18e   :  { %v9046_v41 = vcombine.high %v768_v63, %v772_v34  ;;  %v9045_v48 = vcombine.low %v768_v63, %v772_v34  ;;  %v9047_v0 = vcombine.low %v769_v35, %v773_v36  ;;  %v821_v63 = vld [vmem:[#allocation5 + $0x1768] sm:$0xff] }
 0x18f   :  { %6529 = vmatmul.mubr.bf16.vlgmr.msra.gmra.mrb[0].mxu0 %v9993_v39  ;;  %6857 = vmatmul.mubr.bf16.vlgmr.msra.gmra.mrb[0].mxu1 %v9993_v39 }
 0x190   :  { %6538 = vmatpush1.bf16.msra.mxu0 %v8989_v42  ;;  %6866 = vmatpush1.bf16.msra.mxu1 %v8991_v43  ;;  %v9048_v42 = vcombine.high %v769_v35, %v773_v36  ;;  %v776_v43 = vld [vmem:[#allocation5 + $0x1600] sm:$0xff] }
 0x191   :  { %6539 = vmatprep.subr.bf16.mxu0 %v8998_v45  ;;  %6867 = vmatprep.subr.bf16.mxu1 %v9000_v46  ;;  %v780_v45 = vld [vmem:[#allocation5 + $0x1620] sm:$0xff]  ;;  %v777_v46 = vld [vmem:[#allocation5 + $0x1608] sm:$0xff] }
 0x192   :  { %6569 = vmatprep.mubr.bf16.mxu0 %v9997_v49  ;;  %6897 = vmatprep.mubr.bf16.mxu1 %v9997_v49  ;;  %v9054_v50 = vcombine.high %v776_v43, %v780_v45  ;;  %v9053_v60 = vcombine.low %v776_v43, %v780_v45  ;;  %v9055_v61 = vcombine.low %v777_v46, %v781_v47  ;;  %v829_v43 = vld [vmem:[#allocation5 + $0x17a8] sm:$0xff] }
 0x194   :  { %6540 = vmatpush1.bf16.msra.mxu0 %v8997_v52  ;;  %6868 = vmatpush1.bf16.msra.mxu1 %v8999_v54  ;;  %v9056_v52 = vcombine.high %v777_v46, %v781_v47  ;;  %v784_v54 = vld [vmem:[#allocation5 + $0x1640] sm:$0xff] }
 0x195   :  { %6541 = vmatprep.subr.bf16.mxu0 %v9006_v56  ;;  %6869 = vmatprep.subr.bf16.mxu1 %v9008_v57  ;;  %v788_v56 = vld [vmem:[#allocation5 + $0x1660] sm:$0xff]  ;;  %v785_v57 = vld [vmem:[#allocation5 + $0x1648] sm:$0xff] }
 0x196   :  { %v9062_v28 = vcombine.high %v784_v54, %v788_v56  ;;  %v9061_v6 = vcombine.low %v784_v54, %v788_v56  ;;  %v9063_v7 = vcombine.low %v785_v57, %v789_v58  ;;  %v833_v54 = vld [vmem:[#allocation5 + $0x17c8] sm:$0xff] }
 0x197   :  { %v837_v56 = vld [vmem:[#allocation5 + $0x17e8] sm:$0xff] }
 0x198   :  { %6542 = vmatpush1.bf16.msra.mxu0 %v9005_v1  ;;  %6870 = vmatpush1.bf16.msra.mxu1 %v9007_v2  ;;  %v9064_v1 = vcombine.high %v785_v57, %v789_v58  ;;  %v792_v2 = vld [vmem:[#allocation5 + $0x1680] sm:$0xff] }
 0x199   :  { %6543 = vmatprep.subr.bf16.mxu0 %v9014_v3  ;;  %6871 = vmatprep.subr.bf16.mxu1 %v9016_v4  ;;  %v796_v3 = vld [vmem:[#allocation5 + $0x16a0] sm:$0xff]  ;;  %v793_v4 = vld [vmem:[#allocation5 + $0x1688] sm:$0xff] }
 0x19a   :  { %v9070_v8 = vcombine.high %v792_v2, %v796_v3  ;;  %v9069_v16 = vcombine.low %v792_v2, %v796_v3  ;;  %v9071_v17 = vcombine.low %v793_v4, %v797_v5  ;;  %v841_v3 = vld [vmem:[#allocation5 + $0x1808] sm:$0xff] }
 0x19c   :  { %6544 = vmatpush1.bf16.msra.mxu0 %v9013_v10  ;;  %6872 = vmatpush1.bf16.msra.mxu1 %v9015_v12  ;;  %v9072_v10 = vcombine.high %v793_v4, %v797_v5  ;;  %v800_v12 = vld [vmem:[#allocation5 + $0x16c0] sm:$0xff]  ;;  %v845_v4 = vld [vmem:[#allocation5 + $0x1828] sm:$0xff] }
 0x19d   :  { %6545 = vmatprep.subr.bf16.mxu0 %v9022_v13  ;;  %6873 = vmatprep.subr.bf16.mxu1 %v9024_v14  ;;  %v804_v13 = vld [vmem:[#allocation5 + $0x16e0] sm:$0xff]  ;;  %v801_v14 = vld [vmem:[#allocation5 + $0x16c8] sm:$0xff] }
 0x19e   :  { %v9078_v18 = vcombine.high %v800_v12, %v804_v13  ;;  %v9077_v26 = vcombine.low %v800_v12, %v804_v13  ;;  %v9079_v27 = vcombine.low %v801_v14, %v805_v15  ;;  %v10012_v13 = vcombine.high %v9993_v39, %v9993_v39 }
 0x1a0   :  { %6546 = vmatpush1.bf16.msra.mxu0 %v9021_v19  ;;  %6874 = vmatpush1.bf16.msra.mxu1 %v9023_v21  ;;  %v9080_v19 = vcombine.high %v801_v14, %v805_v15  ;;  %v808_v21 = vld [vmem:[#allocation5 + $0x1700] sm:$0xff]  ;;  %v849_v14 = vld [vmem:[#allocation5 + $0x1848] sm:$0xff] }
 0x1a1   :  { %6547 = vmatprep.subr.bf16.mxu0 %v9030_v23  ;;  %6875 = vmatprep.subr.bf16.mxu1 %v9032_v24  ;;  %v812_v23 = vld [vmem:[#allocation5 + $0x1720] sm:$0xff]  ;;  %v809_v24 = vld [vmem:[#allocation5 + $0x1708] sm:$0xff] }
 0x1a2   :  { %v9086_v29 = vcombine.high %v808_v21, %v812_v23  ;;  %v9085_v34 = vcombine.low %v808_v21, %v812_v23  ;;  %v9087_v35 = vcombine.low %v809_v24, %v813_v25  ;;  %v853_v15 = vld [vmem:[#allocation5 + $0x1868] sm:$0xff]  ;;  %v856_v21 = vld [vmem:[#allocation5 + $0x1880] sm:$0xff] }
 0x1a3   :  { %v860_v23 = vld [vmem:[#allocation5 + $0x18a0] sm:$0xff] }
 0x1a4   :  { %6548 = vmatpush1.bf16.msra.mxu0 %v9029_v59  ;;  %6876 = vmatpush1.bf16.msra.mxu1 %v9031_v30  ;;  %v9088_v59 = vcombine.high %v809_v24, %v813_v25  ;;  %v816_v30 = vld [vmem:[#allocation5 + $0x1740] sm:$0xff]  ;;  %v857_v25 = vld [vmem:[#allocation5 + $0x1888] sm:$0xff] }
 0x1a5   :  { %6549 = vmatprep.subr.bf16.mxu0 %v9038_v31  ;;  %6877 = vmatprep.subr.bf16.mxu1 %v9040_v32  ;;  %v820_v31 = vld [vmem:[#allocation5 + $0x1760] sm:$0xff]  ;;  %v817_v32 = vld [vmem:[#allocation5 + $0x1748] sm:$0xff] }
 0x1a6   :  { %v9094_v36 = vcombine.high %v816_v30, %v820_v31  ;;  %v9093_v45 = vcombine.low %v816_v30, %v820_v31  ;;  %v9095_v46 = vcombine.low %v817_v32, %v821_v63  ;;  %v864_v31 = vld [vmem:[#allocation5 + $0x18c0] sm:$0xff] }
 0x1a8   :  { %6550 = vmatpush1.bf16.msra.mxu0 %v9037_v38  ;;  %6878 = vmatpush1.bf16.msra.mxu1 %v9039_v40  ;;  %v9096_v38 = vcombine.high %v817_v32, %v821_v63  ;;  %v824_v40 = vld [vmem:[#allocation5 + $0x1780] sm:$0xff]  ;;  %v865_v63 = vld [vmem:[#allocation5 + $0x18c8] sm:$0xff] }
 0x1a9   :  { %6551 = vmatprep.subr.bf16.mxu0 %v9046_v41  ;;  %6879 = vmatprep.subr.bf16.mxu1 %v9048_v42  ;;  %v828_v41 = vld [vmem:[#allocation5 + $0x17a0] sm:$0xff]  ;;  %v825_v42 = vld [vmem:[#allocation5 + $0x1788] sm:$0xff] }
 0x1aa   :  { %v9102_v47 = vcombine.high %v824_v40, %v828_v41  ;;  %v9101_v57 = vcombine.low %v824_v40, %v828_v41  ;;  %v9103_v58 = vcombine.low %v825_v42, %v829_v43  ;;  %v868_v32 = vld [vmem:[#allocation5 + $0x18e0] sm:$0xff] }
 0x1ab   :  { %v872_v41 = vld [vmem:[#allocation5 + $0x1900] sm:$0xff] }
 0x1ac   :  { %6552 = vmatpush1.bf16.msra.mxu0 %v9045_v48  ;;  %6880 = vmatpush1.bf16.msra.mxu1 %v9047_v0  ;;  %v9104_v48 = vcombine.high %v825_v42, %v829_v43  ;;  %v832_v0 = vld [vmem:[#allocation5 + $0x17c0] sm:$0xff]  ;;  %v873_v43 = vld [vmem:[#allocation5 + $0x1908] sm:$0xff] }
 0x1ad   :  { %6553 = vmatprep.subr.bf16.mxu0 %v9054_v50  ;;  %6881 = vmatprep.subr.bf16.mxu1 %v9056_v52  ;;  %v836_v50 = vld [vmem:[#allocation5 + $0x17e0] sm:$0xff]  ;;  %v1147_v52 = vcombine.high %v9972_v55, %v9972_v55  ;;  %v9111_v55 = vcombine.low %v833_v54, %v837_v56 }
 0x1ae   :  { %v9109_v5 = vcombine.low %v832_v0, %v836_v50  ;;  %v876_v42 = vld [vmem:[#allocation5 + $0x1920] sm:$0xff] }
 0x1af   :  { %v10006_v2 = vrot.slane %v1147_v52, %v9915_v53  ;;  %v884_v52 = vld [vmem:[#allocation5 + $0x1960] sm:$0xff] }
 0x1b0   :  { %6554 = vmatpush1.bf16.msra.mxu0 %v9053_v60  ;;  %6882 = vmatpush1.bf16.msra.mxu1 %v9055_v61  ;;  %v9110_v60 = vcombine.high %v832_v0, %v836_v50  ;;  %v9112_v61 = vcombine.high %v833_v54, %v837_v56  ;;  %v880_v50 = vld [vmem:[#allocation5 + $0x1940] sm:$0xff]  ;;  %v881_v54 = vld [vmem:[#allocation5 + $0x1948] sm:$0xff] }
 0x1b1   :  { %6555 = vmatprep.subr.bf16.mxu0 %v9062_v28  ;;  %6883 = vmatprep.subr.bf16.mxu1 %v9064_v1  ;;  %v840_v28 = vld [vmem:[#allocation5 + $0x1800] sm:$0xff]  ;;  %v1163_v12 = vcombine.high %v10006_v2, %v10006_v2  ;;  %v885_v56 = vld [vmem:[#allocation5 + $0x1968] sm:$0xff] }
 0x1b2   :  { %v844_v1 = vld [vmem:[#allocation5 + $0x1820] sm:$0xff] }
 0x1b3   :  { %v10015_v24 = vrot.slane %v1163_v12, %v9915_v53  ;;  %v897_v12 = vld [vmem:[#allocation5 + $0x19c8] sm:$0xff] }
 0x1b4   :  { %6556 = vmatpush1.bf16.msra.mxu0 %v9061_v6  ;;  %6884 = vmatpush1.bf16.msra.mxu1 %v9063_v7  ;;  %v9118_v6 = vcombine.high %v840_v28, %v844_v1  ;;  %v9120_v7 = vcombine.high %v841_v3, %v845_v4 }
 0x1b5   :  { %6557 = vmatprep.subr.bf16.mxu0 %v9070_v8  ;;  %6885 = vmatprep.subr.bf16.mxu1 %v9072_v10  ;;  %v848_v8 = vld [vmem:[#allocation5 + $0x1840] sm:$0xff] }
 0x1b6   :  { %v852_v10 = vld [vmem:[#allocation5 + $0x1860] sm:$0xff] }
 0x1b8   :  { %6558 = vmatpush1.bf16.msra.mxu0 %v9069_v16  ;;  %6886 = vmatpush1.bf16.msra.mxu1 %v9071_v17  ;;  %v9117_v16 = vcombine.low %v840_v28, %v844_v1  ;;  %v9119_v17 = vcombine.low %v841_v3, %v845_v4  ;;  %v888_v28 = vld [vmem:[#allocation5 + $0x1980] sm:$0xff]  ;;  %v889_v3 = vld [vmem:[#allocation5 + $0x1988] sm:$0xff] }
 0x1b9   :  { %6559 = vmatprep.subr.bf16.mxu0 %v9078_v18  ;;  %6887 = vmatprep.subr.bf16.mxu1 %v9080_v19  ;;  %v9126_v18 = vcombine.high %v848_v8, %v852_v10  ;;  %v9128_v19 = vcombine.high %v849_v14, %v853_v15  ;;  %v892_v1 = vld [vmem:[#allocation5 + $0x19a0] sm:$0xff]  ;;  %v893_v4 = vld [vmem:[#allocation5 + $0x19a8] sm:$0xff] }
 0x1bc   :  { %6560 = vmatpush1.bf16.msra.mxu0 %v9077_v26  ;;  %6888 = vmatpush1.bf16.msra.mxu1 %v9079_v27  ;;  %v861_v26 = vld [vmem:[#allocation5 + $0x18a8] sm:$0xff]  ;;  %v9125_v27 = vcombine.low %v848_v8, %v852_v10  ;;  %v896_v8 = vld [vmem:[#allocation5 + $0x19c0] sm:$0xff] }
 0x1bd   :  { %6561 = vmatprep.subr.bf16.mxu0 %v9086_v29  ;;  %6889 = vmatprep.subr.bf16.mxu1 %v9088_v59  ;;  %v9127_v29 = vcombine.low %v849_v14, %v853_v15  ;;  %v9134_v59 = vcombine.high %v856_v21, %v860_v23  ;;  %v9136_v30 = vcombine.high %v857_v25, %v861_v26  ;;  %v900_v10 = vld [vmem:[#allocation5 + $0x19e0] sm:$0xff]  ;;  %v901_v14 = vld [vmem:[#allocation5 + $0x19e8] sm:$0xff] }
 0x1be   :  { %v9165_v15 = vcombine.low %v888_v28, %v892_v1 }
 0x1c0   :  { %6562 = vmatpush1.bf16.msra.mxu0 %v9085_v34  ;;  %6890 = vmatpush1.bf16.msra.mxu1 %v9087_v35  ;;  %v869_v34 = vld [vmem:[#allocation5 + $0x18e8] sm:$0xff]  ;;  %v9133_v35 = vcombine.low %v856_v21, %v860_v23  ;;  %v908_v21 = vld [vmem:[#allocation5 + $0x1a20] sm:$0xff] }
 0x1c1   :  { %6563 = vmatprep.subr.bf16.mxu0 %v9094_v36  ;;  %6891 = vmatprep.subr.bf16.mxu1 %v9096_v38  ;;  %v9135_v36 = vcombine.low %v857_v25, %v861_v26  ;;  %v9142_v38 = vcombine.high %v864_v31, %v868_v32  ;;  %v9144_v40 = vcombine.high %v865_v63, %v869_v34  ;;  %v905_v23 = vld [vmem:[#allocation5 + $0x1a08] sm:$0xff] }
 0x1c2   :  { %v909_v25 = vld [vmem:[#allocation5 + $0x1a28] sm:$0xff]  ;;  %v9173_v26 = vcombine.low %v896_v8, %v900_v10 }
 0x1c4   :  { %6564 = vmatpush1.bf16.msra.mxu0 %v9093_v45  ;;  %6892 = vmatpush1.bf16.msra.mxu1 %v9095_v46  ;;  %v877_v45 = vld [vmem:[#allocation5 + $0x1928] sm:$0xff]  ;;  %v9141_v46 = vcombine.low %v864_v31, %v868_v32  ;;  %v916_v31 = vld [vmem:[#allocation5 + $0x1a60] sm:$0xff] }
 0x1c5   :  { %6565 = vmatprep.subr.bf16.mxu0 %v9102_v47  ;;  %6893 = vmatprep.subr.bf16.mxu1 %v9104_v48  ;;  %v9143_v47 = vcombine.low %v865_v63, %v869_v34  ;;  %v9150_v48 = vcombine.high %v872_v41, %v876_v42  ;;  %v9152_v0 = vcombine.high %v873_v43, %v877_v45  ;;  %v913_v32 = vld [vmem:[#allocation5 + $0x1a48] sm:$0xff] }
 0x1c6   :  { %v917_v63 = vld [vmem:[#allocation5 + $0x1a68] sm:$0xff] }
 0x1c8   :  { %6566 = vmatpush1.bf16.msra.mxu0 %v9101_v57  ;;  %6894 = vmatpush1.bf16.msra.mxu1 %v9103_v58  ;;  %v9149_v57 = vcombine.low %v872_v41, %v876_v42  ;;  %v9151_v58 = vcombine.low %v873_v43, %v877_v45  ;;  %v924_v41 = vld [vmem:[#allocation5 + $0x1aa0] sm:$0xff]  ;;  %v921_v42 = vld [vmem:[#allocation5 + $0x1a88] sm:$0xff] }
 0x1c9   :  { %6567 = vmatprep.subr.bf16.mxu0 %v9110_v60  ;;  %6895 = vmatprep.subr.bf16.mxu1 %v9112_v61  ;;  %v9158_v60 = vcombine.high %v880_v50, %v884_v52  ;;  %v9160_v61 = vcombine.high %v881_v54, %v885_v56  ;;  %v925_v43 = vld [vmem:[#allocation5 + $0x1aa8] sm:$0xff] }
 0x1cc   :  { %6568 = vmatpush1.bf16.msra.mxu0 %v9109_v5  ;;  %6896 = vmatpush1.bf16.msra.mxu1 %v9111_v55  ;;  %v9157_v5 = vcombine.low %v880_v50, %v884_v52  ;;  %v9159_v55 = vcombine.low %v881_v54, %v885_v56  ;;  %v932_v50 = vld [vmem:[#allocation5 + $0x1ae0] sm:$0xff]  ;;  %v929_v52 = vld [vmem:[#allocation5 + $0x1ac8] sm:$0xff] }
 0x1cd   :  { %6578 = vmatprep.subr.bf16.mxu0 %v9118_v6  ;;  %6906 = vmatprep.subr.bf16.mxu1 %v9120_v7  ;;  %v9166_v6 = vcombine.high %v888_v28, %v892_v1  ;;  %v9168_v7 = vcombine.high %v889_v3, %v893_v4  ;;  %v933_v54 = vld [vmem:[#allocation5 + $0x1ae8] sm:$0xff]  ;;  %v940_v28 = vld [vmem:[#allocation5 + $0x1b20] sm:$0xff] }
 0x1ce   :  { %v937_v1 = vld [vmem:[#allocation5 + $0x1b08] sm:$0xff] }
 0x1cf   :  { %6570 = vmatmul.mubr.bf16.vlgmr.msra.gmra.mrb[0].mxu0 %v10012_v13  ;;  %6898 = vmatmul.mubr.bf16.vlgmr.msra.gmra.mrb[0].mxu1 %v10012_v13 }
 0x1d0   :  { %6579 = vmatpush1.bf16.msra.mxu0 %v9117_v16  ;;  %6907 = vmatpush1.bf16.msra.mxu1 %v9119_v17  ;;  %v9167_v16 = vcombine.low %v889_v3, %v893_v4  ;;  %v9174_v17 = vcombine.high %v896_v8, %v900_v10  ;;  %v941_v3 = vld [vmem:[#allocation5 + $0x1b28] sm:$0xff]  ;;  %v948_v8 = vld [vmem:[#allocation5 + $0x1b60] sm:$0xff] }
 0x1d1   :  { %6580 = vmatprep.subr.bf16.mxu0 %v9126_v18  ;;  %6908 = vmatprep.subr.bf16.mxu1 %v9128_v19  ;;  %v9176_v18 = vcombine.high %v897_v12, %v901_v14  ;;  %v904_v19 = vld [vmem:[#allocation5 + $0x1a00] sm:$0xff]  ;;  %v945_v10 = vld [vmem:[#allocation5 + $0x1b48] sm:$0xff] }
 0x1d2   :  { %6610 = vmatprep.mubr.bf16.mxu0 %v10015_v24  ;;  %6938 = vmatprep.mubr.bf16.mxu1 %v10015_v24  ;;  %v9181_v34 = vcombine.low %v904_v19, %v908_v21 }
 0x1d4   :  { %6581 = vmatpush1.bf16.msra.mxu0 %v9125_v27  ;;  %6909 = vmatpush1.bf16.msra.mxu1 %v9127_v29  ;;  %v9175_v27 = vcombine.low %v897_v12, %v901_v14  ;;  %v9182_v29 = vcombine.high %v904_v19, %v908_v21  ;;  %v949_v12 = vld [vmem:[#allocation5 + $0x1b68] sm:$0xff]  ;;  %v956_v19 = vld [vmem:[#allocation5 + $0x1ba0] sm:$0xff] }
 0x1d5   :  { %6582 = vmatprep.subr.bf16.mxu0 %v9134_v59  ;;  %6910 = vmatprep.subr.bf16.mxu1 %v9136_v30  ;;  %v9184_v59 = vcombine.high %v905_v23, %v909_v25  ;;  %v912_v30 = vld [vmem:[#allocation5 + $0x1a40] sm:$0xff]  ;;  %v953_v21 = vld [vmem:[#allocation5 + $0x1b88] sm:$0xff] }
 0x1d6   :  { %v9189_v45 = vcombine.low %v912_v30, %v916_v31 }
 0x1d8   :  { %6583 = vmatpush1.bf16.msra.mxu0 %v9133_v35  ;;  %6911 = vmatpush1.bf16.msra.mxu1 %v9135_v36  ;;  %v9183_v35 = vcombine.low %v905_v23, %v909_v25  ;;  %v9190_v36 = vcombine.high %v912_v30, %v916_v31  ;;  %v957_v23 = vld [vmem:[#allocation5 + $0x1ba8] sm:$0xff]  ;;  %v964_v30 = vld [vmem:[#allocation5 + $0x1be0] sm:$0xff] }
 0x1d9   :  { %6584 = vmatprep.subr.bf16.mxu0 %v9142_v38  ;;  %6912 = vmatprep.subr.bf16.mxu1 %v9144_v40  ;;  %v9192_v38 = vcombine.high %v913_v32, %v917_v63  ;;  %v920_v40 = vld [vmem:[#allocation5 + $0x1a80] sm:$0xff]  ;;  %v961_v31 = vld [vmem:[#allocation5 + $0x1bc8] sm:$0xff] }
 0x1da   :  { %v9197_v56 = vcombine.low %v920_v40, %v924_v41 }
 0x1dc   :  { %6585 = vmatpush1.bf16.msra.mxu0 %v9141_v46  ;;  %6913 = vmatpush1.bf16.msra.mxu1 %v9143_v47  ;;  %v9191_v46 = vcombine.low %v913_v32, %v917_v63  ;;  %v9198_v47 = vcombine.high %v920_v40, %v924_v41  ;;  %v965_v32 = vld [vmem:[#allocation5 + $0x1be8] sm:$0xff]  ;;  %v972_v40 = vld [vmem:[#allocation5 + $0x1c20] sm:$0xff] }
 0x1dd   :  { %6586 = vmatprep.subr.bf16.mxu0 %v9150_v48  ;;  %6914 = vmatprep.subr.bf16.mxu1 %v9152_v0  ;;  %v9200_v48 = vcombine.high %v921_v42, %v925_v43  ;;  %v928_v0 = vld [vmem:[#allocation5 + $0x1ac0] sm:$0xff]  ;;  %v969_v41 = vld [vmem:[#allocation5 + $0x1c08] sm:$0xff] }
 0x1de   :  { %v9205_v4 = vcombine.low %v928_v0, %v932_v50 }
 0x1e0   :  { %6587 = vmatpush1.bf16.msra.mxu0 %v9149_v57  ;;  %6915 = vmatpush1.bf16.msra.mxu1 %v9151_v58  ;;  %v9199_v57 = vcombine.low %v921_v42, %v925_v43  ;;  %v9206_v58 = vcombine.high %v928_v0, %v932_v50  ;;  %v973_v42 = vld [vmem:[#allocation5 + $0x1c28] sm:$0xff]  ;;  %v980_v0 = vld [vmem:[#allocation5 + $0x1c60] sm:$0xff]  ;;  %v10023_v50 = vrot.slane %v10006_v2, %v9915_v53 }
 0x1e1   :  { %6588 = vmatprep.subr.bf16.mxu0 %v9158_v60  ;;  %6916 = vmatprep.subr.bf16.mxu1 %v9160_v61  ;;  %v9208_v60 = vcombine.high %v929_v52, %v933_v54  ;;  %v936_v61 = vld [vmem:[#allocation5 + $0x1b00] sm:$0xff]  ;;  %v985_v53 = vld [vmem:[#allocation5 + $0x1c88] sm:$0xff] }
 0x1e2   :  { %v9213_v14 = vcombine.low %v936_v61, %v940_v28  ;;  %v989_v2 = vld [vmem:[#allocation5 + $0x1ca8] sm:$0xff] }
 0x1e4   :  { %6589 = vmatpush1.bf16.msra.mxu0 %v9157_v5  ;;  %6917 = vmatpush1.bf16.msra.mxu1 %v9159_v55  ;;  %v9207_v5 = vcombine.low %v929_v52, %v933_v54  ;;  %v9214_v55 = vcombine.high %v936_v61, %v940_v28  ;;  %v977_v52 = vld [vmem:[#allocation5 + $0x1c48] sm:$0xff]  ;;  %v984_v61 = vld [vmem:[#allocation5 + $0x1c80] sm:$0xff] }
 0x1e5   :  { %6590 = vmatprep.subr.bf16.mxu0 %v9166_v6  ;;  %6918 = vmatprep.subr.bf16.mxu1 %v9168_v7  ;;  %v9216_v6 = vcombine.high %v937_v1, %v941_v3  ;;  %v944_v7 = vld [vmem:[#allocation5 + $0x1b40] sm:$0xff]  ;;  %v981_v54 = vld [vmem:[#allocation5 + $0x1c68] sm:$0xff] }
 0x1e6   :  { %v9221_v25 = vcombine.low %v944_v7, %v948_v8  ;;  %v988_v28 = vld [vmem:[#allocation5 + $0x1ca0] sm:$0xff] }
 0x1e8   :  { %6591 = vmatpush1.bf16.msra.mxu0 %v9165_v15  ;;  %6919 = vmatpush1.bf16.msra.mxu1 %v9167_v16  ;;  %v9215_v15 = vcombine.low %v937_v1, %v941_v3  ;;  %v9222_v16 = vcombine.high %v944_v7, %v948_v8  ;;  %v10027_v1 = vcombine.high %v10015_v24, %v10015_v24  ;;  %v996_v7 = vld [vmem:[#allocation5 + $0x1ce0] sm:$0xff]  ;;  %v993_v8 = vld [vmem:[#allocation5 + $0x1cc8] sm:$0xff] }
 0x1e9   :  { %6592 = vmatprep.subr.bf16.mxu0 %v9174_v17  ;;  %6920 = vmatprep.subr.bf16.mxu1 %v9176_v18  ;;  %v9224_v17 = vcombine.high %v945_v10, %v949_v12  ;;  %v952_v18 = vld [vmem:[#allocation5 + $0x1b80] sm:$0xff] }
 0x1ea   :  { %v9229_v63 = vcombine.low %v952_v18, %v956_v19 }
 0x1ec   :  { %6593 = vmatpush1.bf16.msra.mxu0 %v9173_v26  ;;  %6921 = vmatpush1.bf16.msra.mxu1 %v9175_v27  ;;  %v9223_v26 = vcombine.low %v945_v10, %v949_v12  ;;  %v9230_v27 = vcombine.high %v952_v18, %v956_v19  ;;  %v997_v10 = vld [vmem:[#allocation5 + $0x1ce8] sm:$0xff]  ;;  %v9261_v12 = vcombine.low %v984_v61, %v988_v28  ;;  %v1004_v18 = vld [vmem:[#allocation5 + $0x1d20] sm:$0xff] }
 0x1ed   :  { %6594 = vmatprep.subr.bf16.mxu0 %v9182_v29  ;;  %6922 = vmatprep.subr.bf16.mxu1 %v9184_v59  ;;  %v9232_v29 = vcombine.high %v953_v21, %v957_v23  ;;  %v960_v59 = vld [vmem:[#allocation5 + $0x1bc0] sm:$0xff]  ;;  %v1001_v19 = vld [vmem:[#allocation5 + $0x1d08] sm:$0xff] }
 0x1ee   :  { %v9237_v43 = vcombine.low %v960_v59, %v964_v30 }
 0x1f0   :  { %6595 = vmatpush1.bf16.msra.mxu0 %v9181_v34  ;;  %6923 = vmatpush1.bf16.msra.mxu1 %v9183_v35  ;;  %v9231_v34 = vcombine.low %v953_v21, %v957_v23  ;;  %v9238_v35 = vcombine.high %v960_v59, %v964_v30  ;;  %v1005_v21 = vld [vmem:[#allocation5 + $0x1d28] sm:$0xff]  ;;  %v1012_v59 = vld [vmem:[#allocation5 + $0x1d60] sm:$0xff] }
 0x1f1   :  { %6596 = vmatprep.subr.bf16.mxu0 %v9190_v36  ;;  %6924 = vmatprep.subr.bf16.mxu1 %v9192_v38  ;;  %v9240_v36 = vcombine.high %v961_v31, %v965_v32  ;;  %v968_v38 = vld [vmem:[#allocation5 + $0x1c00] sm:$0xff]  ;;  %v1009_v30 = vld [vmem:[#allocation5 + $0x1d48] sm:$0xff] }
 0x1f4   :  { %6597 = vmatpush1.bf16.msra.mxu0 %v9189_v45  ;;  %6925 = vmatpush1.bf16.msra.mxu1 %v9191_v46  ;;  %v9239_v45 = vcombine.low %v961_v31, %v965_v32  ;;  %v9246_v46 = vcombine.high %v968_v38, %v972_v40  ;;  %v1013_v31 = vld [vmem:[#allocation5 + $0x1d68] sm:$0xff] }
 0x1f5   :  { %6598 = vmatprep.subr.bf16.mxu0 %v9198_v47  ;;  %6926 = vmatprep.subr.bf16.mxu1 %v9200_v48  ;;  %v9248_v47 = vcombine.high %v969_v41, %v973_v42  ;;  %v976_v48 = vld [vmem:[#allocation5 + $0x1c40] sm:$0xff] }
 0x1f6   :  { %v9253_v3 = vcombine.low %v976_v48, %v980_v0 }
 0x1f8   :  { %6599 = vmatpush1.bf16.msra.mxu0 %v9197_v56  ;;  %6927 = vmatpush1.bf16.msra.mxu1 %v9199_v57  ;;  %v9245_v56 = vcombine.low %v968_v38, %v972_v40  ;;  %v9247_v57 = vcombine.low %v969_v41, %v973_v42  ;;  %v1020_v38 = vld [vmem:[#allocation5 + $0x1da0] sm:$0xff]  ;;  %v1017_v40 = vld [vmem:[#allocation5 + $0x1d88] sm:$0xff] }
 0x1f9   :  { %6600 = vmatprep.subr.bf16.mxu0 %v9206_v58  ;;  %6928 = vmatprep.subr.bf16.mxu1 %v9208_v60  ;;  %v9254_v58 = vcombine.high %v976_v48, %v980_v0  ;;  %v9256_v60 = vcombine.high %v977_v52, %v981_v54  ;;  %v1021_v41 = vld [vmem:[#allocation5 + $0x1da8] sm:$0xff]  ;;  %v1028_v48 = vld [vmem:[#allocation5 + $0x1de0] sm:$0xff] }
 0x1fa   :  { %v1025_v0 = vld [vmem:[#allocation5 + $0x1dc8] sm:$0xff] }
 0x1fc   :  { %6601 = vmatpush1.bf16.msra.mxu0 %v9205_v4  ;;  %6929 = vmatpush1.bf16.msra.mxu1 %v9207_v5  ;;  %v9255_v4 = vcombine.low %v977_v52, %v981_v54  ;;  %v9262_v5 = vcombine.high %v984_v61, %v988_v28  ;;  %v1029_v52 = vld [vmem:[#allocation5 + $0x1de8] sm:$0xff]  ;;  %v1036_v61 = vld [vmem:[#allocation5 + $0x1e20] sm:$0xff] }
 0x1fd   :  { %6602 = vmatprep.subr.bf16.mxu0 %v9214_v55  ;;  %6930 = vmatprep.subr.bf16.mxu1 %v9216_v6  ;;  %v9264_v55 = vcombine.high %v985_v53, %v989_v2  ;;  %v992_v6 = vld [vmem:[#allocation5 + $0x1cc0] sm:$0xff]  ;;  %v1033_v28 = vld [vmem:[#allocation5 + $0x1e08] sm:$0xff] }
 0x1fe   :  { %v9269_v23 = vcombine.low %v992_v6, %v996_v7 }
 0x200   :  { %6603 = vmatpush1.bf16.msra.mxu0 %v9213_v14  ;;  %6931 = vmatpush1.bf16.msra.mxu1 %v9215_v15  ;;  %v9263_v14 = vcombine.low %v985_v53, %v989_v2  ;;  %v9270_v15 = vcombine.high %v992_v6, %v996_v7  ;;  %v1037_v53 = vld [vmem:[#allocation5 + $0x1e28] sm:$0xff]  ;;  %v1044_v6 = vld [vmem:[#allocation5 + $0x1e60] sm:$0xff] }
 0x201   :  { %6604 = vmatprep.subr.bf16.mxu0 %v9222_v16  ;;  %6932 = vmatprep.subr.bf16.mxu1 %v9224_v17  ;;  %v9272_v16 = vcombine.high %v993_v8, %v997_v10  ;;  %v1000_v17 = vld [vmem:[#allocation5 + $0x1d00] sm:$0xff]  ;;  %v1041_v7 = vld [vmem:[#allocation5 + $0x1e48] sm:$0xff] }
 0x202   :  { %v9277_v32 = vcombine.low %v1000_v17, %v1004_v18 }
 0x204   :  { %6605 = vmatpush1.bf16.msra.mxu0 %v9221_v25  ;;  %6933 = vmatpush1.bf16.msra.mxu1 %v9223_v26  ;;  %v9271_v25 = vcombine.low %v993_v8, %v997_v10  ;;  %v9278_v26 = vcombine.high %v1000_v17, %v1004_v18  ;;  %v1045_v8 = vld [vmem:[#allocation5 + $0x1e68] sm:$0xff]  ;;  %v1052_v17 = vld [vmem:[#allocation5 + $0x1ea0] sm:$0xff] }
 0x205   :  { %6606 = vmatprep.subr.bf16.mxu0 %v9230_v27  ;;  %6934 = vmatprep.subr.bf16.mxu1 %v9232_v29  ;;  %v9280_v27 = vcombine.high %v1001_v19, %v1005_v21  ;;  %v1008_v29 = vld [vmem:[#allocation5 + $0x1d40] sm:$0xff]  ;;  %v1049_v18 = vld [vmem:[#allocation5 + $0x1e88] sm:$0xff] }
 0x206   :  { %v9285_v42 = vcombine.low %v1008_v29, %v1012_v59 }
 0x208   :  { %6607 = vmatpush1.bf16.msra.mxu0 %v9229_v63  ;;  %6935 = vmatpush1.bf16.msra.mxu1 %v9231_v34  ;;  %v9279_v63 = vcombine.low %v1001_v19, %v1005_v21  ;;  %v9286_v34 = vcombine.high %v1008_v29, %v1012_v59  ;;  %v1053_v19 = vld [vmem:[#allocation5 + $0x1ea8] sm:$0xff]  ;;  %v1060_v29 = vld [vmem:[#allocation5 + $0x1ee0] sm:$0xff] }
 0x209   :  { %6608 = vmatprep.subr.bf16.mxu0 %v9238_v35  ;;  %6936 = vmatprep.subr.bf16.mxu1 %v9240_v36  ;;  %v9288_v35 = vcombine.high %v1009_v30, %v1013_v31  ;;  %v1016_v36 = vld [vmem:[#allocation5 + $0x1d80] sm:$0xff]  ;;  %v1057_v59 = vld [vmem:[#allocation5 + $0x1ec8] sm:$0xff] }
 0x20a   :  { %v9293_v54 = vcombine.low %v1016_v36, %v1020_v38 }
 0x20c   :  { %6609 = vmatpush1.bf16.msra.mxu0 %v9237_v43  ;;  %6937 = vmatpush1.bf16.msra.mxu1 %v9239_v45  ;;  %v9287_v43 = vcombine.low %v1009_v30, %v1013_v31  ;;  %v9294_v45 = vcombine.high %v1016_v36, %v1020_v38  ;;  %v1061_v30 = vld [vmem:[#allocation5 + $0x1ee8] sm:$0xff]  ;;  %v1068_v36 = vld [vmem:[#allocation5 + $0x1f20] sm:$0xff] }
 0x20d   :  { %6619 = vmatprep.subr.bf16.mxu0 %v9246_v46  ;;  %6947 = vmatprep.subr.bf16.mxu1 %v9248_v47  ;;  %v9296_v46 = vcombine.high %v1017_v40, %v1021_v41  ;;  %v1024_v47 = vld [vmem:[#allocation5 + $0x1dc0] sm:$0xff]  ;;  %v1065_v38 = vld [vmem:[#allocation5 + $0x1f08] sm:$0xff] }
 0x20e   :  { %v9301_v2 = vcombine.low %v1024_v47, %v1028_v48 }
 0x20f   :  { %6611 = vmatmul.mubr.bf16.vlgmr.msra.gmra.mrb[0].mxu0 %v10023_v50  ;;  %6939 = vmatmul.mubr.bf16.vlgmr.msra.gmra.mrb[0].mxu1 %v10023_v50 }
 0x210   :  { %6620 = vmatpush1.bf16.msra.mxu0 %v9245_v56  ;;  %6948 = vmatpush1.bf16.msra.mxu1 %v9247_v57  ;;  %v9295_v56 = vcombine.low %v1017_v40, %v1021_v41  ;;  %v9302_v57 = vcombine.high %v1024_v47, %v1028_v48  ;;  %v1069_v40 = vld [vmem:[#allocation5 + $0x1f28] sm:$0xff]  ;;  %v1076_v47 = vld [vmem:[#allocation5 + $0x1f60] sm:$0xff] }
 0x211   :  { %6621 = vmatprep.subr.bf16.mxu0 %v9254_v58  ;;  %6949 = vmatprep.subr.bf16.mxu1 %v9256_v60  ;;  %v9304_v58 = vcombine.high %v1025_v0, %v1029_v52  ;;  %v1032_v60 = vld [vmem:[#allocation5 + $0x1e00] sm:$0xff]  ;;  %v1073_v48 = vld [vmem:[#allocation5 + $0x1f48] sm:$0xff] }
 0x212   :  { %6651 = vmatprep.mubr.bf16.mxu0 %v10027_v1  ;;  %6979 = vmatprep.mubr.bf16.mxu1 %v10027_v1  ;;  %v9309_v10 = vcombine.low %v1032_v60, %v1036_v61 }
 0x214   :  { %6622 = vmatpush1.bf16.msra.mxu0 %v9253_v3  ;;  %6950 = vmatpush1.bf16.msra.mxu1 %v9255_v4  ;;  %v9303_v3 = vcombine.low %v1025_v0, %v1029_v52  ;;  %v9310_v4 = vcombine.high %v1032_v60, %v1036_v61  ;;  %v1077_v0 = vld [vmem:[#allocation5 + $0x1f68] sm:$0xff]  ;;  %v1084_v60 = vld [vmem:[#allocation5 + $0x1fa0] sm:$0xff] }
 0x215   :  { %6623 = vmatprep.subr.bf16.mxu0 %v9262_v5  ;;  %6951 = vmatprep.subr.bf16.mxu1 %v9264_v55  ;;  %v9312_v5 = vcombine.high %v1033_v28, %v1037_v53  ;;  %v1040_v55 = vld [vmem:[#allocation5 + $0x1e40] sm:$0xff]  ;;  %v1081_v61 = vld [vmem:[#allocation5 + $0x1f88] sm:$0xff] }
 0x216   :  { %v9317_v21 = vcombine.low %v1040_v55, %v1044_v6 }
 0x218   :  { %6624 = vmatpush1.bf16.msra.mxu0 %v9261_v12  ;;  %6952 = vmatpush1.bf16.msra.mxu1 %v9263_v14  ;;  %v9311_v12 = vcombine.low %v1033_v28, %v1037_v53  ;;  %v9318_v14 = vcombine.high %v1040_v55, %v1044_v6  ;;  %v1085_v28 = vld [vmem:[#allocation5 + $0x1fa8] sm:$0xff]  ;;  %v1092_v55 = vld [vmem:[#allocation5 + $0x1fe0] sm:$0xff] }
 0x219   :  { %6625 = vmatprep.subr.bf16.mxu0 %v9270_v15  ;;  %6953 = vmatprep.subr.bf16.mxu1 %v9272_v16  ;;  %v9320_v15 = vcombine.high %v1041_v7, %v1045_v8  ;;  %v1048_v16 = vld [vmem:[#allocation5 + $0x1e80] sm:$0xff]  ;;  %v1089_v6 = vld [vmem:[#allocation5 + $0x1fc8] sm:$0xff] }
 0x21a   :  { %v9325_v31 = vcombine.low %v1048_v16, %v1052_v17 }
 0x21c   :  { %6626 = vmatpush1.bf16.msra.mxu0 %v9269_v23  ;;  %6954 = vmatpush1.bf16.msra.mxu1 %v9271_v25  ;;  %v9319_v23 = vcombine.low %v1041_v7, %v1045_v8  ;;  %v9326_v25 = vcombine.high %v1048_v16, %v1052_v17  ;;  %v1093_v7 = vld [vmem:[#allocation5 + $0x1fe8] sm:$0xff]  ;;  %v78_v16 = vld [vmem:[#allocation5 + $0x30] sm:$0xff]  ;;  %v75_v17 = vld [vmem:[#allocation5 + $0x18] sm:$0xff] }
 0x21d   :  { %6627 = vmatprep.subr.bf16.mxu0 %v9278_v26  ;;  %6955 = vmatprep.subr.bf16.mxu1 %v9280_v27  ;;  %v9328_v26 = vcombine.high %v1049_v18, %v1053_v19  ;;  %v1056_v27 = vld [vmem:[#allocation5 + $0x1ec0] sm:$0xff] }
 0x21e   :  { %v9333_v41 = vcombine.low %v1056_v27, %v1060_v29 }
 0x220   :  { %6628 = vmatpush1.bf16.msra.mxu0 %v9277_v32  ;;  %6956 = vmatpush1.bf16.msra.mxu1 %v9279_v63  ;;  %v9327_v32 = vcombine.low %v1049_v18, %v1053_v19  ;;  %v9334_v63 = vcombine.high %v1056_v27, %v1060_v29  ;;  %v79_v18 = vld [vmem:[#allocation5 + $0x38] sm:$0xff]  ;;  %v86_v27 = vld [vmem:[#allocation5 + $0x70] sm:$0xff]  ;;  %v10035_v29 = vcombine.high %v10023_v50, %v10023_v50 }
 0x221   :  { %6629 = vmatprep.subr.bf16.mxu0 %v9286_v34  ;;  %6957 = vmatprep.subr.bf16.mxu1 %v9288_v35  ;;  %v9336_v34 = vcombine.high %v1057_v59, %v1061_v30  ;;  %v1064_v35 = vld [vmem:[#allocation5 + $0x1f00] sm:$0xff] }
 0x222   :  { %v9341_v52 = vcombine.low %v1064_v35, %v1068_v36 }
 0x224   :  { %6630 = vmatpush1.bf16.msra.mxu0 %v9285_v42  ;;  %6958 = vmatpush1.bf16.msra.mxu1 %v9287_v43  ;;  %v9335_v42 = vcombine.low %v1057_v59, %v1061_v30  ;;  %v9342_v43 = vcombine.high %v1064_v35, %v1068_v36  ;;  %v83_v59 = vld [vmem:[#allocation5 + $0x58] sm:$0xff]  ;;  %v90_v35 = vld [vmem:[#allocation5 + $0x90] sm:$0xff] }
 0x225   :  { %6631 = vmatprep.subr.bf16.mxu0 %v9294_v45  ;;  %6959 = vmatprep.subr.bf16.mxu1 %v9296_v46  ;;  %v9344_v45 = vcombine.high %v1065_v38, %v1069_v40  ;;  %v1072_v46 = vld [vmem:[#allocation5 + $0x1f40] sm:$0xff]  ;;  %v87_v30 = vld [vmem:[#allocation5 + $0x78] sm:$0xff]  ;;  %v94_v36 = vld [vmem:[#allocation5 + $0xb0] sm:$0xff] }
 0x226   :  { %v9349_v53 = vcombine.low %v1072_v46, %v1076_v47 }
 0x228   :  { %6632 = vmatpush1.bf16.msra.mxu0 %v9293_v54  ;;  %6960 = vmatpush1.bf16.msra.mxu1 %v9295_v56  ;;  %v9343_v54 = vcombine.low %v1065_v38, %v1069_v40  ;;  %v9350_v56 = vcombine.high %v1072_v46, %v1076_v47  ;;  %v91_v38 = vld [vmem:[#allocation5 + $0x98] sm:$0xff]  ;;  %v98_v46 = vld [vmem:[#allocation5 + $0xd0] sm:$0xff] }
 0x229   :  { %6633 = vmatprep.subr.bf16.mxu0 %v9302_v57  ;;  %6961 = vmatprep.subr.bf16.mxu1 %v9304_v58  ;;  %v9352_v57 = vcombine.high %v1073_v48, %v1077_v0  ;;  %v1080_v58 = vld [vmem:[#allocation5 + $0x1f80] sm:$0xff]  ;;  %v95_v40 = vld [vmem:[#allocation5 + $0xb8] sm:$0xff]  ;;  %v102_v47 = vld [vmem:[#allocation5 + $0xf0] sm:$0xff] }
 0x22a   :  { %v9357_v8 = vcombine.low %v1080_v58, %v1084_v60 }
 0x22c   :  { %6634 = vmatpush1.bf16.msra.mxu0 %v9301_v2  ;;  %6962 = vmatpush1.bf16.msra.mxu1 %v9303_v3  ;;  %v9351_v2 = vcombine.low %v1073_v48, %v1077_v0  ;;  %v9358_v3 = vcombine.high %v1080_v58, %v1084_v60  ;;  %v99_v48 = vld [vmem:[#allocation5 + $0xd8] sm:$0xff]  ;;  %v106_v58 = vld [vmem:[#allocation5 + $0x110] sm:$0xff] }
 0x22d   :  { %6635 = vmatprep.subr.bf16.mxu0 %v9310_v4  ;;  %6963 = vmatprep.subr.bf16.mxu1 %v9312_v5  ;;  %v9360_v4 = vcombine.high %v1081_v61, %v1085_v28  ;;  %v1088_v5 = vld [vmem:[#allocation5 + $0x1fc0] sm:$0xff]  ;;  %v103_v0 = vld [vmem:[#allocation5 + $0xf8] sm:$0xff]  ;;  %v110_v60 = vld [vmem:[#allocation5 + $0x130] sm:$0xff] }
 0x22e   :  { %v9365_v19 = vcombine.low %v1088_v5, %v1092_v55 }
 0x230   :  { %6636 = vmatpush1.bf16.msra.mxu0 %v9309_v10  ;;  %6964 = vmatpush1.bf16.msra.mxu1 %v9311_v12  ;;  %v9359_v10 = vcombine.low %v1081_v61, %v1085_v28  ;;  %v9366_v12 = vcombine.high %v1088_v5, %v1092_v55  ;;  %v107_v61 = vld [vmem:[#allocation5 + $0x118] sm:$0xff]  ;;  %v118_v5 = vld [vmem:[#allocation5 + $0x170] sm:$0xff] }
 0x231   :  { %6637 = vmatprep.subr.bf16.mxu0 %v9318_v14  ;;  %6965 = vmatprep.subr.bf16.mxu1 %v9320_v15  ;;  %v9368_v14 = vcombine.high %v1089_v6, %v1093_v7  ;;  %v74_v15 = vld [vmem:[#allocation5 + $0x10] sm:$0xff]  ;;  %v111_v28 = vld [vmem:[#allocation5 + $0x138] sm:$0xff] }
 0x232   :  { %v115_v55 = vld [vmem:[#allocation5 + $0x158] sm:$0xff] }
 0x234   :  { %6638 = vmatpush1.bf16.msra.mxu0 %v9317_v21  ;;  %6966 = vmatpush1.bf16.msra.mxu1 %v9319_v23  ;;  %v9367_v21 = vcombine.low %v1089_v6, %v1093_v7  ;;  %v8354_v23 = vcombine.high %v74_v15, %v78_v16  ;;  %v119_v6 = vld [vmem:[#allocation5 + $0x178] sm:$0xff]  ;;  %v8385_v7 = vcombine.low %v106_v58, %v110_v60 }
 0x235   :  { %6639 = vmatprep.subr.bf16.mxu0 %v9326_v25  ;;  %6967 = vmatprep.subr.bf16.mxu1 %v9328_v26  ;;  %v8356_v25 = vcombine.high %v75_v17, %v79_v18  ;;  %v82_v26 = vld [vmem:[#allocation5 + $0x50] sm:$0xff] }
 0x238   :  { %6640 = vmatpush1.bf16.msra.mxu0 %v9325_v31  ;;  %6968 = vmatpush1.bf16.msra.mxu1 %v9327_v32  ;;  %v8353_v31 = vcombine.low %v74_v15, %v78_v16  ;;  %v8355_v32 = vcombine.low %v75_v17, %v79_v18  ;;  %v126_v15 = vld [vmem:[#allocation5 + $0x1b0] sm:$0xff]  ;;  %v123_v16 = vld [vmem:[#allocation5 + $0x198] sm:$0xff] }
 0x239   :  { %6641 = vmatprep.subr.bf16.mxu0 %v9334_v63  ;;  %6969 = vmatprep.subr.bf16.mxu1 %v9336_v34  ;;  %v8362_v63 = vcombine.high %v82_v26, %v86_v27  ;;  %v8364_v34 = vcombine.high %v83_v59, %v87_v30  ;;  %v127_v17 = vld [vmem:[#allocation5 + $0x1b8] sm:$0xff] }
 0x23c   :  { %6642 = vmatpush1.bf16.msra.mxu0 %v9333_v41  ;;  %6970 = vmatpush1.bf16.msra.mxu1 %v9335_v42  ;;  %v8361_v41 = vcombine.low %v82_v26, %v86_v27  ;;  %v8363_v42 = vcombine.low %v83_v59, %v87_v30  ;;  %v134_v26 = vld [vmem:[#allocation5 + $0x1f0] sm:$0xff]  ;;  %v131_v27 = vld [vmem:[#allocation5 + $0x1d8] sm:$0xff] }
 0x23d   :  { %6643 = vmatprep.subr.bf16.mxu0 %v9342_v43  ;;  %6971 = vmatprep.subr.bf16.mxu1 %v9344_v45  ;;  %v8370_v43 = vcombine.high %v90_v35, %v94_v36  ;;  %v8372_v45 = vcombine.high %v91_v38, %v95_v40  ;;  %v135_v59 = vld [vmem:[#allocation5 + $0x1f8] sm:$0xff] }
 0x240   :  { %6644 = vmatpush1.bf16.msra.mxu0 %v9341_v52  ;;  %6972 = vmatpush1.bf16.msra.mxu1 %v9343_v54  ;;  %v8369_v52 = vcombine.low %v90_v35, %v94_v36  ;;  %v8371_v54 = vcombine.low %v91_v38, %v95_v40  ;;  %v142_v35 = vld [vmem:[#allocation5 + $0x230] sm:$0xff]  ;;  %v139_v36 = vld [vmem:[#allocation5 + $0x218] sm:$0xff] }
 0x241   :  { %6645 = vmatprep.subr.bf16.mxu0 %v9350_v56  ;;  %6973 = vmatprep.subr.bf16.mxu1 %v9352_v57  ;;  %v8378_v56 = vcombine.high %v98_v46, %v102_v47  ;;  %v8380_v57 = vcombine.high %v99_v48, %v103_v0  ;;  %v143_v38 = vld [vmem:[#allocation5 + $0x238] sm:$0xff] }
 0x244   :  { %6646 = vmatpush1.bf16.msra.mxu0 %v9349_v53  ;;  %6974 = vmatpush1.bf16.msra.mxu1 %v9351_v2  ;;  %v8377_v53 = vcombine.low %v98_v46, %v102_v47  ;;  %v8379_v2 = vcombine.low %v99_v48, %v103_v0  ;;  %v150_v46 = vld [vmem:[#allocation5 + $0x270] sm:$0xff]  ;;  %v147_v47 = vld [vmem:[#allocation5 + $0x258] sm:$0xff] }
 0x245   :  { %6647 = vmatprep.subr.bf16.mxu0 %v9358_v3  ;;  %6975 = vmatprep.subr.bf16.mxu1 %v9360_v4  ;;  %v8386_v3 = vcombine.high %v106_v58, %v110_v60  ;;  %v114_v4 = vld [vmem:[#allocation5 + $0x150] sm:$0xff]  ;;  %v151_v48 = vld [vmem:[#allocation5 + $0x278] sm:$0xff] }
 0x246   :  { %v8393_v18 = vcombine.low %v114_v4, %v118_v5  ;;  %v158_v58 = vld [vmem:[#allocation5 + $0x2b0] sm:$0xff]  ;;  %v155_v60 = vld [vmem:[#allocation5 + $0x298] sm:$0xff] }
 0x248   :  { %6648 = vmatpush1.bf16.msra.mxu0 %v9357_v8  ;;  %6976 = vmatpush1.bf16.msra.mxu1 %v9359_v10  ;;  %v8387_v8 = vcombine.low %v107_v61, %v111_v28  ;;  %v8394_v10 = vcombine.high %v114_v4, %v118_v5  ;;  %v166_v4 = vld [vmem:[#allocation5 + $0x2f0] sm:$0xff]  ;;  %v163_v5 = vld [vmem:[#allocation5 + $0x2d8] sm:$0xff] }
 0x249   :  { %6649 = vmatprep.subr.bf16.mxu0 %v9366_v12  ;;  %6977 = vmatprep.subr.bf16.mxu1 %v9368_v14  ;;  %v8396_v12 = vcombine.high %v115_v55, %v119_v6  ;;  %v122_v14 = vld [vmem:[#allocation5 + $0x190] sm:$0xff] }
 0x24a   :  { %v8401_v30 = vcombine.low %v122_v14, %v126_v15 }
 0x24c   :  { %6650 = vmatpush1.bf16.msra.mxu0 %v9365_v19  ;;  %6978 = vmatpush1.bf16.msra.mxu1 %v9367_v21  ;;  %v8395_v19 = vcombine.low %v115_v55, %v119_v6  ;;  %v8402_v21 = vcombine.high %v122_v14, %v126_v15  ;;  %v167_v55 = vld [vmem:[#allocation5 + $0x2f8] sm:$0xff]  ;;  %v174_v14 = vld [vmem:[#allocation5 + $0x330] sm:$0xff] }
 0x24d   :  { %6988 = vmatprep.subr.bf16.mxu0 %v8354_v23  ;;  %7316 = vmatprep.subr.bf16.mxu1 %v8356_v25  ;;  %v8404_v23 = vcombine.high %v123_v16, %v127_v17  ;;  %v130_v25 = vld [vmem:[#allocation5 + $0x1d0] sm:$0xff]  ;;  %v171_v15 = vld [vmem:[#allocation5 + $0x318] sm:$0xff] }
 0x24e   :  { %v8409_v40 = vcombine.low %v130_v25, %v134_v26 }
 0x24f   :  { %6652 = vmatmul.mubr.bf16.vlgmr.msra.gmra.mrb[0].mxu0 %v10035_v29  ;;  %6980 = vmatmul.mubr.bf16.vlgmr.msra.gmra.mrb[0].mxu1 %v10035_v29 }
 0x250   :  { %6989 = vmatpush1.bf16.msra.mxu0 %v8353_v31  ;;  %7317 = vmatpush1.bf16.msra.mxu1 %v8355_v32  ;;  %v8403_v31 = vcombine.low %v123_v16, %v127_v17  ;;  %v8410_v32 = vcombine.high %v130_v25, %v134_v26  ;;  %v175_v16 = vld [vmem:[#allocation5 + $0x338] sm:$0xff]  ;;  %v182_v25 = vld [vmem:[#allocation5 + $0x370] sm:$0xff] }
 0x251   :  { %6990 = vmatprep.subr.bf16.mxu0 %v8362_v63  ;;  %7318 = vmatprep.subr.bf16.mxu1 %v8364_v34  ;;  %v8412_v63 = vcombine.high %v131_v27, %v135_v59  ;;  %v138_v34 = vld [vmem:[#allocation5 + $0x210] sm:$0xff]  ;;  %v179_v26 = vld [vmem:[#allocation5 + $0x358] sm:$0xff] }
 0x252   :  { %7020 = vmatprep.mubr.bf16.mxu0 %v9926_v9  ;;  %7348 = vmatprep.mubr.bf16.mxu1 %v9926_v9  ;;  %v8388_v9 = vcombine.high %v107_v61, %v111_v28  ;;  %v8417_v0 = vcombine.low %v138_v34, %v142_v35  ;;  %v159_v61 = vld [vmem:[#allocation5 + $0x2b8] sm:$0xff] }
 0x254   :  { %6991 = vmatpush1.bf16.msra.mxu0 %v8361_v41  ;;  %7319 = vmatpush1.bf16.msra.mxu1 %v8363_v42  ;;  %v8411_v41 = vcombine.low %v131_v27, %v135_v59  ;;  %v8418_v42 = vcombine.high %v138_v34, %v142_v35  ;;  %v183_v27 = vld [vmem:[#allocation5 + $0x378] sm:$0xff]  ;;  %v190_v34 = vld [vmem:[#allocation5 + $0x3b0] sm:$0xff] }
 0x255   :  { %6992 = vmatprep.subr.bf16.mxu0 %v8370_v43  ;;  %7320 = vmatprep.subr.bf16.mxu1 %v8372_v45  ;;  %v8420_v43 = vcombine.high %v139_v36, %v143_v38  ;;  %v146_v45 = vld [vmem:[#allocation5 + $0x250] sm:$0xff]  ;;  %v187_v35 = vld [vmem:[#allocation5 + $0x398] sm:$0xff] }
 0x256   :  { %v8425_v28 = vcombine.low %v146_v45, %v150_v46 }
 0x258   :  { %6993 = vmatpush1.bf16.msra.mxu0 %v8369_v52  ;;  %7321 = vmatpush1.bf16.msra.mxu1 %v8371_v54  ;;  %v8419_v52 = vcombine.low %v139_v36, %v143_v38  ;;  %v8426_v54 = vcombine.high %v146_v45, %v150_v46  ;;  %v191_v36 = vld [vmem:[#allocation5 + $0x3b8] sm:$0xff]  ;;  %v198_v45 = vld [vmem:[#allocation5 + $0x3f0] sm:$0xff] }
 0x259   :  { %6994 = vmatprep.subr.bf16.mxu0 %v8378_v56  ;;  %7322 = vmatprep.subr.bf16.mxu1 %v8380_v57  ;;  %v8428_v56 = vcombine.high %v147_v47, %v151_v48  ;;  %v154_v57 = vld [vmem:[#allocation5 + $0x290] sm:$0xff]  ;;  %v195_v46 = vld [vmem:[#allocation5 + $0x3d8] sm:$0xff] }
 0x25a   :  { %v8433_v6 = vcombine.low %v154_v57, %v158_v58 }
 0x25c   :  { %6995 = vmatpush1.bf16.msra.mxu0 %v8377_v53  ;;  %7323 = vmatpush1.bf16.msra.mxu1 %v8379_v2  ;;  %v8427_v53 = vcombine.low %v147_v47, %v151_v48  ;;  %v8434_v2 = vcombine.high %v154_v57, %v158_v58  ;;  %v199_v47 = vld [vmem:[#allocation5 + $0x3f8] sm:$0xff]  ;;  %v206_v57 = vld [vmem:[#allocation5 + $0x430] sm:$0xff] }
 0x25d   :  { %6996 = vmatprep.subr.bf16.mxu0 %v8386_v3  ;;  %7324 = vmatprep.subr.bf16.mxu1 %v8388_v9  ;;  %v8436_v3 = vcombine.high %v155_v60, %v159_v61  ;;  %v162_v9 = vld [vmem:[#allocation5 + $0x2d0] sm:$0xff]  ;;  %v203_v58 = vld [vmem:[#allocation5 + $0x418] sm:$0xff] }
 0x25e   :  { %v8441_v17 = vcombine.low %v162_v9, %v166_v4 }
 0x260   :  { %6997 = vmatpush1.bf16.msra.mxu0 %v8385_v7  ;;  %7325 = vmatpush1.bf16.msra.mxu1 %v8387_v8  ;;  %v8435_v7 = vcombine.low %v155_v60, %v159_v61  ;;  %v8442_v8 = vcombine.high %v162_v9, %v166_v4  ;;  %v207_v60 = vld [vmem:[#allocation5 + $0x438] sm:$0xff]  ;;  %v214_v9 = vld [vmem:[#allocation5 + $0x470] sm:$0xff] }
 0x261   :  { %6998 = vmatprep.subr.bf16.mxu0 %v8394_v10  ;;  %7326 = vmatprep.subr.bf16.mxu1 %v8396_v12  ;;  %v8444_v10 = vcombine.high %v163_v5, %v167_v55  ;;  %v170_v12 = vld [vmem:[#allocation5 + $0x310] sm:$0xff]  ;;  %v211_v4 = vld [vmem:[#allocation5 + $0x458] sm:$0xff] }
 0x262   :  { %v8449_v59 = vcombine.low %v170_v12, %v174_v14 }
 0x264   :  { %6999 = vmatpush1.bf16.msra.mxu0 %v8393_v18  ;;  %7327 = vmatpush1.bf16.msra.mxu1 %v8395_v19  ;;  %v8443_v18 = vcombine.low %v163_v5, %v167_v55  ;;  %v8450_v19 = vcombine.high %v170_v12, %v174_v14  ;;  %v215_v5 = vld [vmem:[#allocation5 + $0x478] sm:$0xff]  ;;  %v222_v12 = vld [vmem:[#allocation5 + $0x4b0] sm:$0xff] }
 0x265   :  { %7000 = vmatprep.subr.bf16.mxu0 %v8402_v21  ;;  %7328 = vmatprep.subr.bf16.mxu1 %v8404_v23  ;;  %v8452_v21 = vcombine.high %v171_v15, %v175_v16  ;;  %v178_v23 = vld [vmem:[#allocation5 + $0x350] sm:$0xff]  ;;  %v219_v14 = vld [vmem:[#allocation5 + $0x498] sm:$0xff] }
 0x266   :  { %v8457_v38 = vcombine.low %v178_v23, %v182_v25 }
 0x268   :  { %7001 = vmatpush1.bf16.msra.mxu0 %v8401_v30  ;;  %7329 = vmatpush1.bf16.msra.mxu1 %v8403_v31  ;;  %v8451_v30 = vcombine.low %v171_v15, %v175_v16  ;;  %v8458_v31 = vcombine.high %v178_v23, %v182_v25  ;;  %v223_v15 = vld [vmem:[#allocation5 + $0x4b8] sm:$0xff]  ;;  %v230_v23 = vld [vmem:[#allocation5 + $0x4f0] sm:$0xff] }
 0x269   :  { %7002 = vmatprep.subr.bf16.mxu0 %v8410_v32  ;;  %7330 = vmatprep.subr.bf16.mxu1 %v8412_v63  ;;  %v8460_v32 = vcombine.high %v179_v26, %v183_v27  ;;  %v186_v63 = vld [vmem:[#allocation5 + $0x390] sm:$0xff]  ;;  %v227_v25 = vld [vmem:[#allocation5 + $0x4d8] sm:$0xff] }
 0x26a   :  { %v8465_v48 = vcombine.low %v186_v63, %v190_v34 }
 0x26c   :  { %7003 = vmatpush1.bf16.msra.mxu0 %v8409_v40  ;;  %7331 = vmatpush1.bf16.msra.mxu1 %v8411_v41  ;;  %v8459_v40 = vcombine.low %v179_v26, %v183_v27  ;;  %v8466_v41 = vcombine.high %v186_v63, %v190_v34  ;;  %v231_v26 = vld [vmem:[#allocation5 + $0x4f8] sm:$0xff] }
 0x26d   :  { %7004 = vmatprep.subr.bf16.mxu0 %v8418_v42  ;;  %7332 = vmatprep.subr.bf16.mxu1 %v8420_v43  ;;  %v8468_v42 = vcombine.high %v187_v35, %v191_v36  ;;  %v194_v43 = vld [vmem:[#allocation5 + $0x3d0] sm:$0xff]  ;;  %v235_v63 = vld [vmem:[#allocation5 + $0x518] sm:$0xff] }
 0x26e   :  { %v8473_v61 = vcombine.low %v194_v43, %v198_v45  ;;  %v239_v34 = vld [vmem:[#allocation5 + $0x538] sm:$0xff] }
 0x270   :  { %7005 = vmatpush1.bf16.msra.mxu0 %v8417_v0  ;;  %7333 = vmatpush1.bf16.msra.mxu1 %v8419_v52  ;;  %v8467_v0 = vcombine.low %v187_v35, %v191_v36  ;;  %v8474_v52 = vcombine.high %v194_v43, %v198_v45  ;;  %v8507_v36 = vcombine.low %v227_v25, %v231_v26  ;;  %v247_v43 = vld [vmem:[#allocation5 + $0x578] sm:$0xff] }
 0x271   :  { %7006 = vmatprep.subr.bf16.mxu0 %v8426_v54  ;;  %7334 = vmatprep.subr.bf16.mxu1 %v8428_v56  ;;  %v8476_v54 = vcombine.high %v195_v46, %v199_v47  ;;  %v202_v56 = vld [vmem:[#allocation5 + $0x410] sm:$0xff] }
 0x272   :  { %v8481_v55 = vcombine.low %v202_v56, %v206_v57 }
 0x274   :  { %7007 = vmatpush1.bf16.msra.mxu0 %v8425_v28  ;;  %7335 = vmatpush1.bf16.msra.mxu1 %v8427_v53  ;;  %v8475_v28 = vcombine.low %v195_v46, %v199_v47  ;;  %v8482_v53 = vcombine.high %v202_v56, %v206_v57  ;;  %v8515_v46 = vcombine.low %v235_v63, %v239_v34  ;;  %v255_v56 = vld [vmem:[#allocation5 + $0x5b8] sm:$0xff] }
 0x275   :  { %7008 = vmatprep.subr.bf16.mxu0 %v8434_v2  ;;  %7336 = vmatprep.subr.bf16.mxu1 %v8436_v3  ;;  %v8484_v2 = vcombine.high %v203_v58, %v207_v60  ;;  %v210_v3 = vld [vmem:[#allocation5 + $0x450] sm:$0xff] }
 0x276   :  { %v8489_v16 = vcombine.low %v210_v3, %v214_v9 }
 0x278   :  { %7009 = vmatpush1.bf16.msra.mxu0 %v8433_v6  ;;  %7337 = vmatpush1.bf16.msra.mxu1 %v8435_v7  ;;  %v8483_v6 = vcombine.low %v203_v58, %v207_v60  ;;  %v8490_v7 = vcombine.high %v210_v3, %v214_v9  ;;  %v263_v3 = vld [vmem:[#allocation5 + $0x5f8] sm:$0xff] }
 0x279   :  { %7010 = vmatprep.subr.bf16.mxu0 %v8442_v8  ;;  %7338 = vmatprep.subr.bf16.mxu1 %v8444_v10  ;;  %v8492_v8 = vcombine.high %v211_v4, %v215_v5  ;;  %v218_v10 = vld [vmem:[#allocation5 + $0x490] sm:$0xff] }
 0x27a   :  { %v8497_v27 = vcombine.low %v218_v10, %v222_v12 }
 0x27c   :  { %7011 = vmatpush1.bf16.msra.mxu0 %v8441_v17  ;;  %7339 = vmatpush1.bf16.msra.mxu1 %v8443_v18  ;;  %v8491_v17 = vcombine.low %v211_v4, %v215_v5  ;;  %v8498_v18 = vcombine.high %v218_v10, %v222_v12  ;;  %v271_v10 = vld [vmem:[#allocation5 + $0x638] sm:$0xff] }
 0x27d   :  { %7012 = vmatprep.subr.bf16.mxu0 %v8450_v19  ;;  %7340 = vmatprep.subr.bf16.mxu1 %v8452_v21  ;;  %v8500_v19 = vcombine.high %v219_v14, %v223_v15  ;;  %v226_v21 = vld [vmem:[#allocation5 + $0x4d0] sm:$0xff] }
 0x27e   :  { %v8505_v35 = vcombine.low %v226_v21, %v230_v23 }
 0x280   :  { %7013 = vmatpush1.bf16.msra.mxu0 %v8449_v59  ;;  %7341 = vmatpush1.bf16.msra.mxu1 %v8451_v30  ;;  %v8506_v59 = vcombine.high %v226_v21, %v230_v23  ;;  %v8508_v30 = vcombine.high %v227_v25, %v231_v26  ;;  %v279_v21 = vld [vmem:[#allocation5 + $0x678] sm:$0xff] }
 0x281   :  { %7014 = vmatprep.subr.bf16.mxu0 %v8458_v31  ;;  %7342 = vmatprep.subr.bf16.mxu1 %v8460_v32  ;;  %v234_v31 = vld [vmem:[#allocation5 + $0x510] sm:$0xff] }
 0x282   :  { %v238_v32 = vld [vmem:[#allocation5 + $0x530] sm:$0xff] }
 0x283   :  { %v8513_v45 = vcombine.low %v234_v31, %v238_v32 }
 0x284   :  { %7015 = vmatpush1.bf16.msra.mxu0 %v8457_v38  ;;  %7343 = vmatpush1.bf16.msra.mxu1 %v8459_v40  ;;  %v8514_v38 = vcombine.high %v234_v31, %v238_v32  ;;  %v242_v40 = vld [vmem:[#allocation5 + $0x550] sm:$0xff]  ;;  %v287_v31 = vld [vmem:[#allocation5 + $0x6b8] sm:$0xff] }
 0x285   :  { %7016 = vmatprep.subr.bf16.mxu0 %v8466_v41  ;;  %7344 = vmatprep.subr.bf16.mxu1 %v8468_v42  ;;  %v246_v41 = vld [vmem:[#allocation5 + $0x570] sm:$0xff]  ;;  %v243_v42 = vld [vmem:[#allocation5 + $0x558] sm:$0xff] }
 0x286   :  { %v8522_v47 = vcombine.high %v242_v40, %v246_v41  ;;  %v8521_v57 = vcombine.low %v242_v40, %v246_v41  ;;  %v8523_v58 = vcombine.low %v243_v42, %v247_v43  ;;  %v295_v40 = vld [vmem:[#allocation5 + $0x6f8] sm:$0xff] }
 0x288   :  { %7017 = vmatpush1.bf16.msra.mxu0 %v8465_v48  ;;  %7345 = vmatpush1.bf16.msra.mxu1 %v8467_v0  ;;  %v8524_v48 = vcombine.high %v243_v42, %v247_v43  ;;  %v250_v0 = vld [vmem:[#allocation5 + $0x590] sm:$0xff] }
 0x289   :  { %7018 = vmatprep.subr.bf16.mxu0 %v8474_v52  ;;  %7346 = vmatprep.subr.bf16.mxu1 %v8476_v54  ;;  %v254_v52 = vld [vmem:[#allocation5 + $0x5b0] sm:$0xff]  ;;  %v251_v54 = vld [vmem:[#allocation5 + $0x598] sm:$0xff] }
 0x28a   :  { %v8530_v60 = vcombine.high %v250_v0, %v254_v52  ;;  %v8529_v9 = vcombine.low %v250_v0, %v254_v52  ;;  %v8531_v4 = vcombine.low %v251_v54, %v255_v56  ;;  %v303_v0 = vld [vmem:[#allocation5 + $0x738] sm:$0xff] }
 0x28c   :  { %7019 = vmatpush1.bf16.msra.mxu0 %v8473_v61  ;;  %7347 = vmatpush1.bf16.msra.mxu1 %v8475_v28  ;;  %v8532_v61 = vcombine.high %v251_v54, %v255_v56  ;;  %v258_v28 = vld [vmem:[#allocation5 + $0x5d0] sm:$0xff] }
 0x28d   :  { %7029 = vmatprep.subr.bf16.mxu0 %v8482_v53  ;;  %7357 = vmatprep.subr.bf16.mxu1 %v8484_v2  ;;  %v262_v53 = vld [vmem:[#allocation5 + $0x5f0] sm:$0xff]  ;;  %v259_v2 = vld [vmem:[#allocation5 + $0x5d8] sm:$0xff] }
 0x28e   :  { %v8538_v5 = vcombine.high %v258_v28, %v262_v53  ;;  %v8537_v12 = vcombine.low %v258_v28, %v262_v53  ;;  %v311_v28 = vld [vmem:[#allocation5 + $0x778] sm:$0xff] }
 0x28f   :  { %7021 = vmatmul.mubr.bf16.vlgmr.msra.gmra.mrb[4].mxu0 %v9932_v22  ;;  %7349 = vmatmul.mubr.bf16.vlgmr.msra.gmra.mrb[4].mxu1 %v9932_v22  ;;  %v8499_v22 = vcombine.low %v219_v14, %v223_v15  ;;  %v8539_v14 = vcombine.low %v259_v2, %v263_v3 }
 0x290   :  { %7030 = vmatpush1.bf16.msra.mxu0 %v8481_v55  ;;  %7358 = vmatpush1.bf16.msra.mxu1 %v8483_v6  ;;  %v8540_v55 = vcombine.high %v259_v2, %v263_v3  ;;  %v266_v6 = vld [vmem:[#allocation5 + $0x610] sm:$0xff] }
 0x291   :  { %7031 = vmatprep.subr.bf16.mxu0 %v8490_v7  ;;  %7359 = vmatprep.subr.bf16.mxu1 %v8492_v8  ;;  %v270_v7 = vld [vmem:[#allocation5 + $0x630] sm:$0xff]  ;;  %v267_v8 = vld [vmem:[#allocation5 + $0x618] sm:$0xff] }
 0x292   :  { %7061 = vmatprep.mubr.bf16.mxu0 %v9936_v33  ;;  %7389 = vmatprep.mubr.bf16.mxu1 %v9936_v33  ;;  %v8516_v33 = vcombine.high %v235_v63, %v239_v34  ;;  %v8546_v15 = vcombine.high %v266_v6, %v270_v7  ;;  %v8545_v23 = vcombine.low %v266_v6, %v270_v7  ;;  %v319_v6 = vld [vmem:[#allocation5 + $0x7b8] sm:$0xff] }
 0x293   :  { %v8547_v25 = vcombine.low %v267_v8, %v271_v10 }
 0x294   :  { %7032 = vmatpush1.bf16.msra.mxu0 %v8489_v16  ;;  %7360 = vmatpush1.bf16.msra.mxu1 %v8491_v17  ;;  %v8548_v16 = vcombine.high %v267_v8, %v271_v10  ;;  %v274_v17 = vld [vmem:[#allocation5 + $0x650] sm:$0xff] }
 0x295   :  { %7033 = vmatprep.subr.bf16.mxu0 %v8498_v18  ;;  %7361 = vmatprep.subr.bf16.mxu1 %v8500_v19  ;;  %v278_v18 = vld [vmem:[#allocation5 + $0x670] sm:$0xff]  ;;  %v275_v19 = vld [vmem:[#allocation5 + $0x658] sm:$0xff] }
 0x296   :  { %v8554_v26 = vcombine.high %v274_v17, %v278_v18  ;;  %v8553_v32 = vcombine.low %v274_v17, %v278_v18  ;;  %v8555_v63 = vcombine.low %v275_v19, %v279_v21  ;;  %v327_v17 = vld [vmem:[#allocation5 + $0x7f8] sm:$0xff] }
 0x298   :  { %7034 = vmatpush1.bf16.msra.mxu0 %v8497_v27  ;;  %7362 = vmatpush1.bf16.msra.mxu1 %v8499_v22  ;;  %v8556_v27 = vcombine.high %v275_v19, %v279_v21  ;;  %v282_v22 = vld [vmem:[#allocation5 + $0x690] sm:$0xff] }
 0x299   :  { %7035 = vmatprep.subr.bf16.mxu0 %v8506_v59  ;;  %7363 = vmatprep.subr.bf16.mxu1 %v8508_v30  ;;  %v286_v59 = vld [vmem:[#allocation5 + $0x6b0] sm:$0xff]  ;;  %v283_v30 = vld [vmem:[#allocation5 + $0x698] sm:$0xff] }
 0x29a   :  { %v8562_v34 = vcombine.high %v282_v22, %v286_v59  ;;  %v8561_v41 = vcombine.low %v282_v22, %v286_v59  ;;  %v8563_v42 = vcombine.low %v283_v30, %v287_v31  ;;  %v335_v22 = vld [vmem:[#allocation5 + $0x838] sm:$0xff] }
 0x29c   :  { %7036 = vmatpush1.bf16.msra.mxu0 %v8505_v35  ;;  %7364 = vmatpush1.bf16.msra.mxu1 %v8507_v36  ;;  %v8564_v35 = vcombine.high %v283_v30, %v287_v31  ;;  %v290_v36 = vld [vmem:[#allocation5 + $0x6d0] sm:$0xff] }
 0x29d   :  { %7037 = vmatprep.subr.bf16.mxu0 %v8514_v38  ;;  %7365 = vmatprep.subr.bf16.mxu1 %v8516_v33  ;;  %v294_v38 = vld [vmem:[#allocation5 + $0x6f0] sm:$0xff]  ;;  %v291_v33 = vld [vmem:[#allocation5 + $0x6d8] sm:$0xff] }
 0x29e   :  { %v8570_v43 = vcombine.high %v290_v36, %v294_v38  ;;  %v8569_v52 = vcombine.low %v290_v36, %v294_v38  ;;  %v8571_v54 = vcombine.low %v291_v33, %v295_v40  ;;  %v343_v36 = vld [vmem:[#allocation5 + $0x878] sm:$0xff] }
 0x2a0   :  { %7038 = vmatpush1.bf16.msra.mxu0 %v8513_v45  ;;  %7366 = vmatpush1.bf16.msra.mxu1 %v8515_v46  ;;  %v8572_v45 = vcombine.high %v291_v33, %v295_v40  ;;  %v298_v46 = vld [vmem:[#allocation5 + $0x710] sm:$0xff] }
 0x2a1   :  { %7039 = vmatprep.subr.bf16.mxu0 %v8522_v47  ;;  %7367 = vmatprep.subr.bf16.mxu1 %v8524_v48  ;;  %v302_v47 = vld [vmem:[#allocation5 + $0x730] sm:$0xff]  ;;  %v299_v48 = vld [vmem:[#allocation5 + $0x718] sm:$0xff] }
 0x2a2   :  { %v8578_v56 = vcombine.high %v298_v46, %v302_v47  ;;  %v8577_v53 = vcombine.low %v298_v46, %v302_v47  ;;  %v8579_v2 = vcombine.low %v299_v48, %v303_v0  ;;  %v351_v46 = vld [vmem:[#allocation5 + $0x8b8] sm:$0xff] }
 0x2a4   :  { %7040 = vmatpush1.bf16.msra.mxu0 %v8521_v57  ;;  %7368 = vmatpush1.bf16.msra.mxu1 %v8523_v58  ;;  %v8580_v57 = vcombine.high %v299_v48, %v303_v0  ;;  %v306_v58 = vld [vmem:[#allocation5 + $0x750] sm:$0xff] }
 0x2a5   :  { %7041 = vmatprep.subr.bf16.mxu0 %v8530_v60  ;;  %7369 = vmatprep.subr.bf16.mxu1 %v8532_v61  ;;  %v310_v60 = vld [vmem:[#allocation5 + $0x770] sm:$0xff]  ;;  %v307_v61 = vld [vmem:[#allocation5 + $0x758] sm:$0xff] }
 0x2a6   :  { %v8586_v3 = vcombine.high %v306_v58, %v310_v60  ;;  %v8585_v7 = vcombine.low %v306_v58, %v310_v60  ;;  %v8587_v8 = vcombine.low %v307_v61, %v311_v28  ;;  %v359_v58 = vld [vmem:[#allocation5 + $0x8f8] sm:$0xff] }
 0x2a8   :  { %7042 = vmatpush1.bf16.msra.mxu0 %v8529_v9  ;;  %7370 = vmatpush1.bf16.msra.mxu1 %v8531_v4  ;;  %v8588_v9 = vcombine.high %v307_v61, %v311_v28  ;;  %v314_v4 = vld [vmem:[#allocation5 + $0x790] sm:$0xff] }
 0x2a9   :  { %7043 = vmatprep.subr.bf16.mxu0 %v8538_v5  ;;  %7371 = vmatprep.subr.bf16.mxu1 %v8540_v55  ;;  %v318_v5 = vld [vmem:[#allocation5 + $0x7b0] sm:$0xff]  ;;  %v315_v55 = vld [vmem:[#allocation5 + $0x798] sm:$0xff] }
 0x2aa   :  { %v8594_v10 = vcombine.high %v314_v4, %v318_v5  ;;  %v8593_v18 = vcombine.low %v314_v4, %v318_v5  ;;  %v8595_v19 = vcombine.low %v315_v55, %v319_v6 }
 0x2ac   :  { %7044 = vmatpush1.bf16.msra.mxu0 %v8537_v12  ;;  %7372 = vmatpush1.bf16.msra.mxu1 %v8539_v14  ;;  %v8596_v12 = vcombine.high %v315_v55, %v319_v6  ;;  %v322_v14 = vld [vmem:[#allocation5 + $0x7d0] sm:$0xff] }
 0x2ad   :  { %7045 = vmatprep.subr.bf16.mxu0 %v8546_v15  ;;  %7373 = vmatprep.subr.bf16.mxu1 %v8548_v16  ;;  %v326_v15 = vld [vmem:[#allocation5 + $0x7f0] sm:$0xff]  ;;  %v323_v16 = vld [vmem:[#allocation5 + $0x7d8] sm:$0xff] }
 0x2ae   :  { %v8602_v21 = vcombine.high %v322_v14, %v326_v15  ;;  %v8601_v59 = vcombine.low %v322_v14, %v326_v15  ;;  %v8603_v30 = vcombine.low %v323_v16, %v327_v17  ;;  %v370_v6 = vld [vmem:[#allocation5 + $0x950] sm:$0xff] }
 0x2b0   :  { %7046 = vmatpush1.bf16.msra.mxu0 %v8545_v23  ;;  %7374 = vmatpush1.bf16.msra.mxu1 %v8547_v25  ;;  %v8604_v23 = vcombine.high %v323_v16, %v327_v17  ;;  %v330_v25 = vld [vmem:[#allocation5 + $0x810] sm:$0xff] }
 0x2b1   :  { %7047 = vmatprep.subr.bf16.mxu0 %v8554_v26  ;;  %7375 = vmatprep.subr.bf16.mxu1 %v8556_v27  ;;  %v334_v26 = vld [vmem:[#allocation5 + $0x830] sm:$0xff]  ;;  %v331_v27 = vld [vmem:[#allocation5 + $0x818] sm:$0xff] }
 0x2b2   :  { %v8610_v31 = vcombine.high %v330_v25, %v334_v26  ;;  %v8609_v38 = vcombine.low %v330_v25, %v334_v26  ;;  %v8611_v33 = vcombine.low %v331_v27, %v335_v22  ;;  %v378_v17 = vld [vmem:[#allocation5 + $0x990] sm:$0xff] }
 0x2b4   :  { %7048 = vmatpush1.bf16.msra.mxu0 %v8553_v32  ;;  %7376 = vmatpush1.bf16.msra.mxu1 %v8555_v63  ;;  %v8612_v32 = vcombine.high %v331_v27, %v335_v22  ;;  %v338_v63 = vld [vmem:[#allocation5 + $0x850] sm:$0xff] }
 0x2b5   :  { %7049 = vmatprep.subr.bf16.mxu0 %v8562_v34  ;;  %7377 = vmatprep.subr.bf16.mxu1 %v8564_v35  ;;  %v342_v34 = vld [vmem:[#allocation5 + $0x870] sm:$0xff]  ;;  %v339_v35 = vld [vmem:[#allocation5 + $0x858] sm:$0xff] }
 0x2b6   :  { %v8618_v40 = vcombine.high %v338_v63, %v342_v34  ;;  %v8617_v47 = vcombine.low %v338_v63, %v342_v34  ;;  %v8619_v48 = vcombine.low %v339_v35, %v343_v36  ;;  %v386_v22 = vld [vmem:[#allocation5 + $0x9d0] sm:$0xff] }
 0x2b8   :  { %7050 = vmatpush1.bf16.msra.mxu0 %v8561_v41  ;;  %7378 = vmatpush1.bf16.msra.mxu1 %v8563_v42  ;;  %v8620_v41 = vcombine.high %v339_v35, %v343_v36  ;;  %v346_v42 = vld [vmem:[#allocation5 + $0x890] sm:$0xff] }
 0x2b9   :  { %7051 = vmatprep.subr.bf16.mxu0 %v8570_v43  ;;  %7379 = vmatprep.subr.bf16.mxu1 %v8572_v45  ;;  %v350_v43 = vld [vmem:[#allocation5 + $0x8b0] sm:$0xff]  ;;  %v347_v45 = vld [vmem:[#allocation5 + $0x898] sm:$0xff] }
 0x2ba   :  { %v8626_v0 = vcombine.high %v346_v42, %v350_v43  ;;  %v8625_v60 = vcombine.low %v346_v42, %v350_v43  ;;  %v394_v36 = vld [vmem:[#allocation5 + $0xa10] sm:$0xff] }
 0x2bc   :  { %7052 = vmatpush1.bf16.msra.mxu0 %v8569_v52  ;;  %7380 = vmatpush1.bf16.msra.mxu1 %v8571_v54  ;;  %v8628_v52 = vcombine.high %v347_v45, %v351_v46  ;;  %v354_v54 = vld [vmem:[#allocation5 + $0x8d0] sm:$0xff] }
 0x2bd   :  { %7053 = vmatprep.subr.bf16.mxu0 %v8578_v56  ;;  %7381 = vmatprep.subr.bf16.mxu1 %v8580_v57  ;;  %v358_v56 = vld [vmem:[#allocation5 + $0x8f0] sm:$0xff]  ;;  %v355_v57 = vld [vmem:[#allocation5 + $0x8d8] sm:$0xff] }
 0x2be   :  { %v8634_v61 = vcombine.high %v354_v54, %v358_v56  ;;  %v8636_v28 = vcombine.high %v355_v57, %v359_v58  ;;  %v8633_v4 = vcombine.low %v354_v54, %v358_v56  ;;  %v8635_v5 = vcombine.low %v355_v57, %v359_v58  ;;  %v410_v58 = vld [vmem:[#allocation5 + $0xa90] sm:$0xff] }
 0x2c0   :  { %7054 = vmatpush1.bf16.msra.mxu0 %v8577_v53  ;;  %7382 = vmatpush1.bf16.msra.mxu1 %v8579_v2  ;;  %v362_v53 = vld [vmem:[#allocation5 + $0x910] sm:$0xff] }
 0x2c1   :  { %7055 = vmatprep.subr.bf16.mxu0 %v8586_v3  ;;  %7383 = vmatprep.subr.bf16.mxu1 %v8588_v9  ;;  %v366_v2 = vld [vmem:[#allocation5 + $0x930] sm:$0xff]  ;;  %v363_v3 = vld [vmem:[#allocation5 + $0x918] sm:$0xff] }
 0x2c2   :  { %v367_v9 = vld [vmem:[#allocation5 + $0x938] sm:$0xff]  ;;  %v8642_v55 = vcombine.high %v362_v53, %v366_v2 }
 0x2c3   :  { %v8643_v14 = vcombine.low %v363_v3, %v367_v9 }
 0x2c4   :  { %7056 = vmatpush1.bf16.msra.mxu0 %v8585_v7  ;;  %7384 = vmatpush1.bf16.msra.mxu1 %v8587_v8  ;;  %v374_v7 = vld [vmem:[#allocation5 + $0x970] sm:$0xff]  ;;  %v371_v8 = vld [vmem:[#allocation5 + $0x958] sm:$0xff] }
 0x2c5   :  { %7057 = vmatprep.subr.bf16.mxu0 %v8594_v10  ;;  %7385 = vmatprep.subr.bf16.mxu1 %v8596_v12  ;;  %v375_v10 = vld [vmem:[#allocation5 + $0x978] sm:$0xff]  ;;  %v8641_v12 = vcombine.low %v362_v53, %v366_v2  ;;  %v8650_v15 = vcombine.high %v370_v6, %v374_v7 }
 0x2c6   :  { %v8652_v16 = vcombine.high %v371_v8, %v375_v10  ;;  %v8651_v25 = vcombine.low %v371_v8, %v375_v10  ;;  %v426_v10 = vld [vmem:[#allocation5 + $0xb10] sm:$0xff] }
 0x2c8   :  { %7058 = vmatpush1.bf16.msra.mxu0 %v8593_v18  ;;  %7386 = vmatpush1.bf16.msra.mxu1 %v8595_v19  ;;  %v382_v18 = vld [vmem:[#allocation5 + $0x9b0] sm:$0xff]  ;;  %v379_v19 = vld [vmem:[#allocation5 + $0x998] sm:$0xff] }
 0x2c9   :  { %7059 = vmatprep.subr.bf16.mxu0 %v8602_v21  ;;  %7387 = vmatprep.subr.bf16.mxu1 %v8604_v23  ;;  %v383_v21 = vld [vmem:[#allocation5 + $0x9b8] sm:$0xff]  ;;  %v8649_v23 = vcombine.low %v370_v6, %v374_v7  ;;  %v8658_v26 = vcombine.high %v378_v17, %v382_v18 }
 0x2ca   :  { %v8660_v27 = vcombine.high %v379_v19, %v383_v21  ;;  %v8659_v63 = vcombine.low %v379_v19, %v383_v21  ;;  %v434_v21 = vld [vmem:[#allocation5 + $0xb50] sm:$0xff] }
 0x2cc   :  { %7060 = vmatpush1.bf16.msra.mxu0 %v8601_v59  ;;  %7388 = vmatpush1.bf16.msra.mxu1 %v8603_v30  ;;  %v390_v59 = vld [vmem:[#allocation5 + $0x9f0] sm:$0xff]  ;;  %v387_v30 = vld [vmem:[#allocation5 + $0x9d8] sm:$0xff] }
 0x2cd   :  { %7070 = vmatprep.subr.bf16.mxu0 %v8610_v31  ;;  %7398 = vmatprep.subr.bf16.mxu1 %v8612_v32  ;;  %v391_v31 = vld [vmem:[#allocation5 + $0x9f8] sm:$0xff]  ;;  %v8657_v32 = vcombine.low %v378_v17, %v382_v18  ;;  %v8666_v34 = vcombine.high %v386_v22, %v390_v59 }
 0x2ce   :  { %v8668_v35 = vcombine.high %v387_v30, %v391_v31  ;;  %v8667_v42 = vcombine.low %v387_v30, %v391_v31  ;;  %v442_v31 = vld [vmem:[#allocation5 + $0xb90] sm:$0xff] }
 0x2cf   :  { %7062 = vmatmul.mubr.bf16.vlgmr.msra.gmra.mrb[4].mxu0 %v9951_v37  ;;  %7390 = vmatmul.mubr.bf16.vlgmr.msra.gmra.mrb[4].mxu1 %v9951_v37  ;;  %v8627_v37 = vcombine.low %v347_v45, %v351_v46  ;;  %v402_v46 = vld [vmem:[#allocation5 + $0xa50] sm:$0xff] }
 0x2d0   :  { %7071 = vmatpush1.bf16.msra.mxu0 %v8609_v38  ;;  %7399 = vmatpush1.bf16.msra.mxu1 %v8611_v33  ;;  %v398_v38 = vld [vmem:[#allocation5 + $0xa30] sm:$0xff]  ;;  %v395_v33 = vld [vmem:[#allocation5 + $0xa18] sm:$0xff] }
 0x2d1   :  { %7072 = vmatprep.subr.bf16.mxu0 %v8618_v40  ;;  %7400 = vmatprep.subr.bf16.mxu1 %v8620_v41  ;;  %v399_v40 = vld [vmem:[#allocation5 + $0xa38] sm:$0xff]  ;;  %v8665_v41 = vcombine.low %v386_v22, %v390_v59  ;;  %v8674_v43 = vcombine.high %v394_v36, %v398_v38 }
 0x2d2   :  { %7102 = vmatprep.mubr.bf16.mxu0 %v9954_v44  ;;  %7430 = vmatprep.mubr.bf16.mxu1 %v9954_v44  ;;  %v8644_v44 = vcombine.high %v363_v3, %v367_v9  ;;  %v8676_v45 = vcombine.high %v395_v33, %v399_v40  ;;  %v8675_v54 = vcombine.low %v395_v33, %v399_v40  ;;  %v418_v9 = vld [vmem:[#allocation5 + $0xad0] sm:$0xff] }
 0x2d3   :  { %v450_v40 = vld [vmem:[#allocation5 + $0xbd0] sm:$0xff] }
 0x2d4   :  { %7073 = vmatpush1.bf16.msra.mxu0 %v8617_v47  ;;  %7401 = vmatpush1.bf16.msra.mxu1 %v8619_v48  ;;  %v406_v47 = vld [vmem:[#allocation5 + $0xa70] sm:$0xff]  ;;  %v403_v48 = vld [vmem:[#allocation5 + $0xa58] sm:$0xff] }
 0x2d5   :  { %7074 = vmatprep.subr.bf16.mxu0 %v8626_v0  ;;  %7402 = vmatprep.subr.bf16.mxu1 %v8628_v52  ;;  %v407_v0 = vld [vmem:[#allocation5 + $0xa78] sm:$0xff]  ;;  %v8673_v52 = vcombine.low %v394_v36, %v398_v38  ;;  %v8682_v56 = vcombine.high %v402_v46, %v406_v47 }
 0x2d6   :  { %v8684_v57 = vcombine.high %v403_v48, %v407_v0  ;;  %v8683_v53 = vcombine.low %v403_v48, %v407_v0  ;;  %v458_v0 = vld [vmem:[#allocation5 + $0xc10] sm:$0xff] }
 0x2d8   :  { %7075 = vmatpush1.bf16.msra.mxu0 %v8625_v60  ;;  %7403 = vmatpush1.bf16.msra.mxu1 %v8627_v37  ;;  %v414_v60 = vld [vmem:[#allocation5 + $0xab0] sm:$0xff]  ;;  %v411_v37 = vld [vmem:[#allocation5 + $0xa98] sm:$0xff] }
 0x2d9   :  { %7076 = vmatprep.subr.bf16.mxu0 %v8634_v61  ;;  %7404 = vmatprep.subr.bf16.mxu1 %v8636_v28  ;;  %v415_v61 = vld [vmem:[#allocation5 + $0xab8] sm:$0xff]  ;;  %v8681_v28 = vcombine.low %v402_v46, %v406_v47  ;;  %v8690_v2 = vcombine.high %v410_v58, %v414_v60 }
 0x2da   :  { %v8692_v3 = vcombine.high %v411_v37, %v415_v61  ;;  %v8691_v6 = vcombine.low %v411_v37, %v415_v61  ;;  %v466_v61 = vld [vmem:[#allocation5 + $0xc50] sm:$0xff] }
 0x2dc   :  { %7077 = vmatpush1.bf16.msra.mxu0 %v8633_v4  ;;  %7405 = vmatpush1.bf16.msra.mxu1 %v8635_v5  ;;  %v422_v4 = vld [vmem:[#allocation5 + $0xaf0] sm:$0xff]  ;;  %v419_v5 = vld [vmem:[#allocation5 + $0xad8] sm:$0xff] }
 0x2dd   :  { %7078 = vmatprep.subr.bf16.mxu0 %v8642_v55  ;;  %7406 = vmatprep.subr.bf16.mxu1 %v8644_v44  ;;  %v423_v55 = vld [vmem:[#allocation5 + $0xaf8] sm:$0xff]  ;;  %v8689_v44 = vcombine.low %v410_v58, %v414_v60  ;;  %v8698_v7 = vcombine.high %v418_v9, %v422_v4 }
 0x2de   :  { %v8700_v8 = vcombine.high %v419_v5, %v423_v55  ;;  %v8699_v17 = vcombine.low %v419_v5, %v423_v55  ;;  %v474_v55 = vld [vmem:[#allocation5 + $0xc90] sm:$0xff] }
 0x2e0   :  { %7079 = vmatpush1.bf16.msra.mxu0 %v8641_v12  ;;  %7407 = vmatpush1.bf16.msra.mxu1 %v8643_v14  ;;  %v430_v12 = vld [vmem:[#allocation5 + $0xb30] sm:$0xff]  ;;  %v427_v14 = vld [vmem:[#allocation5 + $0xb18] sm:$0xff] }
 0x2e1   :  { %7080 = vmatprep.subr.bf16.mxu0 %v8650_v15  ;;  %7408 = vmatprep.subr.bf16.mxu1 %v8652_v16  ;;  %v431_v15 = vld [vmem:[#allocation5 + $0xb38] sm:$0xff]  ;;  %v8697_v16 = vcombine.low %v418_v9, %v422_v4  ;;  %v8706_v18 = vcombine.high %v426_v10, %v430_v12 }
 0x2e2   :  { %v8708_v19 = vcombine.high %v427_v14, %v431_v15  ;;  %v8707_v22 = vcombine.low %v427_v14, %v431_v15  ;;  %v482_v15 = vld [vmem:[#allocation5 + $0xcd0] sm:$0xff] }
 0x2e4   :  { %7081 = vmatpush1.bf16.msra.mxu0 %v8649_v23  ;;  %7409 = vmatpush1.bf16.msra.mxu1 %v8651_v25  ;;  %v438_v23 = vld [vmem:[#allocation5 + $0xb70] sm:$0xff]  ;;  %v435_v25 = vld [vmem:[#allocation5 + $0xb58] sm:$0xff] }
 0x2e5   :  { %7082 = vmatprep.subr.bf16.mxu0 %v8658_v26  ;;  %7410 = vmatprep.subr.bf16.mxu1 %v8660_v27  ;;  %v439_v26 = vld [vmem:[#allocation5 + $0xb78] sm:$0xff]  ;;  %v8705_v27 = vcombine.low %v426_v10, %v430_v12  ;;  %v8714_v59 = vcombine.high %v434_v21, %v438_v23 }
 0x2e6   :  { %v8716_v30 = vcombine.high %v435_v25, %v439_v26  ;;  %v8715_v36 = vcombine.low %v435_v25, %v439_v26  ;;  %v490_v25 = vld [vmem:[#allocation5 + $0xd10] sm:$0xff] }
 0x2e7   :  { %v494_v26 = vld [vmem:[#allocation5 + $0xd30] sm:$0xff] }
 0x2e8   :  { %7083 = vmatpush1.bf16.msra.mxu0 %v8657_v32  ;;  %7411 = vmatpush1.bf16.msra.mxu1 %v8659_v63  ;;  %v446_v32 = vld [vmem:[#allocation5 + $0xbb0] sm:$0xff]  ;;  %v443_v63 = vld [vmem:[#allocation5 + $0xb98] sm:$0xff] }
 0x2e9   :  { %7084 = vmatprep.subr.bf16.mxu0 %v8666_v34  ;;  %7412 = vmatprep.subr.bf16.mxu1 %v8668_v35  ;;  %v447_v34 = vld [vmem:[#allocation5 + $0xbb8] sm:$0xff]  ;;  %v8713_v35 = vcombine.low %v434_v21, %v438_v23  ;;  %v8722_v38 = vcombine.high %v442_v31, %v446_v32 }
 0x2ea   :  { %v8724_v33 = vcombine.high %v443_v63, %v447_v34  ;;  %v8723_v46 = vcombine.low %v443_v63, %v447_v34  ;;  %v502_v63 = vld [vmem:[#allocation5 + $0xd70] sm:$0xff]  ;;  %v499_v34 = vld [vmem:[#allocation5 + $0xd58] sm:$0xff] }
 0x2ec   :  { %7085 = vmatpush1.bf16.msra.mxu0 %v8665_v41  ;;  %7413 = vmatpush1.bf16.msra.mxu1 %v8667_v42  ;;  %v454_v41 = vld [vmem:[#allocation5 + $0xbf0] sm:$0xff]  ;;  %v451_v42 = vld [vmem:[#allocation5 + $0xbd8] sm:$0xff] }
 0x2ed   :  { %7086 = vmatprep.subr.bf16.mxu0 %v8674_v43  ;;  %7414 = vmatprep.subr.bf16.mxu1 %v8676_v45  ;;  %v455_v43 = vld [vmem:[#allocation5 + $0xbf8] sm:$0xff]  ;;  %v8721_v45 = vcombine.low %v442_v31, %v446_v32  ;;  %v8730_v47 = vcombine.high %v450_v40, %v454_v41  ;;  %v8770_v31 = vcombine.high %v490_v25, %v494_v26  ;;  %v498_v32 = vld [vmem:[#allocation5 + $0xd50] sm:$0xff] }
 0x2ee   :  { %v8732_v48 = vcombine.high %v451_v42, %v455_v43  ;;  %v8731_v58 = vcombine.low %v451_v42, %v455_v43  ;;  %v510_v42 = vld [vmem:[#allocation5 + $0xdb0] sm:$0xff]  ;;  %v507_v43 = vld [vmem:[#allocation5 + $0xd98] sm:$0xff] }
 0x2f0   :  { %7087 = vmatpush1.bf16.msra.mxu0 %v8673_v52  ;;  %7415 = vmatpush1.bf16.msra.mxu1 %v8675_v54  ;;  %v462_v52 = vld [vmem:[#allocation5 + $0xc30] sm:$0xff]  ;;  %v459_v54 = vld [vmem:[#allocation5 + $0xc18] sm:$0xff] }
 0x2f1   :  { %7088 = vmatprep.subr.bf16.mxu0 %v8682_v56  ;;  %7416 = vmatprep.subr.bf16.mxu1 %v8684_v57  ;;  %v463_v56 = vld [vmem:[#allocation5 + $0xc38] sm:$0xff]  ;;  %v8729_v57 = vcombine.low %v450_v40, %v454_v41  ;;  %v8738_v60 = vcombine.high %v458_v0, %v462_v52  ;;  %v506_v41 = vld [vmem:[#allocation5 + $0xd90] sm:$0xff] }
 0x2f2   :  { %v8740_v37 = vcombine.high %v459_v54, %v463_v56  ;;  %v8739_v9 = vcombine.low %v459_v54, %v463_v56  ;;  %v514_v54 = vld [vmem:[#allocation5 + $0xdd0] sm:$0xff] }
 0x2f3   :  { %v518_v56 = vld [vmem:[#allocation5 + $0xdf0] sm:$0xff] }
 0x2f4   :  { %7089 = vmatpush1.bf16.msra.mxu0 %v8681_v28  ;;  %7417 = vmatpush1.bf16.msra.mxu1 %v8683_v53  ;;  %v470_v28 = vld [vmem:[#allocation5 + $0xc70] sm:$0xff]  ;;  %v467_v53 = vld [vmem:[#allocation5 + $0xc58] sm:$0xff] }
 0x2f5   :  { %7090 = vmatprep.subr.bf16.mxu0 %v8690_v2  ;;  %7418 = vmatprep.subr.bf16.mxu1 %v8692_v3  ;;  %v471_v2 = vld [vmem:[#allocation5 + $0xc78] sm:$0xff]  ;;  %v8737_v3 = vcombine.low %v458_v0, %v462_v52  ;;  %v8746_v4 = vcombine.high %v466_v61, %v470_v28 }
 0x2f6   :  { %v8748_v5 = vcombine.high %v467_v53, %v471_v2  ;;  %v8747_v10 = vcombine.low %v467_v53, %v471_v2  ;;  %v8785_v53 = vcombine.low %v506_v41, %v510_v42 }
 0x2f8   :  { %7091 = vmatpush1.bf16.msra.mxu0 %v8689_v44  ;;  %7419 = vmatpush1.bf16.msra.mxu1 %v8691_v6  ;;  %v478_v44 = vld [vmem:[#allocation5 + $0xcb0] sm:$0xff]  ;;  %v475_v6 = vld [vmem:[#allocation5 + $0xc98] sm:$0xff] }
 0x2f9   :  { %7092 = vmatprep.subr.bf16.mxu0 %v8698_v7  ;;  %7420 = vmatprep.subr.bf16.mxu1 %v8700_v8  ;;  %v479_v7 = vld [vmem:[#allocation5 + $0xcb8] sm:$0xff]  ;;  %v8745_v8 = vcombine.low %v466_v61, %v470_v28  ;;  %v8754_v12 = vcombine.high %v474_v55, %v478_v44 }
 0x2fa   :  { %v8756_v14 = vcombine.high %v475_v6, %v479_v7 }
 0x2fc   :  { %7093 = vmatpush1.bf16.msra.mxu0 %v8697_v16  ;;  %7421 = vmatpush1.bf16.msra.mxu1 %v8699_v17  ;;  %v486_v16 = vld [vmem:[#allocation5 + $0xcf0] sm:$0xff]  ;;  %v483_v17 = vld [vmem:[#allocation5 + $0xcd8] sm:$0xff] }
 0x2fd   :  { %7094 = vmatprep.subr.bf16.mxu0 %v8706_v18  ;;  %7422 = vmatprep.subr.bf16.mxu1 %v8708_v19  ;;  %v487_v18 = vld [vmem:[#allocation5 + $0xcf8] sm:$0xff]  ;;  %v8753_v19 = vcombine.low %v474_v55, %v478_v44  ;;  %v8762_v21 = vcombine.high %v482_v15, %v486_v16  ;;  %v522_v44 = vld [vmem:[#allocation5 + $0xe10] sm:$0xff] }
 0x2fe   :  { %v8764_v23 = vcombine.high %v483_v17, %v487_v18 }
 0x300   :  { %7095 = vmatpush1.bf16.msra.mxu0 %v8705_v27  ;;  %7423 = vmatpush1.bf16.msra.mxu1 %v8707_v22  ;;  %v491_v27 = vld [vmem:[#allocation5 + $0xd18] sm:$0xff] }
 0x301   :  { %7096 = vmatprep.subr.bf16.mxu0 %v8714_v59  ;;  %7424 = vmatprep.subr.bf16.mxu1 %v8716_v30  ;;  %v495_v22 = vld [vmem:[#allocation5 + $0xd38] sm:$0xff]  ;;  %v8761_v59 = vcombine.low %v482_v15, %v486_v16  ;;  %v8763_v30 = vcombine.low %v483_v17, %v487_v18  ;;  %v530_v16 = vld [vmem:[#allocation5 + $0xe50] sm:$0xff] }
 0x302   :  { %v534_v17 = vld [vmem:[#allocation5 + $0xe70] sm:$0xff]  ;;  %v531_v18 = vld [vmem:[#allocation5 + $0xe58] sm:$0xff] }
 0x304   :  { %7097 = vmatpush1.bf16.msra.mxu0 %v8713_v35  ;;  %7425 = vmatpush1.bf16.msra.mxu1 %v8715_v36  ;;  %v503_v35 = vld [vmem:[#allocation5 + $0xd78] sm:$0xff]  ;;  %v8769_v36 = vcombine.low %v490_v25, %v494_v26  ;;  %v538_v26 = vld [vmem:[#allocation5 + $0xe90] sm:$0xff] }
 0x305   :  { %7098 = vmatprep.subr.bf16.mxu0 %v8722_v38  ;;  %7426 = vmatprep.subr.bf16.mxu1 %v8724_v33  ;;  %v8771_v38 = vcombine.low %v491_v27, %v495_v22  ;;  %v8778_v33 = vcombine.high %v498_v32, %v502_v63  ;;  %v8780_v40 = vcombine.high %v499_v34, %v503_v35 }
 0x308   :  { %7099 = vmatpush1.bf16.msra.mxu0 %v8721_v45  ;;  %7427 = vmatpush1.bf16.msra.mxu1 %v8723_v46  ;;  %v511_v45 = vld [vmem:[#allocation5 + $0xdb8] sm:$0xff]  ;;  %v8777_v46 = vcombine.low %v498_v32, %v502_v63  ;;  %v546_v63 = vld [vmem:[#allocation5 + $0xed0] sm:$0xff] }
 0x309   :  { %7100 = vmatprep.subr.bf16.mxu0 %v8730_v47  ;;  %7428 = vmatprep.subr.bf16.mxu1 %v8732_v48  ;;  %v8779_v47 = vcombine.low %v499_v34, %v503_v35  ;;  %v8786_v48 = vcombine.high %v506_v41, %v510_v42  ;;  %v8788_v52 = vcombine.high %v507_v43, %v511_v45  ;;  %v550_v34 = vld [vmem:[#allocation5 + $0xef0] sm:$0xff]  ;;  %v547_v35 = vld [vmem:[#allocation5 + $0xed8] sm:$0xff] }
 0x30a   :  { %v554_v42 = vld [vmem:[#allocation5 + $0xf10] sm:$0xff] }
 0x30c   :  { %7101 = vmatpush1.bf16.msra.mxu0 %v8729_v57  ;;  %7429 = vmatpush1.bf16.msra.mxu1 %v8731_v58 }
 0x30d   :  { %7111 = vmatprep.subr.bf16.mxu0 %v8738_v60  ;;  %7439 = vmatprep.subr.bf16.mxu1 %v8740_v37  ;;  %v515_v60 = vld [vmem:[#allocation5 + $0xdd8] sm:$0xff] }
 0x30e   :  { %v519_v37 = vld [vmem:[#allocation5 + $0xdf8] sm:$0xff] }
 0x30f   :  { %7103 = vmatmul.mubr.bf16.vlgmr.msra.gmra.mrb[4].mxu0 %v9962_v51  ;;  %7431 = vmatmul.mubr.bf16.vlgmr.msra.gmra.mrb[4].mxu1 %v9962_v51  ;;  %v8755_v51 = vcombine.low %v475_v6, %v479_v7  ;;  %v8796_v55 = vcombine.high %v515_v60, %v519_v37  ;;  %v526_v6 = vld [vmem:[#allocation5 + $0xe30] sm:$0xff]  ;;  %v523_v7 = vld [vmem:[#allocation5 + $0xe18] sm:$0xff] }
 0x310   :  { %7112 = vmatpush1.bf16.msra.mxu0 %v8737_v3  ;;  %7440 = vmatpush1.bf16.msra.mxu1 %v8739_v9  ;;  %v8787_v9 = vcombine.low %v507_v43, %v511_v45  ;;  %v558_v43 = vld [vmem:[#allocation5 + $0xf30] sm:$0xff]  ;;  %v555_v45 = vld [vmem:[#allocation5 + $0xf18] sm:$0xff] }
 0x311   :  { %7113 = vmatprep.subr.bf16.mxu0 %v8746_v4  ;;  %7441 = vmatprep.subr.bf16.mxu1 %v8748_v5  ;;  %v8794_v4 = vcombine.high %v514_v54, %v518_v56 }
 0x312   :  { %7143 = vmatprep.mubr.bf16.mxu0 %v9966_v62  ;;  %7471 = vmatprep.mubr.bf16.mxu1 %v9966_v62  ;;  %v8772_v62 = vcombine.high %v491_v27, %v495_v22  ;;  %v542_v27 = vld [vmem:[#allocation5 + $0xeb0] sm:$0xff]  ;;  %v539_v22 = vld [vmem:[#allocation5 + $0xe98] sm:$0xff] }
 0x314   :  { %7114 = vmatpush1.bf16.msra.mxu0 %v8745_v8  ;;  %7442 = vmatpush1.bf16.msra.mxu1 %v8747_v10  ;;  %v527_v8 = vld [vmem:[#allocation5 + $0xe38] sm:$0xff]  ;;  %v8793_v10 = vcombine.low %v514_v54, %v518_v56  ;;  %v562_v56 = vld [vmem:[#allocation5 + $0xf50] sm:$0xff] }
 0x315   :  { %7115 = vmatprep.subr.bf16.mxu0 %v8754_v12  ;;  %7443 = vmatprep.subr.bf16.mxu1 %v8756_v14  ;;  %v8795_v12 = vcombine.low %v515_v60, %v519_v37  ;;  %v8802_v14 = vcombine.high %v522_v44, %v526_v6  ;;  %v8804_v15 = vcombine.high %v523_v7, %v527_v8  ;;  %v566_v60 = vld [vmem:[#allocation5 + $0xf70] sm:$0xff]  ;;  %v563_v37 = vld [vmem:[#allocation5 + $0xf58] sm:$0xff] }
 0x318   :  { %7116 = vmatpush1.bf16.msra.mxu0 %v8753_v19  ;;  %7444 = vmatpush1.bf16.msra.mxu1 %v8755_v51  ;;  %v535_v19 = vld [vmem:[#allocation5 + $0xe78] sm:$0xff]  ;;  %v8801_v51 = vcombine.low %v522_v44, %v526_v6  ;;  %v8841_v6 = vcombine.low %v562_v56, %v566_v60 }
 0x319   :  { %7117 = vmatprep.subr.bf16.mxu0 %v8762_v21  ;;  %7445 = vmatprep.subr.bf16.mxu1 %v8764_v23  ;;  %v8803_v21 = vcombine.low %v523_v7, %v527_v8  ;;  %v8810_v23 = vcombine.high %v530_v16, %v534_v17  ;;  %v8812_v25 = vcombine.high %v531_v18, %v535_v19  ;;  %v575_v44 = vld [vmem:[#allocation5 + $0xfb8] sm:$0xff] }
 0x31c   :  { %7118 = vmatpush1.bf16.msra.mxu0 %v8761_v59  ;;  %7446 = vmatpush1.bf16.msra.mxu1 %v8763_v30  ;;  %v543_v59 = vld [vmem:[#allocation5 + $0xeb8] sm:$0xff]  ;;  %v8809_v30 = vcombine.low %v530_v16, %v534_v17 }
 0x31d   :  { %7119 = vmatprep.subr.bf16.mxu0 %v8770_v31  ;;  %7447 = vmatprep.subr.bf16.mxu1 %v8772_v62  ;;  %v8811_v31 = vcombine.low %v531_v18, %v535_v19  ;;  %v8818_v62 = vcombine.high %v538_v26, %v542_v27  ;;  %v8820_v32 = vcombine.high %v539_v22, %v543_v59  ;;  %v583_v16 = vld [vmem:[#allocation5 + $0xff8] sm:$0xff] }
 0x320   :  { %7120 = vmatpush1.bf16.msra.mxu0 %v8769_v36  ;;  %7448 = vmatpush1.bf16.msra.mxu1 %v8771_v38  ;;  %v551_v36 = vld [vmem:[#allocation5 + $0xef8] sm:$0xff]  ;;  %v8817_v38 = vcombine.low %v538_v26, %v542_v27 }
 0x321   :  { %7121 = vmatprep.subr.bf16.mxu0 %v8778_v33  ;;  %7449 = vmatprep.subr.bf16.mxu1 %v8780_v40  ;;  %v8819_v33 = vcombine.low %v539_v22, %v543_v59  ;;  %v8826_v40 = vcombine.high %v546_v63, %v550_v34  ;;  %v8828_v41 = vcombine.high %v547_v35, %v551_v36  ;;  %v591_v26 = vld [vmem:[#allocation5 + $0x1038] sm:$0xff] }
 0x322   :  { %v10053_v0 = vpop.f32.mrb[0].mxu0  ;;  %v10055_v57 = vpop.f32.mrb[0].mxu1 }
 0x323   :  { %v10057_v58 = vpop.f32.mrb[1].mxu0  ;;  %v10059_v61 = vpop.f32.mrb[1].mxu1 }
 0x324   :  { %v6657_v28 = vpop.f32.mrb[2].mxu0  ;;  %7122 = vmatpush1.bf16.msra.mxu0 %v8777_v46  ;;  %v6985_v2 = vpop.f32.mrb[2].mxu1  ;;  %7450 = vmatpush1.bf16.msra.mxu1 %v8779_v47  ;;  %v559_v46 = vld [vmem:[#allocation5 + $0xf38] sm:$0xff]  ;;  %v8825_v47 = vcombine.low %v546_v63, %v550_v34 }
 0x325   :  { %v6658_v3 = vpop.f32.mrb[3].mxu0  ;;  %7123 = vmatprep.subr.bf16.mxu0 %v8786_v48  ;;  %v6986_v5 = vpop.f32.mrb[3].mxu1  ;;  %7451 = vmatprep.subr.bf16.mxu1 %v8788_v52  ;;  %v8827_v48 = vcombine.low %v547_v35, %v551_v36  ;;  %v8834_v52 = vcombine.high %v554_v42, %v558_v43  ;;  %v8836_v54 = vcombine.high %v555_v45, %v559_v46  ;;  %v567_v28 = vld [vmem:[#allocation5 + $0xf78] sm:$0xff] }
 0x326   :  { %v8835_v2 = vcombine.low %v555_v45, %v559_v46  ;;  %v8842_v3 = vcombine.high %v562_v56, %v566_v60  ;;  %v574_v5 = vld [vmem:[#allocation5 + $0xfb0] sm:$0xff]  ;;  %v8843_v7 = vcombine.low %v563_v37, %v567_v28  ;;  %v599_v63 = vld [vmem:[#allocation5 + $0x1078] sm:$0xff] }
 0x327   :  { %v615_v56 = vld [vmem:[#allocation5 + $0x10f8] sm:$0xff] }
 0x328   :  { %7124 = vmatpush1.bf16.msra.mxu0 %v8785_v53  ;;  %7452 = vmatpush1.bf16.msra.mxu1 %v8787_v9  ;;  %v8833_v53 = vcombine.low %v554_v42, %v558_v43  ;;  %v8844_v9 = vcombine.high %v563_v37, %v567_v28  ;;  %v607_v42 = vld [vmem:[#allocation5 + $0x10b8] sm:$0xff] }
 0x329   :  { %7125 = vmatprep.subr.bf16.mxu0 %v8794_v4  ;;  %7453 = vmatprep.subr.bf16.mxu1 %v8796_v55  ;;  %v570_v4 = vld [vmem:[#allocation5 + $0xf90] sm:$0xff]  ;;  %v571_v55 = vld [vmem:[#allocation5 + $0xf98] sm:$0xff] }
 0x32a   :  { %v8850_v8 = vcombine.high %v570_v4, %v574_v5  ;;  %v8849_v17 = vcombine.low %v570_v4, %v574_v5  ;;  %v8851_v18 = vcombine.low %v571_v55, %v575_v44 }
 0x32c   :  { %7126 = vmatpush1.bf16.msra.mxu0 %v8793_v10  ;;  %7454 = vmatpush1.bf16.msra.mxu1 %v8795_v12  ;;  %v8852_v10 = vcombine.high %v571_v55, %v575_v44  ;;  %v578_v12 = vld [vmem:[#allocation5 + $0xfd0] sm:$0xff] }
 0x32d   :  { %7127 = vmatprep.subr.bf16.mxu0 %v8802_v14  ;;  %7455 = vmatprep.subr.bf16.mxu1 %v8804_v15  ;;  %v582_v14 = vld [vmem:[#allocation5 + $0xff0] sm:$0xff]  ;;  %v579_v15 = vld [vmem:[#allocation5 + $0xfd8] sm:$0xff] }
 0x32e   :  { %v8858_v19 = vcombine.high %v578_v12, %v582_v14  ;;  %v8857_v27 = vcombine.low %v578_v12, %v582_v14  ;;  %v8859_v22 = vcombine.low %v579_v15, %v583_v16  ;;  %v626_v44 = vld [vmem:[#allocation5 + $0x1150] sm:$0xff] }
 0x330   :  { %7128 = vmatpush1.bf16.msra.mxu0 %v8801_v51  ;;  %7456 = vmatpush1.bf16.msra.mxu1 %v8803_v21  ;;  %v8860_v51 = vcombine.high %v579_v15, %v583_v16  ;;  %v586_v21 = vld [vmem:[#allocation5 + $0x1010] sm:$0xff] }
 0x331   :  { %7129 = vmatprep.subr.bf16.mxu0 %v8810_v23  ;;  %7457 = vmatprep.subr.bf16.mxu1 %v8812_v25  ;;  %v590_v23 = vld [vmem:[#allocation5 + $0x1030] sm:$0xff]  ;;  %v587_v25 = vld [vmem:[#allocation5 + $0x1018] sm:$0xff] }
 0x332   :  { %v8866_v59 = vcombine.high %v586_v21, %v590_v23  ;;  %v8865_v34 = vcombine.low %v586_v21, %v590_v23  ;;  %v8867_v35 = vcombine.low %v587_v25, %v591_v26  ;;  %v634_v16 = vld [vmem:[#allocation5 + $0x1190] sm:$0xff] }
 0x334   :  { %7130 = vmatpush1.bf16.msra.mxu0 %v8809_v30  ;;  %7458 = vmatpush1.bf16.msra.mxu1 %v8811_v31  ;;  %v8868_v30 = vcombine.high %v587_v25, %v591_v26  ;;  %v594_v31 = vld [vmem:[#allocation5 + $0x1050] sm:$0xff] }
 0x335   :  { %7131 = vmatprep.subr.bf16.mxu0 %v8818_v62  ;;  %7459 = vmatprep.subr.bf16.mxu1 %v8820_v32  ;;  %v598_v62 = vld [vmem:[#allocation5 + $0x1070] sm:$0xff]  ;;  %v595_v32 = vld [vmem:[#allocation5 + $0x1058] sm:$0xff] }
 0x336   :  { %v8874_v36 = vcombine.high %v594_v31, %v598_v62  ;;  %v8873_v43 = vcombine.low %v594_v31, %v598_v62  ;;  %v8875_v45 = vcombine.low %v595_v32, %v599_v63  ;;  %v642_v26 = vld [vmem:[#allocation5 + $0x11d0] sm:$0xff] }
 0x338   :  { %7132 = vmatpush1.bf16.msra.mxu0 %v8817_v38  ;;  %7460 = vmatpush1.bf16.msra.mxu1 %v8819_v33  ;;  %v8876_v38 = vcombine.high %v595_v32, %v599_v63  ;;  %v602_v33 = vld [vmem:[#allocation5 + $0x1090] sm:$0xff] }
 0x339   :  { %7133 = vmatprep.subr.bf16.mxu0 %v8826_v40  ;;  %7461 = vmatprep.subr.bf16.mxu1 %v8828_v41  ;;  %v606_v40 = vld [vmem:[#allocation5 + $0x10b0] sm:$0xff]  ;;  %v603_v41 = vld [vmem:[#allocation5 + $0x1098] sm:$0xff] }
 0x33a   :  { %v8882_v46 = vcombine.high %v602_v33, %v606_v40  ;;  %v8881_v60 = vcombine.low %v602_v33, %v606_v40  ;;  %v650_v63 = vld [vmem:[#allocation5 + $0x1210] sm:$0xff] }
 0x33c   :  { %7134 = vmatpush1.bf16.msra.mxu0 %v8825_v47  ;;  %7462 = vmatpush1.bf16.msra.mxu1 %v8827_v48  ;;  %v8884_v47 = vcombine.high %v603_v41, %v607_v42  ;;  %v610_v48 = vld [vmem:[#allocation5 + $0x10d0] sm:$0xff] }
 0x33d   :  { %7135 = vmatprep.subr.bf16.mxu0 %v8834_v52  ;;  %7463 = vmatprep.subr.bf16.mxu1 %v8836_v54  ;;  %v614_v52 = vld [vmem:[#allocation5 + $0x10f0] sm:$0xff]  ;;  %v611_v54 = vld [vmem:[#allocation5 + $0x10d8] sm:$0xff] }
 0x33e   :  { %v8890_v37 = vcombine.high %v610_v48, %v614_v52  ;;  %v8892_v28 = vcombine.high %v611_v54, %v615_v56  ;;  %v8889_v4 = vcombine.low %v610_v48, %v614_v52  ;;  %v8891_v5 = vcombine.low %v611_v54, %v615_v56  ;;  %v666_v56 = vld [vmem:[#allocation5 + $0x1290] sm:$0xff] }
 0x340   :  { %7136 = vmatpush1.bf16.msra.mxu0 %v8833_v53  ;;  %7464 = vmatpush1.bf16.msra.mxu1 %v8835_v2  ;;  %v618_v53 = vld [vmem:[#allocation5 + $0x1110] sm:$0xff] }
 0x341   :  { %7137 = vmatprep.subr.bf16.mxu0 %v8842_v3  ;;  %7465 = vmatprep.subr.bf16.mxu1 %v8844_v9  ;;  %v622_v2 = vld [vmem:[#allocation5 + $0x1130] sm:$0xff]  ;;  %v619_v3 = vld [vmem:[#allocation5 + $0x1118] sm:$0xff] }
 0x342   :  { %v623_v9 = vld [vmem:[#allocation5 + $0x1138] sm:$0xff]  ;;  %v8898_v55 = vcombine.high %v618_v53, %v622_v2 }
 0x343   :  { %v8899_v12 = vcombine.low %v619_v3, %v623_v9 }
 0x344   :  { %7138 = vmatpush1.bf16.msra.mxu0 %v8841_v6  ;;  %7466 = vmatpush1.bf16.msra.mxu1 %v8843_v7  ;;  %v630_v6 = vld [vmem:[#allocation5 + $0x1170] sm:$0xff]  ;;  %v627_v7 = vld [vmem:[#allocation5 + $0x1158] sm:$0xff] }
 0x345   :  { %7139 = vmatprep.subr.bf16.mxu0 %v8850_v8  ;;  %7467 = vmatprep.subr.bf16.mxu1 %v8852_v10  ;;  %v631_v8 = vld [vmem:[#allocation5 + $0x1178] sm:$0xff]  ;;  %v8897_v10 = vcombine.low %v618_v53, %v622_v2  ;;  %v8906_v14 = vcombine.high %v626_v44, %v630_v6 }
 0x346   :  { %v8908_v15 = vcombine.high %v627_v7, %v631_v8  ;;  %v8907_v21 = vcombine.low %v627_v7, %v631_v8  ;;  %v682_v8 = vld [vmem:[#allocation5 + $0x1310] sm:$0xff] }
 0x348   :  { %7140 = vmatpush1.bf16.msra.mxu0 %v8849_v17  ;;  %7468 = vmatpush1.bf16.msra.mxu1 %v8851_v18  ;;  %v638_v17 = vld [vmem:[#allocation5 + $0x11b0] sm:$0xff]  ;;  %v635_v18 = vld [vmem:[#allocation5 + $0x1198] sm:$0xff] }
 0x349   :  { %7141 = vmatprep.subr.bf16.mxu0 %v8858_v19  ;;  %7469 = vmatprep.subr.bf16.mxu1 %v8860_v51  ;;  %v639_v19 = vld [vmem:[#allocation5 + $0x11b8] sm:$0xff]  ;;  %v8905_v51 = vcombine.low %v626_v44, %v630_v6  ;;  %v8914_v23 = vcombine.high %v634_v16, %v638_v17 }
 0x34a   :  { %v8916_v25 = vcombine.high %v635_v18, %v639_v19  ;;  %v8915_v31 = vcombine.low %v635_v18, %v639_v19  ;;  %v690_v19 = vld [vmem:[#allocation5 + $0x1350] sm:$0xff] }
 0x34c   :  { %7142 = vmatpush1.bf16.msra.mxu0 %v8857_v27  ;;  %7470 = vmatpush1.bf16.msra.mxu1 %v8859_v22  ;;  %v646_v27 = vld [vmem:[#allocation5 + $0x11f0] sm:$0xff]  ;;  %v643_v22 = vld [vmem:[#allocation5 + $0x11d8] sm:$0xff] }
 0x34d   :  { %7152 = vmatprep.subr.bf16.mxu0 %v8866_v59  ;;  %7480 = vmatprep.subr.bf16.mxu1 %v8868_v30  ;;  %v647_v59 = vld [vmem:[#allocation5 + $0x11f8] sm:$0xff]  ;;  %v8913_v30 = vcombine.low %v634_v16, %v638_v17  ;;  %v8922_v62 = vcombine.high %v642_v26, %v646_v27 }
 0x34e   :  { %v8924_v32 = vcombine.high %v643_v22, %v647_v59  ;;  %v8923_v33 = vcombine.low %v643_v22, %v647_v59  ;;  %v698_v59 = vld [vmem:[#allocation5 + $0x1390] sm:$0xff] }
 0x34f   :  { %7144 = vmatmul.mubr.bf16.vlgmr.msra.gmra.mrb[4].mxu0 %v9982_v11  ;;  %7472 = vmatmul.mubr.bf16.vlgmr.msra.gmra.mrb[4].mxu1 %v9982_v11  ;;  %v8883_v11 = vcombine.low %v603_v41, %v607_v42  ;;  %v658_v42 = vld [vmem:[#allocation5 + $0x1250] sm:$0xff] }
 0x350   :  { %7153 = vmatpush1.bf16.msra.mxu0 %v8865_v34  ;;  %7481 = vmatpush1.bf16.msra.mxu1 %v8867_v35  ;;  %v654_v34 = vld [vmem:[#allocation5 + $0x1230] sm:$0xff]  ;;  %v651_v35 = vld [vmem:[#allocation5 + $0x1218] sm:$0xff] }
 0x351   :  { %7154 = vmatprep.subr.bf16.mxu0 %v8874_v36  ;;  %7482 = vmatprep.subr.bf16.mxu1 %v8876_v38  ;;  %v655_v36 = vld [vmem:[#allocation5 + $0x1238] sm:$0xff]  ;;  %v8921_v38 = vcombine.low %v642_v26, %v646_v27  ;;  %v8930_v40 = vcombine.high %v650_v63, %v654_v34 }
 0x352   :  { %7184 = vmatprep.mubr.bf16.mxu0 %v9985_v20  ;;  %7512 = vmatprep.mubr.bf16.mxu1 %v9985_v20  ;;  %v8900_v20 = vcombine.high %v619_v3, %v623_v9  ;;  %v8932_v41 = vcombine.high %v651_v35, %v655_v36  ;;  %v8931_v48 = vcombine.low %v651_v35, %v655_v36  ;;  %v674_v9 = vld [vmem:[#allocation5 + $0x12d0] sm:$0xff] }
 0x353   :  { %v706_v36 = vld [vmem:[#allocation5 + $0x13d0] sm:$0xff] }
 0x354   :  { %7155 = vmatpush1.bf16.msra.mxu0 %v8873_v43  ;;  %7483 = vmatpush1.bf16.msra.mxu1 %v8875_v45  ;;  %v662_v43 = vld [vmem:[#allocation5 + $0x1270] sm:$0xff]  ;;  %v659_v45 = vld [vmem:[#allocation5 + $0x1258] sm:$0xff] }
 0x355   :  { %7156 = vmatprep.subr.bf16.mxu0 %v8882_v46  ;;  %7484 = vmatprep.subr.bf16.mxu1 %v8884_v47  ;;  %v663_v46 = vld [vmem:[#allocation5 + $0x1278] sm:$0xff]  ;;  %v8929_v47 = vcombine.low %v650_v63, %v654_v34  ;;  %v8938_v52 = vcombine.high %v658_v42, %v662_v43 }
 0x356   :  { %v8940_v54 = vcombine.high %v659_v45, %v663_v46  ;;  %v8939_v53 = vcombine.low %v659_v45, %v663_v46  ;;  %v714_v46 = vld [vmem:[#allocation5 + $0x1410] sm:$0xff] }
 0x358   :  { %7157 = vmatpush1.bf16.msra.mxu0 %v8881_v60  ;;  %7485 = vmatpush1.bf16.msra.mxu1 %v8883_v11  ;;  %v670_v60 = vld [vmem:[#allocation5 + $0x12b0] sm:$0xff]  ;;  %v667_v11 = vld [vmem:[#allocation5 + $0x1298] sm:$0xff] }
 0x359   :  { %7158 = vmatprep.subr.bf16.mxu0 %v8890_v37  ;;  %7486 = vmatprep.subr.bf16.mxu1 %v8892_v28  ;;  %v671_v37 = vld [vmem:[#allocation5 + $0x12b8] sm:$0xff]  ;;  %v8937_v28 = vcombine.low %v658_v42, %v662_v43  ;;  %v8946_v2 = vcombine.high %v666_v56, %v670_v60 }
 0x35a   :  { %v8948_v3 = vcombine.high %v667_v11, %v671_v37  ;;  %v8947_v44 = vcombine.low %v667_v11, %v671_v37  ;;  %v722_v37 = vld [vmem:[#allocation5 + $0x1450] sm:$0xff] }
 0x35c   :  { %7159 = vmatpush1.bf16.msra.mxu0 %v8889_v4  ;;  %7487 = vmatpush1.bf16.msra.mxu1 %v8891_v5  ;;  %v678_v4 = vld [vmem:[#allocation5 + $0x12f0] sm:$0xff]  ;;  %v675_v5 = vld [vmem:[#allocation5 + $0x12d8] sm:$0xff] }
 0x35d   :  { %7160 = vmatprep.subr.bf16.mxu0 %v8898_v55  ;;  %7488 = vmatprep.subr.bf16.mxu1 %v8900_v20  ;;  %v679_v55 = vld [vmem:[#allocation5 + $0x12f8] sm:$0xff]  ;;  %v8945_v20 = vcombine.low %v666_v56, %v670_v60  ;;  %v8954_v6 = vcombine.high %v674_v9, %v678_v4 }
 0x35e   :  { %v8956_v7 = vcombine.high %v675_v5, %v679_v55  ;;  %v8955_v16 = vcombine.low %v675_v5, %v679_v55  ;;  %v730_v55 = vld [vmem:[#allocation5 + $0x1490] sm:$0xff] }
 0x360   :  { %7161 = vmatpush1.bf16.msra.mxu0 %v8897_v10  ;;  %7489 = vmatpush1.bf16.msra.mxu1 %v8899_v12  ;;  %v686_v10 = vld [vmem:[#allocation5 + $0x1330] sm:$0xff]  ;;  %v683_v12 = vld [vmem:[#allocation5 + $0x1318] sm:$0xff] }
 0x361   :  { %7162 = vmatprep.subr.bf16.mxu0 %v8906_v14  ;;  %7490 = vmatprep.subr.bf16.mxu1 %v8908_v15  ;;  %v687_v14 = vld [vmem:[#allocation5 + $0x1338] sm:$0xff]  ;;  %v8953_v15 = vcombine.low %v674_v9, %v678_v4  ;;  %v8962_v17 = vcombine.high %v682_v8, %v686_v10 }
 0x362   :  { %v8964_v18 = vcombine.high %v683_v12, %v687_v14  ;;  %v8963_v26 = vcombine.low %v683_v12, %v687_v14  ;;  %v738_v14 = vld [vmem:[#allocation5 + $0x14d0] sm:$0xff] }
 0x364   :  { %7163 = vmatpush1.bf16.msra.mxu0 %v8905_v51  ;;  %7491 = vmatpush1.bf16.msra.mxu1 %v8907_v21  ;;  %v694_v51 = vld [vmem:[#allocation5 + $0x1370] sm:$0xff]  ;;  %v691_v21 = vld [vmem:[#allocation5 + $0x1358] sm:$0xff] }
 0x365   :  { %7164 = vmatprep.subr.bf16.mxu0 %v8914_v23  ;;  %7492 = vmatprep.subr.bf16.mxu1 %v8916_v25  ;;  %v695_v23 = vld [vmem:[#allocation5 + $0x1378] sm:$0xff]  ;;  %v8961_v25 = vcombine.low %v682_v8, %v686_v10  ;;  %v8970_v27 = vcombine.high %v690_v19, %v694_v51 }
 0x366   :  { %v8972_v22 = vcombine.high %v691_v21, %v695_v23  ;;  %v8971_v63 = vcombine.low %v691_v21, %v695_v23  ;;  %v746_v21 = vld [vmem:[#allocation5 + $0x1510] sm:$0xff] }
 0x367   :  { %v750_v23 = vld [vmem:[#allocation5 + $0x1530] sm:$0xff] }
 0x368   :  { %7165 = vmatpush1.bf16.msra.mxu0 %v8913_v30  ;;  %7493 = vmatpush1.bf16.msra.mxu1 %v8915_v31  ;;  %v702_v30 = vld [vmem:[#allocation5 + $0x13b0] sm:$0xff]  ;;  %v699_v31 = vld [vmem:[#allocation5 + $0x1398] sm:$0xff] }
 0x369   :  { %7166 = vmatprep.subr.bf16.mxu0 %v8922_v62  ;;  %7494 = vmatprep.subr.bf16.mxu1 %v8924_v32  ;;  %v703_v62 = vld [vmem:[#allocation5 + $0x13b8] sm:$0xff]  ;;  %v8969_v32 = vcombine.low %v690_v19, %v694_v51  ;;  %v8978_v34 = vcombine.high %v698_v59, %v702_v30 }
 0x36a   :  { %v8980_v35 = vcombine.high %v699_v31, %v703_v62  ;;  %v8979_v42 = vcombine.low %v699_v31, %v703_v62  ;;  %v758_v31 = vld [vmem:[#allocation5 + $0x1570] sm:$0xff]  ;;  %v755_v62 = vld [vmem:[#allocation5 + $0x1558] sm:$0xff] }
 0x36c   :  { %7167 = vmatpush1.bf16.msra.mxu0 %v8921_v38  ;;  %7495 = vmatpush1.bf16.msra.mxu1 %v8923_v33  ;;  %v710_v38 = vld [vmem:[#allocation5 + $0x13f0] sm:$0xff]  ;;  %v707_v33 = vld [vmem:[#allocation5 + $0x13d8] sm:$0xff] }
 0x36d   :  { %7168 = vmatprep.subr.bf16.mxu0 %v8930_v40  ;;  %7496 = vmatprep.subr.bf16.mxu1 %v8932_v41  ;;  %v711_v40 = vld [vmem:[#allocation5 + $0x13f8] sm:$0xff]  ;;  %v8977_v41 = vcombine.low %v698_v59, %v702_v30  ;;  %v8986_v43 = vcombine.high %v706_v36, %v710_v38  ;;  %v9026_v59 = vcombine.high %v746_v21, %v750_v23  ;;  %v754_v30 = vld [vmem:[#allocation5 + $0x1550] sm:$0xff] }
 0x36e   :  { %v8988_v45 = vcombine.high %v707_v33, %v711_v40  ;;  %v8987_v56 = vcombine.low %v707_v33, %v711_v40  ;;  %v766_v33 = vld [vmem:[#allocation5 + $0x15b0] sm:$0xff]  ;;  %v763_v40 = vld [vmem:[#allocation5 + $0x1598] sm:$0xff] }
 0x370   :  { %7169 = vmatpush1.bf16.msra.mxu0 %v8929_v47  ;;  %7497 = vmatpush1.bf16.msra.mxu1 %v8931_v48  ;;  %v718_v47 = vld [vmem:[#allocation5 + $0x1430] sm:$0xff]  ;;  %v715_v48 = vld [vmem:[#allocation5 + $0x1418] sm:$0xff] }
 0x371   :  { %7170 = vmatprep.subr.bf16.mxu0 %v8938_v52  ;;  %7498 = vmatprep.subr.bf16.mxu1 %v8940_v54  ;;  %v719_v52 = vld [vmem:[#allocation5 + $0x1438] sm:$0xff]  ;;  %v8985_v54 = vcombine.low %v706_v36, %v710_v38  ;;  %v8994_v60 = vcombine.high %v714_v46, %v718_v47  ;;  %v762_v38 = vld [vmem:[#allocation5 + $0x1590] sm:$0xff] }
 0x372   :  { %v8996_v11 = vcombine.high %v715_v48, %v719_v52  ;;  %v8995_v9 = vcombine.low %v715_v48, %v719_v52  ;;  %v774_v48 = vld [vmem:[#allocation5 + $0x15f0] sm:$0xff]  ;;  %v771_v52 = vld [vmem:[#allocation5 + $0x15d8] sm:$0xff] }
 0x374   :  { %7171 = vmatpush1.bf16.msra.mxu0 %v8937_v28  ;;  %7499 = vmatpush1.bf16.msra.mxu1 %v8939_v53  ;;  %v726_v28 = vld [vmem:[#allocation5 + $0x1470] sm:$0xff]  ;;  %v723_v53 = vld [vmem:[#allocation5 + $0x1458] sm:$0xff] }
 0x375   :  { %7172 = vmatprep.subr.bf16.mxu0 %v8946_v2  ;;  %7500 = vmatprep.subr.bf16.mxu1 %v8948_v3  ;;  %v727_v2 = vld [vmem:[#allocation5 + $0x1478] sm:$0xff]  ;;  %v8993_v3 = vcombine.low %v714_v46, %v718_v47  ;;  %v9002_v4 = vcombine.high %v722_v37, %v726_v28  ;;  %v770_v47 = vld [vmem:[#allocation5 + $0x15d0] sm:$0xff] }
 0x376   :  { %v9004_v5 = vcombine.high %v723_v53, %v727_v2  ;;  %v9003_v8 = vcombine.low %v723_v53, %v727_v2  ;;  %v782_v53 = vld [vmem:[#allocation5 + $0x1630] sm:$0xff]  ;;  %v779_v2 = vld [vmem:[#allocation5 + $0x1618] sm:$0xff] }
 0x378   :  { %7173 = vmatpush1.bf16.msra.mxu0 %v8945_v20  ;;  %7501 = vmatpush1.bf16.msra.mxu1 %v8947_v44  ;;  %v734_v20 = vld [vmem:[#allocation5 + $0x14b0] sm:$0xff]  ;;  %v731_v44 = vld [vmem:[#allocation5 + $0x1498] sm:$0xff] }
 0x379   :  { %7174 = vmatprep.subr.bf16.mxu0 %v8954_v6  ;;  %7502 = vmatprep.subr.bf16.mxu1 %v8956_v7  ;;  %v735_v6 = vld [vmem:[#allocation5 + $0x14b8] sm:$0xff]  ;;  %v9001_v7 = vcombine.low %v722_v37, %v726_v28  ;;  %v9010_v10 = vcombine.high %v730_v55, %v734_v20  ;;  %v778_v28 = vld [vmem:[#allocation5 + $0x1610] sm:$0xff] }
 0x37a   :  { %v9012_v12 = vcombine.high %v731_v44, %v735_v6 }
 0x37c   :  { %7175 = vmatpush1.bf16.msra.mxu0 %v8953_v15  ;;  %7503 = vmatpush1.bf16.msra.mxu1 %v8955_v16  ;;  %v742_v15 = vld [vmem:[#allocation5 + $0x14f0] sm:$0xff]  ;;  %v739_v16 = vld [vmem:[#allocation5 + $0x14d8] sm:$0xff] }
 0x37d   :  { %7176 = vmatprep.subr.bf16.mxu0 %v8962_v17  ;;  %7504 = vmatprep.subr.bf16.mxu1 %v8964_v18  ;;  %v743_v17 = vld [vmem:[#allocation5 + $0x14f8] sm:$0xff]  ;;  %v9009_v18 = vcombine.low %v730_v55, %v734_v20  ;;  %v9018_v19 = vcombine.high %v738_v14, %v742_v15  ;;  %v786_v20 = vld [vmem:[#allocation5 + $0x1650] sm:$0xff] }
 0x37e   :  { %v9020_v51 = vcombine.high %v739_v16, %v743_v17 }
 0x380   :  { %7177 = vmatpush1.bf16.msra.mxu0 %v8961_v25  ;;  %7505 = vmatpush1.bf16.msra.mxu1 %v8963_v26  ;;  %v747_v25 = vld [vmem:[#allocation5 + $0x1518] sm:$0xff] }
 0x381   :  { %7178 = vmatprep.subr.bf16.mxu0 %v8970_v27  ;;  %7506 = vmatprep.subr.bf16.mxu1 %v8972_v22  ;;  %v751_v26 = vld [vmem:[#allocation5 + $0x1538] sm:$0xff]  ;;  %v9017_v27 = vcombine.low %v738_v14, %v742_v15  ;;  %v9019_v22 = vcombine.low %v739_v16, %v743_v17  ;;  %v794_v15 = vld [vmem:[#allocation5 + $0x1690] sm:$0xff] }
 0x382   :  { %v798_v16 = vld [vmem:[#allocation5 + $0x16b0] sm:$0xff]  ;;  %v795_v17 = vld [vmem:[#allocation5 + $0x1698] sm:$0xff] }
 0x384   :  { %7179 = vmatpush1.bf16.msra.mxu0 %v8969_v32  ;;  %7507 = vmatpush1.bf16.msra.mxu1 %v8971_v63  ;;  %v759_v32 = vld [vmem:[#allocation5 + $0x1578] sm:$0xff]  ;;  %v9025_v63 = vcombine.low %v746_v21, %v750_v23  ;;  %v802_v23 = vld [vmem:[#allocation5 + $0x16d0] sm:$0xff] }
 0x385   :  { %7180 = vmatprep.subr.bf16.mxu0 %v8978_v34  ;;  %7508 = vmatprep.subr.bf16.mxu1 %v8980_v35  ;;  %v9027_v34 = vcombine.low %v747_v25, %v751_v26  ;;  %v9034_v35 = vcombine.high %v754_v30, %v758_v31  ;;  %v9036_v36 = vcombine.high %v755_v62, %v759_v32 }
 0x388   :  { %7181 = vmatpush1.bf16.msra.mxu0 %v8977_v41  ;;  %7509 = vmatpush1.bf16.msra.mxu1 %v8979_v42  ;;  %v767_v41 = vld [vmem:[#allocation5 + $0x15b8] sm:$0xff]  ;;  %v9033_v42 = vcombine.low %v754_v30, %v758_v31  ;;  %v810_v31 = vld [vmem:[#allocation5 + $0x1710] sm:$0xff] }
 0x389   :  { %7182 = vmatprep.subr.bf16.mxu0 %v8986_v43  ;;  %7510 = vmatprep.subr.bf16.mxu1 %v8988_v45  ;;  %v9035_v43 = vcombine.low %v755_v62, %v759_v32  ;;  %v9042_v45 = vcombine.high %v762_v38, %v766_v33  ;;  %v9044_v46 = vcombine.high %v763_v40, %v767_v41  ;;  %v814_v62 = vld [vmem:[#allocation5 + $0x1730] sm:$0xff]  ;;  %v811_v32 = vld [vmem:[#allocation5 + $0x1718] sm:$0xff] }
 0x38c   :  { %7183 = vmatpush1.bf16.msra.mxu0 %v8985_v54  ;;  %7511 = vmatpush1.bf16.msra.mxu1 %v8987_v56  ;;  %v775_v54 = vld [vmem:[#allocation5 + $0x15f8] sm:$0xff]  ;;  %v9041_v56 = vcombine.low %v762_v38, %v766_v33  ;;  %v818_v33 = vld [vmem:[#allocation5 + $0x1750] sm:$0xff] }
 0x38d   :  { %7193 = vmatprep.subr.bf16.mxu0 %v8994_v60  ;;  %7521 = vmatprep.subr.bf16.mxu1 %v8996_v11  ;;  %v9043_v60 = vcombine.low %v763_v40, %v767_v41  ;;  %v9050_v11 = vcombine.high %v770_v47, %v774_v48  ;;  %v9052_v37 = vcombine.high %v771_v52, %v775_v54  ;;  %v822_v40 = vld [vmem:[#allocation5 + $0x1770] sm:$0xff]  ;;  %v819_v41 = vld [vmem:[#allocation5 + $0x1758] sm:$0xff] }
 0x38f   :  { %7185 = vmatmul.mubr.bf16.vlgmr.msra.gmra.mrb[4].mxu0 %v9993_v39  ;;  %7513 = vmatmul.mubr.bf16.vlgmr.msra.gmra.mrb[4].mxu1 %v9993_v39  ;;  %v9011_v39 = vcombine.low %v731_v44, %v735_v6  ;;  %v790_v44 = vld [vmem:[#allocation5 + $0x1670] sm:$0xff]  ;;  %v787_v6 = vld [vmem:[#allocation5 + $0x1658] sm:$0xff] }
 0x390   :  { %7194 = vmatpush1.bf16.msra.mxu0 %v8993_v3  ;;  %7522 = vmatpush1.bf16.msra.mxu1 %v8995_v9  ;;  %v783_v3 = vld [vmem:[#allocation5 + $0x1638] sm:$0xff]  ;;  %v9049_v9 = vcombine.low %v770_v47, %v774_v48  ;;  %v826_v48 = vld [vmem:[#allocation5 + $0x1790] sm:$0xff] }
 0x391   :  { %7195 = vmatprep.subr.bf16.mxu0 %v9002_v4  ;;  %7523 = vmatprep.subr.bf16.mxu1 %v9004_v5  ;;  %v9051_v4 = vcombine.low %v771_v52, %v775_v54  ;;  %v9058_v5 = vcombine.high %v778_v28, %v782_v53  ;;  %v9060_v55 = vcombine.high %v779_v2, %v783_v3  ;;  %v830_v52 = vld [vmem:[#allocation5 + $0x17b0] sm:$0xff]  ;;  %v827_v54 = vld [vmem:[#allocation5 + $0x1798] sm:$0xff] }
 0x392   :  { %7225 = vmatprep.mubr.bf16.mxu0 %v9997_v49  ;;  %7553 = vmatprep.mubr.bf16.mxu1 %v9997_v49  ;;  %v9028_v49 = vcombine.high %v747_v25, %v751_v26  ;;  %v806_v25 = vld [vmem:[#allocation5 + $0x16f0] sm:$0xff]  ;;  %v803_v26 = vld [vmem:[#allocation5 + $0x16d8] sm:$0xff] }
 0x394   :  { %7196 = vmatpush1.bf16.msra.mxu0 %v9001_v7  ;;  %7524 = vmatpush1.bf16.msra.mxu1 %v9003_v8  ;;  %v791_v7 = vld [vmem:[#allocation5 + $0x1678] sm:$0xff]  ;;  %v9057_v8 = vcombine.low %v778_v28, %v782_v53  ;;  %v834_v53 = vld [vmem:[#allocation5 + $0x17d0] sm:$0xff] }
 0x395   :  { %7197 = vmatprep.subr.bf16.mxu0 %v9010_v10  ;;  %7525 = vmatprep.subr.bf16.mxu1 %v9012_v12  ;;  %v9059_v10 = vcombine.low %v779_v2, %v783_v3  ;;  %v9066_v12 = vcombine.high %v786_v20, %v790_v44  ;;  %v9068_v14 = vcombine.high %v787_v6, %v791_v7  ;;  %v838_v2 = vld [vmem:[#allocation5 + $0x17f0] sm:$0xff]  ;;  %v835_v3 = vld [vmem:[#allocation5 + $0x17d8] sm:$0xff] }
 0x398   :  { %7198 = vmatpush1.bf16.msra.mxu0 %v9009_v18  ;;  %7526 = vmatpush1.bf16.msra.mxu1 %v9011_v39  ;;  %v799_v18 = vld [vmem:[#allocation5 + $0x16b8] sm:$0xff]  ;;  %v9065_v39 = vcombine.low %v786_v20, %v790_v44  ;;  %v842_v44 = vld [vmem:[#allocation5 + $0x1810] sm:$0xff] }
 0x399   :  { %7199 = vmatprep.subr.bf16.mxu0 %v9018_v19  ;;  %7527 = vmatprep.subr.bf16.mxu1 %v9020_v51  ;;  %v9067_v19 = vcombine.low %v787_v6, %v791_v7  ;;  %v9074_v51 = vcombine.high %v794_v15, %v798_v16  ;;  %v9076_v21 = vcombine.high %v795_v17, %v799_v18  ;;  %v846_v6 = vld [vmem:[#allocation5 + $0x1830] sm:$0xff]  ;;  %v843_v7 = vld [vmem:[#allocation5 + $0x1818] sm:$0xff] }
 0x39c   :  { %7200 = vmatpush1.bf16.msra.mxu0 %v9017_v27  ;;  %7528 = vmatpush1.bf16.msra.mxu1 %v9019_v22  ;;  %v807_v27 = vld [vmem:[#allocation5 + $0x16f8] sm:$0xff]  ;;  %v9073_v22 = vcombine.low %v794_v15, %v798_v16  ;;  %v850_v16 = vld [vmem:[#allocation5 + $0x1850] sm:$0xff] }
 0x39d   :  { %7201 = vmatprep.subr.bf16.mxu0 %v9026_v59  ;;  %7529 = vmatprep.subr.bf16.mxu1 %v9028_v49  ;;  %v9075_v59 = vcombine.low %v795_v17, %v799_v18  ;;  %v9082_v49 = vcombine.high %v802_v23, %v806_v25  ;;  %v9084_v30 = vcombine.high %v803_v26, %v807_v27  ;;  %v854_v17 = vld [vmem:[#allocation5 + $0x1870] sm:$0xff]  ;;  %v851_v18 = vld [vmem:[#allocation5 + $0x1858] sm:$0xff] }
 0x3a0   :  { %7202 = vmatpush1.bf16.msra.mxu0 %v9025_v63  ;;  %7530 = vmatpush1.bf16.msra.mxu1 %v9027_v34  ;;  %v815_v63 = vld [vmem:[#allocation5 + $0x1738] sm:$0xff]  ;;  %v9081_v34 = vcombine.low %v802_v23, %v806_v25  ;;  %v858_v25 = vld [vmem:[#allocation5 + $0x1890] sm:$0xff] }
 0x3a1   :  { %7203 = vmatprep.subr.bf16.mxu0 %v9034_v35  ;;  %7531 = vmatprep.subr.bf16.mxu1 %v9036_v36  ;;  %v9083_v35 = vcombine.low %v803_v26, %v807_v27  ;;  %v9090_v36 = vcombine.high %v810_v31, %v814_v62  ;;  %v9092_v38 = vcombine.high %v811_v32, %v815_v63  ;;  %v862_v26 = vld [vmem:[#allocation5 + $0x18b0] sm:$0xff]  ;;  %v859_v27 = vld [vmem:[#allocation5 + $0x1898] sm:$0xff] }
 0x3a4   :  { %7204 = vmatpush1.bf16.msra.mxu0 %v9033_v42  ;;  %7532 = vmatpush1.bf16.msra.mxu1 %v9035_v43  ;;  %v823_v42 = vld [vmem:[#allocation5 + $0x1778] sm:$0xff]  ;;  %v9089_v43 = vcombine.low %v810_v31, %v814_v62  ;;  %v866_v62 = vld [vmem:[#allocation5 + $0x18d0] sm:$0xff] }
 0x3a5   :  { %7205 = vmatprep.subr.bf16.mxu0 %v9042_v45  ;;  %7533 = vmatprep.subr.bf16.mxu1 %v9044_v46  ;;  %v9091_v45 = vcombine.low %v811_v32, %v815_v63  ;;  %v9098_v46 = vcombine.high %v818_v33, %v822_v40  ;;  %v9100_v47 = vcombine.high %v819_v41, %v823_v42  ;;  %v870_v32 = vld [vmem:[#allocation5 + $0x18f0] sm:$0xff]  ;;  %v867_v63 = vld [vmem:[#allocation5 + $0x18d8] sm:$0xff] }
 0x3a8   :  { %7206 = vmatpush1.bf16.msra.mxu0 %v9041_v56  ;;  %7534 = vmatpush1.bf16.msra.mxu1 %v9043_v60  ;;  %v831_v56 = vld [vmem:[#allocation5 + $0x17b8] sm:$0xff]  ;;  %v9097_v60 = vcombine.low %v818_v33, %v822_v40  ;;  %v874_v33 = vld [vmem:[#allocation5 + $0x1910] sm:$0xff] }
 0x3a9   :  { %7207 = vmatprep.subr.bf16.mxu0 %v9050_v11  ;;  %7535 = vmatprep.subr.bf16.mxu1 %v9052_v37  ;;  %v9099_v11 = vcombine.low %v819_v41, %v823_v42  ;;  %v9106_v37 = vcombine.high %v826_v48, %v830_v52  ;;  %v9108_v28 = vcombine.high %v827_v54, %v831_v56  ;;  %v878_v40 = vld [vmem:[#allocation5 + $0x1930] sm:$0xff]  ;;  %v875_v41 = vld [vmem:[#allocation5 + $0x1918] sm:$0xff] }
 0x3aa   :  { %v879_v42 = vld [vmem:[#allocation5 + $0x1938] sm:$0xff] }
 0x3ac   :  { %7208 = vmatpush1.bf16.msra.mxu0 %v9049_v9  ;;  %7536 = vmatpush1.bf16.msra.mxu1 %v9051_v4  ;;  %v839_v9 = vld [vmem:[#allocation5 + $0x17f8] sm:$0xff]  ;;  %v9105_v4 = vcombine.low %v826_v48, %v830_v52  ;;  %v886_v48 = vld [vmem:[#allocation5 + $0x1970] sm:$0xff] }
 0x3ad   :  { %7209 = vmatprep.subr.bf16.mxu0 %v9058_v5  ;;  %7537 = vmatprep.subr.bf16.mxu1 %v9060_v55  ;;  %v9107_v5 = vcombine.low %v827_v54, %v831_v56  ;;  %v9114_v55 = vcombine.high %v834_v53, %v838_v2  ;;  %v9116_v20 = vcombine.high %v835_v3, %v839_v9  ;;  %v883_v52 = vld [vmem:[#allocation5 + $0x1958] sm:$0xff] }
 0x3ae   :  { %v887_v54 = vld [vmem:[#allocation5 + $0x1978] sm:$0xff]  ;;  %v9153_v56 = vcombine.low %v874_v33, %v878_v40 }
 0x3b0   :  { %7210 = vmatpush1.bf16.msra.mxu0 %v9057_v8  ;;  %7538 = vmatpush1.bf16.msra.mxu1 %v9059_v10  ;;  %v847_v8 = vld [vmem:[#allocation5 + $0x1838] sm:$0xff]  ;;  %v9113_v10 = vcombine.low %v834_v53, %v838_v2  ;;  %v894_v53 = vld [vmem:[#allocation5 + $0x19b0] sm:$0xff] }
 0x3b1   :  { %7211 = vmatprep.subr.bf16.mxu0 %v9066_v12  ;;  %7539 = vmatprep.subr.bf16.mxu1 %v9068_v14  ;;  %v9115_v12 = vcombine.low %v835_v3, %v839_v9  ;;  %v9122_v14 = vcombine.high %v842_v44, %v846_v6  ;;  %v9124_v15 = vcombine.high %v843_v7, %v847_v8  ;;  %v891_v2 = vld [vmem:[#allocation5 + $0x1998] sm:$0xff] }
 0x3b2   :  { %v895_v3 = vld [vmem:[#allocation5 + $0x19b8] sm:$0xff] }
 0x3b4   :  { %7212 = vmatpush1.bf16.msra.mxu0 %v9065_v39  ;;  %7540 = vmatpush1.bf16.msra.mxu1 %v9067_v19  ;;  %v855_v39 = vld [vmem:[#allocation5 + $0x1878] sm:$0xff]  ;;  %v9121_v19 = vcombine.low %v842_v44, %v846_v6  ;;  %v902_v44 = vld [vmem:[#allocation5 + $0x19f0] sm:$0xff] }
 0x3b5   :  { %7213 = vmatprep.subr.bf16.mxu0 %v9074_v51  ;;  %7541 = vmatprep.subr.bf16.mxu1 %v9076_v21  ;;  %v9123_v51 = vcombine.low %v843_v7, %v847_v8  ;;  %v9130_v21 = vcombine.high %v850_v16, %v854_v17  ;;  %v9132_v23 = vcombine.high %v851_v18, %v855_v39  ;;  %v899_v6 = vld [vmem:[#allocation5 + $0x19d8] sm:$0xff] }
 0x3b6   :  { %v903_v7 = vld [vmem:[#allocation5 + $0x19f8] sm:$0xff] }
 0x3b8   :  { %7214 = vmatpush1.bf16.msra.mxu0 %v9073_v22  ;;  %7542 = vmatpush1.bf16.msra.mxu1 %v9075_v59  ;;  %v863_v22 = vld [vmem:[#allocation5 + $0x18b8] sm:$0xff]  ;;  %v9129_v59 = vcombine.low %v850_v16, %v854_v17  ;;  %v910_v16 = vld [vmem:[#allocation5 + $0x1a30] sm:$0xff] }
 0x3b9   :  { %7215 = vmatprep.subr.bf16.mxu0 %v9082_v49  ;;  %7543 = vmatprep.subr.bf16.mxu1 %v9084_v30  ;;  %v9131_v49 = vcombine.low %v851_v18, %v855_v39  ;;  %v9138_v30 = vcombine.high %v858_v25, %v862_v26  ;;  %v9140_v31 = vcombine.high %v859_v27, %v863_v22  ;;  %v907_v17 = vld [vmem:[#allocation5 + $0x1a18] sm:$0xff] }
 0x3ba   :  { %v911_v18 = vld [vmem:[#allocation5 + $0x1a38] sm:$0xff] }
 0x3bc   :  { %7216 = vmatpush1.bf16.msra.mxu0 %v9081_v34  ;;  %7544 = vmatpush1.bf16.msra.mxu1 %v9083_v35  ;;  %v871_v34 = vld [vmem:[#allocation5 + $0x18f8] sm:$0xff]  ;;  %v9137_v35 = vcombine.low %v858_v25, %v862_v26  ;;  %v918_v25 = vld [vmem:[#allocation5 + $0x1a70] sm:$0xff] }
 0x3bd   :  { %7217 = vmatprep.subr.bf16.mxu0 %v9090_v36  ;;  %7545 = vmatprep.subr.bf16.mxu1 %v9092_v38  ;;  %v9146_v36 = vcombine.high %v866_v62, %v870_v32  ;;  %v9148_v38 = vcombine.high %v867_v63, %v871_v34  ;;  %v915_v26 = vld [vmem:[#allocation5 + $0x1a58] sm:$0xff] }
 0x3c0   :  { %7218 = vmatpush1.bf16.msra.mxu0 %v9089_v43  ;;  %7546 = vmatpush1.bf16.msra.mxu1 %v9091_v45  ;;  %v9145_v43 = vcombine.low %v866_v62, %v870_v32  ;;  %v9147_v45 = vcombine.low %v867_v63, %v871_v34  ;;  %v926_v62 = vld [vmem:[#allocation5 + $0x1ab0] sm:$0xff]  ;;  %v923_v32 = vld [vmem:[#allocation5 + $0x1a98] sm:$0xff] }
 0x3c1   :  { %7219 = vmatprep.subr.bf16.mxu0 %v9098_v46  ;;  %7547 = vmatprep.subr.bf16.mxu1 %v9100_v47  ;;  %v9154_v46 = vcombine.high %v874_v33, %v878_v40  ;;  %v882_v47 = vld [vmem:[#allocation5 + $0x1950] sm:$0xff]  ;;  %v927_v63 = vld [vmem:[#allocation5 + $0x1ab8] sm:$0xff] }
 0x3c2   :  { %v9161_v9 = vcombine.low %v882_v47, %v886_v48  ;;  %v934_v33 = vld [vmem:[#allocation5 + $0x1af0] sm:$0xff]  ;;  %v931_v40 = vld [vmem:[#allocation5 + $0x1ad8] sm:$0xff] }
 0x3c4   :  { %7220 = vmatpush1.bf16.msra.mxu0 %v9097_v60  ;;  %7548 = vmatpush1.bf16.msra.mxu1 %v9099_v11  ;;  %v9155_v60 = vcombine.low %v875_v41, %v879_v42  ;;  %v9162_v11 = vcombine.high %v882_v47, %v886_v48  ;;  %v942_v47 = vld [vmem:[#allocation5 + $0x1b30] sm:$0xff]  ;;  %v939_v48 = vld [vmem:[#allocation5 + $0x1b18] sm:$0xff] }
 0x3c5   :  { %7221 = vmatprep.subr.bf16.mxu0 %v9106_v37  ;;  %7549 = vmatprep.subr.bf16.mxu1 %v9108_v28  ;;  %v9164_v37 = vcombine.high %v883_v52, %v887_v54  ;;  %v890_v28 = vld [vmem:[#allocation5 + $0x1990] sm:$0xff] }
 0x3c6   :  { %v9169_v8 = vcombine.low %v890_v28, %v894_v53 }
 0x3c8   :  { %7222 = vmatpush1.bf16.msra.mxu0 %v9105_v4  ;;  %7550 = vmatpush1.bf16.msra.mxu1 %v9107_v5  ;;  %v9163_v4 = vcombine.low %v883_v52, %v887_v54  ;;  %v9170_v5 = vcombine.high %v890_v28, %v894_v53  ;;  %v943_v52 = vld [vmem:[#allocation5 + $0x1b38] sm:$0xff]  ;;  %v950_v28 = vld [vmem:[#allocation5 + $0x1b70] sm:$0xff] }
 0x3c9   :  { %7223 = vmatprep.subr.bf16.mxu0 %v9114_v55  ;;  %7551 = vmatprep.subr.bf16.mxu1 %v9116_v20  ;;  %v9172_v55 = vcombine.high %v891_v2, %v895_v3  ;;  %v898_v20 = vld [vmem:[#allocation5 + $0x19d0] sm:$0xff]  ;;  %v947_v53 = vld [vmem:[#allocation5 + $0x1b58] sm:$0xff] }
 0x3ca   :  { %v9177_v39 = vcombine.low %v898_v20, %v902_v44 }
 0x3cc   :  { %7224 = vmatpush1.bf16.msra.mxu0 %v9113_v10  ;;  %7552 = vmatpush1.bf16.msra.mxu1 %v9115_v12  ;;  %v9171_v10 = vcombine.low %v891_v2, %v895_v3  ;;  %v9178_v12 = vcombine.high %v898_v20, %v902_v44  ;;  %v951_v2 = vld [vmem:[#allocation5 + $0x1b78] sm:$0xff]  ;;  %v958_v20 = vld [vmem:[#allocation5 + $0x1bb0] sm:$0xff] }
 0x3cd   :  { %7234 = vmatprep.subr.bf16.mxu0 %v9122_v14  ;;  %7562 = vmatprep.subr.bf16.mxu1 %v9124_v15  ;;  %v9180_v14 = vcombine.high %v899_v6, %v903_v7  ;;  %v906_v15 = vld [vmem:[#allocation5 + $0x1a10] sm:$0xff]  ;;  %v955_v44 = vld [vmem:[#allocation5 + $0x1b98] sm:$0xff] }
 0x3cf   :  { %7226 = vmatmul.mubr.bf16.vlgmr.msra.gmra.mrb[4].mxu0 %v10012_v13  ;;  %7554 = vmatmul.mubr.bf16.vlgmr.msra.gmra.mrb[4].mxu1 %v10012_v13  ;;  %v9139_v13 = vcombine.low %v859_v27, %v863_v22  ;;  %v919_v27 = vld [vmem:[#allocation5 + $0x1a78] sm:$0xff]  ;;  %v9185_v22 = vcombine.low %v906_v15, %v910_v16 }
 0x3d0   :  { %7235 = vmatpush1.bf16.msra.mxu0 %v9121_v19  ;;  %7563 = vmatpush1.bf16.msra.mxu1 %v9123_v51  ;;  %v9179_v19 = vcombine.low %v899_v6, %v903_v7  ;;  %v9186_v51 = vcombine.high %v906_v15, %v910_v16  ;;  %v959_v6 = vld [vmem:[#allocation5 + $0x1bb8] sm:$0xff]  ;;  %v966_v15 = vld [vmem:[#allocation5 + $0x1bf0] sm:$0xff] }
 0x3d1   :  { %7236 = vmatprep.subr.bf16.mxu0 %v9130_v21  ;;  %7564 = vmatprep.subr.bf16.mxu1 %v9132_v23  ;;  %v9188_v21 = vcombine.high %v907_v17, %v911_v18  ;;  %v914_v23 = vld [vmem:[#allocation5 + $0x1a50] sm:$0xff]  ;;  %v963_v16 = vld [vmem:[#allocation5 + $0x1bd8] sm:$0xff] }
 0x3d2   :  { %7266 = vmatprep.mubr.bf16.mxu0 %v10015_v24  ;;  %7594 = vmatprep.mubr.bf16.mxu1 %v10015_v24  ;;  %v9156_v24 = vcombine.high %v875_v41, %v879_v42  ;;  %v9193_v34 = vcombine.low %v914_v23, %v918_v25  ;;  %v935_v41 = vld [vmem:[#allocation5 + $0x1af8] sm:$0xff] }
 0x3d4   :  { %7237 = vmatpush1.bf16.msra.mxu0 %v9129_v59  ;;  %7565 = vmatpush1.bf16.msra.mxu1 %v9131_v49  ;;  %v9187_v59 = vcombine.low %v907_v17, %v911_v18  ;;  %v9194_v49 = vcombine.high %v914_v23, %v918_v25  ;;  %v967_v17 = vld [vmem:[#allocation5 + $0x1bf8] sm:$0xff]  ;;  %v974_v23 = vld [vmem:[#allocation5 + $0x1c30] sm:$0xff] }
 0x3d5   :  { %7238 = vmatprep.subr.bf16.mxu0 %v9138_v30  ;;  %7566 = vmatprep.subr.bf16.mxu1 %v9140_v31  ;;  %v9196_v30 = vcombine.high %v915_v26, %v919_v27  ;;  %v922_v31 = vld [vmem:[#allocation5 + $0x1a90] sm:$0xff]  ;;  %v971_v25 = vld [vmem:[#allocation5 + $0x1c18] sm:$0xff] }
 0x3d6   :  { %v9201_v42 = vcombine.low %v922_v31, %v926_v62 }
 0x3d8   :  { %7239 = vmatpush1.bf16.msra.mxu0 %v9137_v35  ;;  %7567 = vmatpush1.bf16.msra.mxu1 %v9139_v13  ;;  %v9195_v35 = vcombine.low %v915_v26, %v919_v27  ;;  %v9202_v13 = vcombine.high %v922_v31, %v926_v62  ;;  %v975_v26 = vld [vmem:[#allocation5 + $0x1c38] sm:$0xff]  ;;  %v982_v31 = vld [vmem:[#allocation5 + $0x1c70] sm:$0xff] }
 0x3d9   :  { %7240 = vmatprep.subr.bf16.mxu0 %v9146_v36  ;;  %7568 = vmatprep.subr.bf16.mxu1 %v9148_v38  ;;  %v9204_v36 = vcombine.high %v923_v32, %v927_v63  ;;  %v930_v38 = vld [vmem:[#allocation5 + $0x1ad0] sm:$0xff]  ;;  %v979_v62 = vld [vmem:[#allocation5 + $0x1c58] sm:$0xff] }
 0x3da   :  { %v9209_v54 = vcombine.low %v930_v38, %v934_v33 }
 0x3dc   :  { %7241 = vmatpush1.bf16.msra.mxu0 %v9145_v43  ;;  %7569 = vmatpush1.bf16.msra.mxu1 %v9147_v45  ;;  %v9203_v43 = vcombine.low %v923_v32, %v927_v63  ;;  %v9210_v45 = vcombine.high %v930_v38, %v934_v33  ;;  %v983_v32 = vld [vmem:[#allocation5 + $0x1c78] sm:$0xff]  ;;  %v990_v38 = vld [vmem:[#allocation5 + $0x1cb0] sm:$0xff] }
 0x3dd   :  { %7242 = vmatprep.subr.bf16.mxu0 %v9154_v46  ;;  %7570 = vmatprep.subr.bf16.mxu1 %v9156_v24  ;;  %v9212_v46 = vcombine.high %v931_v40, %v935_v41  ;;  %v938_v24 = vld [vmem:[#allocation5 + $0x1b10] sm:$0xff]  ;;  %v987_v33 = vld [vmem:[#allocation5 + $0x1c98] sm:$0xff] }
 0x3de   :  { %v9217_v3 = vcombine.low %v938_v24, %v942_v47 }
 0x3e0   :  { %7243 = vmatpush1.bf16.msra.mxu0 %v9153_v56  ;;  %7571 = vmatpush1.bf16.msra.mxu1 %v9155_v60  ;;  %v9211_v56 = vcombine.low %v931_v40, %v935_v41  ;;  %v9218_v60 = vcombine.high %v938_v24, %v942_v47  ;;  %v991_v40 = vld [vmem:[#allocation5 + $0x1cb8] sm:$0xff]  ;;  %v998_v24 = vld [vmem:[#allocation5 + $0x1cf0] sm:$0xff] }
 0x3e1   :  { %7244 = vmatprep.subr.bf16.mxu0 %v9162_v11  ;;  %7572 = vmatprep.subr.bf16.mxu1 %v9164_v37  ;;  %v9220_v11 = vcombine.high %v939_v48, %v943_v52  ;;  %v946_v37 = vld [vmem:[#allocation5 + $0x1b50] sm:$0xff]  ;;  %v995_v47 = vld [vmem:[#allocation5 + $0x1cd8] sm:$0xff] }
 0x3e2   :  { %v9225_v7 = vcombine.low %v946_v37, %v950_v28 }
 0x3e4   :  { %7245 = vmatpush1.bf16.msra.mxu0 %v9161_v9  ;;  %7573 = vmatpush1.bf16.msra.mxu1 %v9163_v4  ;;  %v9219_v9 = vcombine.low %v939_v48, %v943_v52  ;;  %v9226_v4 = vcombine.high %v946_v37, %v950_v28  ;;  %v999_v48 = vld [vmem:[#allocation5 + $0x1cf8] sm:$0xff] }
 0x3e5   :  { %7246 = vmatprep.subr.bf16.mxu0 %v9170_v5  ;;  %7574 = vmatprep.subr.bf16.mxu1 %v9172_v55  ;;  %v9228_v5 = vcombine.high %v947_v53, %v951_v2  ;;  %v954_v55 = vld [vmem:[#allocation5 + $0x1b90] sm:$0xff]  ;;  %v1003_v37 = vld [vmem:[#allocation5 + $0x1d18] sm:$0xff] }
 0x3e6   :  { %v9233_v18 = vcombine.low %v954_v55, %v958_v20  ;;  %v1007_v28 = vld [vmem:[#allocation5 + $0x1d38] sm:$0xff] }
 0x3e8   :  { %7247 = vmatpush1.bf16.msra.mxu0 %v9169_v8  ;;  %7575 = vmatpush1.bf16.msra.mxu1 %v9171_v10  ;;  %v9227_v8 = vcombine.low %v947_v53, %v951_v2  ;;  %v9234_v10 = vcombine.high %v954_v55, %v958_v20  ;;  %v9275_v2 = vcombine.low %v995_v47, %v999_v48  ;;  %v1015_v55 = vld [vmem:[#allocation5 + $0x1d78] sm:$0xff] }
 0x3e9   :  { %7248 = vmatprep.subr.bf16.mxu0 %v9178_v12  ;;  %7576 = vmatprep.subr.bf16.mxu1 %v9180_v14  ;;  %v9236_v12 = vcombine.high %v955_v44, %v959_v6  ;;  %v962_v14 = vld [vmem:[#allocation5 + $0x1bd0] sm:$0xff] }
 0x3ea   :  { %v9241_v27 = vcombine.low %v962_v14, %v966_v15 }
 0x3ec   :  { %7249 = vmatpush1.bf16.msra.mxu0 %v9177_v39  ;;  %7577 = vmatpush1.bf16.msra.mxu1 %v9179_v19  ;;  %v9235_v39 = vcombine.low %v955_v44, %v959_v6  ;;  %v9242_v19 = vcombine.high %v962_v14, %v966_v15  ;;  %v9283_v44 = vcombine.low %v1003_v37, %v1007_v28  ;;  %v1023_v14 = vld [vmem:[#allocation5 + $0x1db8] sm:$0xff] }
 0x3ed   :  { %7250 = vmatprep.subr.bf16.mxu0 %v9186_v51  ;;  %7578 = vmatprep.subr.bf16.mxu1 %v9188_v21  ;;  %v9244_v51 = vcombine.high %v963_v16, %v967_v17  ;;  %v970_v21 = vld [vmem:[#allocation5 + $0x1c10] sm:$0xff] }
 0x3ee   :  { %v9249_v63 = vcombine.low %v970_v21, %v974_v23 }
 0x3f0   :  { %7251 = vmatpush1.bf16.msra.mxu0 %v9185_v22  ;;  %7579 = vmatpush1.bf16.msra.mxu1 %v9187_v59  ;;  %v9243_v22 = vcombine.low %v963_v16, %v967_v17  ;;  %v9250_v59 = vcombine.high %v970_v21, %v974_v23  ;;  %v1031_v21 = vld [vmem:[#allocation5 + $0x1df8] sm:$0xff] }
 0x3f1   :  { %7252 = vmatprep.subr.bf16.mxu0 %v9194_v49  ;;  %7580 = vmatprep.subr.bf16.mxu1 %v9196_v30  ;;  %v9252_v49 = vcombine.high %v971_v25, %v975_v26  ;;  %v978_v30 = vld [vmem:[#allocation5 + $0x1c50] sm:$0xff] }
 0x3f2   :  { %v9257_v41 = vcombine.low %v978_v30, %v982_v31 }
 0x3f4   :  { %7253 = vmatpush1.bf16.msra.mxu0 %v9193_v34  ;;  %7581 = vmatpush1.bf16.msra.mxu1 %v9195_v35  ;;  %v9251_v34 = vcombine.low %v971_v25, %v975_v26  ;;  %v9258_v35 = vcombine.high %v978_v30, %v982_v31  ;;  %v1039_v30 = vld [vmem:[#allocation5 + $0x1e38] sm:$0xff] }
 0x3f5   :  { %7254 = vmatprep.subr.bf16.mxu0 %v9202_v13  ;;  %7582 = vmatprep.subr.bf16.mxu1 %v9204_v36  ;;  %v9260_v13 = vcombine.high %v979_v62, %v983_v32  ;;  %v986_v36 = vld [vmem:[#allocation5 + $0x1c90] sm:$0xff] }
 0x3f6   :  { %v9265_v52 = vcombine.low %v986_v36, %v990_v38 }
 0x3f8   :  { %7255 = vmatpush1.bf16.msra.mxu0 %v9201_v42  ;;  %7583 = vmatpush1.bf16.msra.mxu1 %v9203_v43  ;;  %v9259_v42 = vcombine.low %v979_v62, %v983_v32  ;;  %v9266_v43 = vcombine.high %v986_v36, %v990_v38  ;;  %v1047_v36 = vld [vmem:[#allocation5 + $0x1e78] sm:$0xff] }
 0x3f9   :  { %7256 = vmatprep.subr.bf16.mxu0 %v9210_v45  ;;  %7584 = vmatprep.subr.bf16.mxu1 %v9212_v46  ;;  %v9268_v45 = vcombine.high %v987_v33, %v991_v40  ;;  %v994_v46 = vld [vmem:[#allocation5 + $0x1cd0] sm:$0xff] }
 0x3fa   :  { %v9273_v53 = vcombine.low %v994_v46, %v998_v24 }
 0x3fc   :  { %7257 = vmatpush1.bf16.msra.mxu0 %v9209_v54  ;;  %7585 = vmatpush1.bf16.msra.mxu1 %v9211_v56  ;;  %v9274_v54 = vcombine.high %v994_v46, %v998_v24  ;;  %v9276_v56 = vcombine.high %v995_v47, %v999_v48  ;;  %v1055_v46 = vld [vmem:[#allocation5 + $0x1eb8] sm:$0xff] }
 0x3fd   :  { %7258 = vmatprep.subr.bf16.mxu0 %v9218_v60  ;;  %7586 = vmatprep.subr.bf16.mxu1 %v9220_v11  ;;  %v1002_v60 = vld [vmem:[#allocation5 + $0x1d10] sm:$0xff] }
 0x3fe   :  { %v1006_v11 = vld [vmem:[#allocation5 + $0x1d30] sm:$0xff] }
 0x3ff   :  { %v9281_v20 = vcombine.low %v1002_v60, %v1006_v11 }
 0x400   :  { %7259 = vmatpush1.bf16.msra.mxu0 %v9217_v3  ;;  %7587 = vmatpush1.bf16.msra.mxu1 %v9219_v9  ;;  %v9282_v3 = vcombine.high %v1002_v60, %v1006_v11  ;;  %v1010_v9 = vld [vmem:[#allocation5 + $0x1d50] sm:$0xff]  ;;  %v1063_v60 = vld [vmem:[#allocation5 + $0x1ef8] sm:$0xff] }
 0x401   :  { %7260 = vmatprep.subr.bf16.mxu0 %v9226_v4  ;;  %7588 = vmatprep.subr.bf16.mxu1 %v9228_v5  ;;  %v1014_v4 = vld [vmem:[#allocation5 + $0x1d70] sm:$0xff]  ;;  %v1011_v5 = vld [vmem:[#allocation5 + $0x1d58] sm:$0xff] }
 0x402   :  { %v9290_v6 = vcombine.high %v1010_v9, %v1014_v4  ;;  %v9289_v15 = vcombine.low %v1010_v9, %v1014_v4  ;;  %v9291_v16 = vcombine.low %v1011_v5, %v1015_v55  ;;  %v1071_v9 = vld [vmem:[#allocation5 + $0x1f38] sm:$0xff] }
 0x404   :  { %7261 = vmatpush1.bf16.msra.mxu0 %v9225_v7  ;;  %7589 = vmatpush1.bf16.msra.mxu1 %v9227_v8  ;;  %v9292_v7 = vcombine.high %v1011_v5, %v1015_v55  ;;  %v1018_v8 = vld [vmem:[#allocation5 + $0x1d90] sm:$0xff] }
 0x405   :  { %7262 = vmatprep.subr.bf16.mxu0 %v9234_v10  ;;  %7590 = vmatprep.subr.bf16.mxu1 %v9236_v12  ;;  %v1022_v10 = vld [vmem:[#allocation5 + $0x1db0] sm:$0xff]  ;;  %v1019_v12 = vld [vmem:[#allocation5 + $0x1d98] sm:$0xff] }
 0x406   :  { %v9298_v17 = vcombine.high %v1018_v8, %v1022_v10  ;;  %v9297_v23 = vcombine.low %v1018_v8, %v1022_v10  ;;  %v9299_v25 = vcombine.low %v1019_v12, %v1023_v14  ;;  %v1079_v8 = vld [vmem:[#allocation5 + $0x1f78] sm:$0xff] }
 0x408   :  { %7263 = vmatpush1.bf16.msra.mxu0 %v9233_v18  ;;  %7591 = vmatpush1.bf16.msra.mxu1 %v9235_v39  ;;  %v9300_v18 = vcombine.high %v1019_v12, %v1023_v14  ;;  %v1026_v39 = vld [vmem:[#allocation5 + $0x1dd0] sm:$0xff] }
 0x409   :  { %7264 = vmatprep.subr.bf16.mxu0 %v9242_v19  ;;  %7592 = vmatprep.subr.bf16.mxu1 %v9244_v51  ;;  %v1030_v19 = vld [vmem:[#allocation5 + $0x1df0] sm:$0xff]  ;;  %v1027_v51 = vld [vmem:[#allocation5 + $0x1dd8] sm:$0xff] }
 0x40a   :  { %v9306_v26 = vcombine.high %v1026_v39, %v1030_v19  ;;  %v9305_v31 = vcombine.low %v1026_v39, %v1030_v19  ;;  %v9307_v62 = vcombine.low %v1027_v51, %v1031_v21  ;;  %v1087_v39 = vld [vmem:[#allocation5 + $0x1fb8] sm:$0xff] }
 0x40c   :  { %7265 = vmatpush1.bf16.msra.mxu0 %v9241_v27  ;;  %7593 = vmatpush1.bf16.msra.mxu1 %v9243_v22  ;;  %v9308_v27 = vcombine.high %v1027_v51, %v1031_v21  ;;  %v1034_v22 = vld [vmem:[#allocation5 + $0x1e10] sm:$0xff] }
 0x40d   :  { %7275 = vmatprep.subr.bf16.mxu0 %v9250_v59  ;;  %7603 = vmatprep.subr.bf16.mxu1 %v9252_v49  ;;  %v1038_v59 = vld [vmem:[#allocation5 + $0x1e30] sm:$0xff]  ;;  %v1035_v49 = vld [vmem:[#allocation5 + $0x1e18] sm:$0xff] }
 0x40e   :  { %v9314_v32 = vcombine.high %v1034_v22, %v1038_v59  ;;  %v9313_v38 = vcombine.low %v1034_v22, %v1038_v59  ;;  %v1095_v22 = vld [vmem:[#allocation5 + $0x1ff8] sm:$0xff] }
 0x40f   :  { %7267 = vmatmul.mubr.bf16.vlgmr.msra.gmra.mrb[4].mxu0 %v10023_v50  ;;  %7595 = vmatmul.mubr.bf16.vlgmr.msra.gmra.mrb[4].mxu1 %v10023_v50  ;;  %v9267_v50 = vcombine.low %v987_v33, %v991_v40  ;;  %v9315_v33 = vcombine.low %v1035_v49, %v1039_v30 }
 0x410   :  { %7276 = vmatpush1.bf16.msra.mxu0 %v9249_v63  ;;  %7604 = vmatpush1.bf16.msra.mxu1 %v9251_v34  ;;  %v9316_v63 = vcombine.high %v1035_v49, %v1039_v30  ;;  %v1042_v34 = vld [vmem:[#allocation5 + $0x1e50] sm:$0xff] }
 0x411   :  { %7277 = vmatprep.subr.bf16.mxu0 %v9258_v35  ;;  %7605 = vmatprep.subr.bf16.mxu1 %v9260_v13  ;;  %v1046_v35 = vld [vmem:[#allocation5 + $0x1e70] sm:$0xff]  ;;  %v1043_v13 = vld [vmem:[#allocation5 + $0x1e58] sm:$0xff] }
 0x412   :  { %7307 = vmatprep.mubr.bf16.mxu0 %v10027_v1  ;;  %7635 = vmatprep.mubr.bf16.mxu1 %v10027_v1  ;;  %v9284_v1 = vcombine.high %v1003_v37, %v1007_v28  ;;  %v9322_v40 = vcombine.high %v1042_v34, %v1046_v35  ;;  %v9321_v24 = vcombine.low %v1042_v34, %v1046_v35  ;;  %v9651_v34 = vld [vmem:[#allocation7 + $0xc0] sm:$0xff]  }
 0x413   :  { %v9323_v47 = vcombine.low %v1043_v13, %v1047_v36  ;;  %v9652_v35 = vld [vmem:[#allocation7] sm:$0xff]  }
 0x414   :  { %7278 = vmatpush1.bf16.msra.mxu0 %v9257_v41  ;;  %7606 = vmatpush1.bf16.msra.mxu1 %v9259_v42  ;;  %v9324_v41 = vcombine.high %v1043_v13, %v1047_v36  ;;  %v1050_v42 = vld [vmem:[#allocation5 + $0x1e90] sm:$0xff]  ;;  %v9653_v13 = vld [vmem:[#allocation7 + $0x80] sm:$0xff]   ;;  %v9654_v36 = vld [vmem:[#allocation7 + $0x48] sm:$0xff]  }
 0x415   :  { %7279 = vmatprep.subr.bf16.mxu0 %v9266_v43  ;;  %7607 = vmatprep.subr.bf16.mxu1 %v9268_v45  ;;  %v1054_v43 = vld [vmem:[#allocation5 + $0x1eb0] sm:$0xff]  ;;  %v1051_v45 = vld [vmem:[#allocation5 + $0x1e98] sm:$0xff] }
 0x416   :  { %v9330_v48 = vcombine.high %v1050_v42, %v1054_v43  ;;  %v9329_v11 = vcombine.low %v1050_v42, %v1054_v43  ;;  %v9331_v37 = vcombine.low %v1051_v45, %v1055_v46  ;;  %v9657_v42 = vld [vmem:[#allocation7 + $0x88] sm:$0xff]   ;;  %v9658_v43 = vld [vmem:[#allocation7 + $0x50] sm:$0xff]  }
 0x418   :  { %7280 = vmatpush1.bf16.msra.mxu0 %v9265_v52  ;;  %7608 = vmatpush1.bf16.msra.mxu1 %v9267_v50  ;;  %v9332_v52 = vcombine.high %v1051_v45, %v1055_v46  ;;  %v1058_v50 = vld [vmem:[#allocation5 + $0x1ed0] sm:$0xff] }
 0x419   :  { %7281 = vmatprep.subr.bf16.mxu0 %v9274_v54  ;;  %7609 = vmatprep.subr.bf16.mxu1 %v9276_v56  ;;  %v1062_v54 = vld [vmem:[#allocation5 + $0x1ef0] sm:$0xff]  ;;  %v1059_v56 = vld [vmem:[#allocation5 + $0x1ed8] sm:$0xff] }
 0x41a   :  { %v9338_v28 = vcombine.high %v1058_v50, %v1062_v54  ;;  %v9337_v4 = vcombine.low %v1058_v50, %v1062_v54  ;;  %v9339_v5 = vcombine.low %v1059_v56, %v1063_v60  ;;  %v9659_v45 = vld [vmem:[#allocation7 + $0xd0] sm:$0xff]   ;;  %v9668_v50 = vld [vmem:[#allocation7 + $0x20] sm:$0xff]  }
 0x41b   :  { %v9661_v46 = vld [vmem:[#allocation7 + $0x90] sm:$0xff]   ;;  %v9669_v54 = vld [vmem:[#allocation7 + $0xa0] sm:$0xff]  }
 0x41c   :  { %7282 = vmatpush1.bf16.msra.mxu0 %v9273_v53  ;;  %7610 = vmatpush1.bf16.msra.mxu1 %v9275_v2  ;;  %v9340_v53 = vcombine.high %v1059_v56, %v1063_v60  ;;  %v1066_v2 = vld [vmem:[#allocation5 + $0x1f10] sm:$0xff]  ;;  %v9670_v56 = vld [vmem:[#allocation7 + $0x68] sm:$0xff]  }
 0x41d   :  { %7283 = vmatprep.subr.bf16.mxu0 %v9282_v3  ;;  %7611 = vmatprep.subr.bf16.mxu1 %v9284_v1  ;;  %v1070_v3 = vld [vmem:[#allocation5 + $0x1f30] sm:$0xff]  ;;  %v1067_v1 = vld [vmem:[#allocation5 + $0x1f18] sm:$0xff]  ;;  %v9671_v60 = vld [vmem:[#allocation7 + $0xe8] sm:$0xff]  }
 0x41e   :  { %v9346_v55 = vcombine.high %v1066_v2, %v1070_v3  ;;  %v9345_v10 = vcombine.low %v1066_v2, %v1070_v3  ;;  %v9347_v12 = vcombine.low %v1067_v1, %v1071_v9  ;;  %v9676_v2 = vld [vmem:[#allocation7 + $0x30] sm:$0xff]  }
 0x41f   :  { %v9677_v3 = vld [vmem:[#allocation7 + $0xb0] sm:$0xff]  }
 0x420   :  { %7284 = vmatpush1.bf16.msra.mxu0 %v9281_v20  ;;  %7612 = vmatpush1.bf16.msra.mxu1 %v9283_v44  ;;  %v9348_v20 = vcombine.high %v1067_v1, %v1071_v9  ;;  %v1074_v44 = vld [vmem:[#allocation5 + $0x1f50] sm:$0xff]  ;;  %v9678_v1 = vld [vmem:[#allocation7 + $0x78] sm:$0xff]  }
 0x421   :  { %7285 = vmatprep.subr.bf16.mxu0 %v9290_v6  ;;  %7613 = vmatprep.subr.bf16.mxu1 %v9292_v7  ;;  %v1078_v6 = vld [vmem:[#allocation5 + $0x1f70] sm:$0xff]  ;;  %v1075_v7 = vld [vmem:[#allocation5 + $0x1f58] sm:$0xff] }
 0x422   :  { %v9354_v14 = vcombine.high %v1074_v44, %v1078_v6  ;;  %v9353_v19 = vcombine.low %v1074_v44, %v1078_v6  ;;  %v9355_v51 = vcombine.low %v1075_v7, %v1079_v8  ;;  %v9679_v9 = vld [vmem:[#allocation7 + $0xf8] sm:$0xff]   ;;  %v9684_v44 = vld [vmem:[#allocation7 + $0x100] sm:$0xff]   ;;  %v7644_v6 = vpack.c.bf16 %v10053_v0, %v10053_v0  ;;  %v9692_v0 = vld [vmem:[#allocation7 + $0x110] sm:$0xff]  }
 0x424   :  { %7286 = vmatpush1.bf16.msra.mxu0 %v9289_v15  ;;  %7614 = vmatpush1.bf16.msra.mxu1 %v9291_v16  ;;  %v9356_v15 = vcombine.high %v1075_v7, %v1079_v8  ;;  %v1082_v16 = vld [vmem:[#allocation5 + $0x1f90] sm:$0xff]  ;;  %v9685_v7 = vld [vmem:[#allocation7 + $0x180] sm:$0xff]   ;;  %v9686_v8 = vld [vmem:[#allocation7 + $0x148] sm:$0xff]  }
 0x425   :  { %7287 = vmatprep.subr.bf16.mxu0 %v9298_v17  ;;  %7615 = vmatprep.subr.bf16.mxu1 %v9300_v18  ;;  %v1086_v17 = vld [vmem:[#allocation5 + $0x1fb0] sm:$0xff]  ;;  %v1083_v18 = vld [vmem:[#allocation5 + $0x1f98] sm:$0xff] }
 0x426   :  { %v9362_v21 = vcombine.high %v1082_v16, %v1086_v17  ;;  %v9361_v59 = vcombine.low %v1082_v16, %v1086_v17  ;;  %v9363_v49 = vcombine.low %v1083_v18, %v1087_v39  ;;  %v9690_v16 = vld [vmem:[#allocation7 + $0x150] sm:$0xff]  }
 0x427   :  { %v9691_v17 = vld [vmem:[#allocation7 + $0x1d0] sm:$0xff]  }
 0x428   :  { %7288 = vmatpush1.bf16.msra.mxu0 %v9297_v23  ;;  %7616 = vmatpush1.bf16.msra.mxu1 %v9299_v25  ;;  %v9364_v23 = vcombine.high %v1083_v18, %v1087_v39  ;;  %v1090_v25 = vld [vmem:[#allocation5 + $0x1fd0] sm:$0xff]  ;;  %v9694_v39 = vld [vmem:[#allocation7 + $0x158] sm:$0xff]  }
 0x429   :  { %7289 = vmatprep.subr.bf16.mxu0 %v9306_v26  ;;  %7617 = vmatprep.subr.bf16.mxu1 %v9308_v27  ;;  %v1094_v26 = vld [vmem:[#allocation5 + $0x1ff0] sm:$0xff]  ;;  %v1091_v27 = vld [vmem:[#allocation5 + $0x1fd8] sm:$0xff] }
 0x42a   :  { %v9370_v30 = vcombine.high %v1090_v25, %v1094_v26  ;;  %v9693_v18 = vld [vmem:[#allocation7 + $0x190] sm:$0xff]  }
 0x42c   :  { %7290 = vmatpush1.bf16.msra.mxu0 %v9305_v31  ;;  %7618 = vmatpush1.bf16.msra.mxu1 %v9307_v62  ;;  %v9372_v31 = vcombine.high %v1091_v27, %v1095_v22  ;;  %v9369_v62 = vcombine.low %v1090_v25, %v1094_v26  ;;  %v9700_v25 = vld [vmem:[#allocation7 + $0x120] sm:$0xff]  }
 0x42d   :  { %7291 = vmatprep.subr.bf16.mxu0 %v9314_v32  ;;  %7619 = vmatprep.subr.bf16.mxu1 %v9316_v63  ;;  %v9371_v32 = vcombine.low %v1091_v27, %v1095_v22  ;;  %v9650_v63 = vld [vmem:[#allocation7 + $0x40] sm:$0xff]   ;;  %v9702_v27 = vld [vmem:[#allocation7 + $0x168] sm:$0xff]  }
 0x42e   :  { %v9701_v26 = vld [vmem:[#allocation7 + $0x1a0] sm:$0xff]   ;;  %v9703_v22 = vld [vmem:[#allocation7 + $0x1e8] sm:$0xff]  }
 0x430   :  { %7292 = vmatpush1.bf16.msra.mxu0 %v9313_v38  ;;  %7620 = vmatpush1.bf16.msra.mxu1 %v9315_v33  ;;  %v7645_v38 = vpack.c.bf16 %v10057_v58, %v10057_v58  ;;  %v9655_v33 = vld [vmem:[#allocation7 + $0xc8] sm:$0xff]   ;;  %v9660_v58 = vld [vmem:[#allocation7 + $0x10] sm:$0xff]  }
 0x431   :  { %7293 = vmatprep.subr.bf16.mxu0 %v9322_v40  ;;  %7621 = vmatprep.subr.bf16.mxu1 %v9324_v41  ;;  %v7647_v40 = vpack.c.bf16 %v10059_v61, %v10059_v61  ;;  %v9656_v41 = vld [vmem:[#allocation7 + $0x8] sm:$0xff]   ;;  %v9663_v61 = vld [vmem:[#allocation7 + $0xd8] sm:$0xff]  }
 0x434   :  { %7294 = vmatpush1.bf16.msra.mxu0 %v9321_v24  ;;  %7622 = vmatpush1.bf16.msra.mxu1 %v9323_v47  ;;  %v9662_v24 = vld [vmem:[#allocation7 + $0x58] sm:$0xff]  }
 0x435   :  { %7295 = vmatprep.subr.bf16.mxu0 %v9330_v48  ;;  %7623 = vmatprep.subr.bf16.mxu1 %v9332_v52  ;;  %v9665_v47 = vld [vmem:[#allocation7 + $0x98] sm:$0xff]   ;;  %v9666_v48 = vld [vmem:[#allocation7 + $0x60] sm:$0xff]  }
 0x436   :  { %v9667_v52 = vld [vmem:[#allocation7 + $0xe0] sm:$0xff]  }
 0x438   :  { %7296 = vmatpush1.bf16.msra.mxu0 %v9329_v11  ;;  %7624 = vmatpush1.bf16.msra.mxu1 %v9331_v37  ;;  %v9672_v11 = vld [vmem:[#allocation7 + $0x28] sm:$0xff]  }
 0x439   :  { %7297 = vmatprep.subr.bf16.mxu0 %v9338_v28  ;;  %7625 = vmatprep.subr.bf16.mxu1 %v9340_v53  ;;  %v9673_v37 = vld [vmem:[#allocation7 + $0xa8] sm:$0xff]   ;;  %v9674_v28 = vld [vmem:[#allocation7 + $0x70] sm:$0xff]  }
 0x43a   :  { %v9675_v53 = vld [vmem:[#allocation7 + $0xf0] sm:$0xff]  }
 0x43c   :  { %7298 = vmatpush1.bf16.msra.mxu0 %v9337_v4  ;;  %7626 = vmatpush1.bf16.msra.mxu1 %v9339_v5  ;;  %v9680_v4 = vld [vmem:[#allocation7 + $0x38] sm:$0xff]  }
 0x43d   :  { %7299 = vmatprep.subr.bf16.mxu0 %v9346_v55  ;;  %7627 = vmatprep.subr.bf16.mxu1 %v9348_v20  ;;  %v9681_v5 = vld [vmem:[#allocation7 + $0xb8] sm:$0xff]   ;;  %v9682_v55 = vld [vmem:[#allocation7 + $0x140] sm:$0xff]  }
 0x43e   :  { %v9683_v20 = vld [vmem:[#allocation7 + $0x1c0] sm:$0xff]  }
 0x440   :  { %7300 = vmatpush1.bf16.msra.mxu0 %v9345_v10  ;;  %7628 = vmatpush1.bf16.msra.mxu1 %v9347_v12  ;;  %v7646_v10 = vpack.c.bf16 %v10055_v57, %v10055_v57  ;;  %v9687_v12 = vld [vmem:[#allocation7 + $0x1c8] sm:$0xff]   ;;  %v9695_v57 = vld [vmem:[#allocation7 + $0x1d8] sm:$0xff]  }
 0x441   :  { %7301 = vmatprep.subr.bf16.mxu0 %v9354_v14  ;;  %7629 = vmatprep.subr.bf16.mxu1 %v9356_v15  ;;  %v9688_v14 = vld [vmem:[#allocation7 + $0x108] sm:$0xff]  }
 0x442   :  { %v9689_v15 = vld [vmem:[#allocation7 + $0x188] sm:$0xff]  }
 0x444   :  { %7302 = vmatpush1.bf16.msra.mxu0 %v9353_v19  ;;  %7630 = vmatpush1.bf16.msra.mxu1 %v9355_v51  ;;  %v9696_v19 = vld [vmem:[#allocation7 + $0x118] sm:$0xff]  }
 0x445   :  { %7303 = vmatprep.subr.bf16.mxu0 %v9362_v21  ;;  %7631 = vmatprep.subr.bf16.mxu1 %v9364_v23  ;;  %v9697_v51 = vld [vmem:[#allocation7 + $0x198] sm:$0xff]   ;;  %v9698_v21 = vld [vmem:[#allocation7 + $0x160] sm:$0xff]  }
 0x446   :  { %v9699_v23 = vld [vmem:[#allocation7 + $0x1e0] sm:$0xff]  }
 0x448   :  { %7304 = vmatpush1.bf16.msra.mxu0 %v9361_v59  ;;  %7632 = vmatpush1.bf16.msra.mxu1 %v9363_v49  ;;  %v9704_v59 = vld [vmem:[#allocation7 + $0x128] sm:$0xff]  }
 0x449   :  { %7305 = vmatprep.subr.bf16.mxu0 %v9370_v30  ;;  %7633 = vmatprep.subr.bf16.mxu1 %v9372_v31  ;;  %v9705_v49 = vld [vmem:[#allocation7 + $0x1a8] sm:$0xff]   ;;  %v9706_v30 = vld [vmem:[#allocation7 + $0x170] sm:$0xff]  }
 0x44a   :  { %v9707_v31 = vld [vmem:[#allocation7 + $0x1f0] sm:$0xff]  }
 0x44c   :  { %7306 = vmatpush1.bf16.msra.mxu0 %v9369_v62  ;;  %7634 = vmatpush1.bf16.msra.mxu1 %v9371_v32  ;;  %v9708_v62 = vld [vmem:[#allocation7 + $0x130] sm:$0xff]  }
 0x44d   :  { %9438 = vmatprep.subr.bf16.mxu0 %v9650_v63  ;;  %9460 = vmatprep.subr.bf16.mxu1 %v9651_v34  ;;  %v9709_v32 = vld [vmem:[#allocation7 + $0x1b0] sm:$0xff]   ;;  %v9710_v63 = vld [vmem:[#allocation7 + $0x178] sm:$0xff]  }
 0x44e   :  { %v9711_v34 = vld [vmem:[#allocation7 + $0x1f8] sm:$0xff]  }
 0x44f   :  { %7308 = vmatmul.mubr.bf16.vlgmr.msra.gmra.mrb[4].mxu0 %v10035_v29  ;;  %7636 = vmatmul.mubr.bf16.vlgmr.msra.gmra.mrb[4].mxu1 %v10035_v29  ;;  %v9664_v29 = vld [vmem:[#allocation7 + $0x18] sm:$0xff]  }
 0x450   :  { %9439 = vmatpush3.bf16.msra.mxu0 %v9652_v35  ;;  %8203 = vmatprep.mubr.bf16.mxu0 %v7645_v38  ;;  %v9712_v35 = vld [vmem:[#allocation7 + $0x138] sm:$0xff]  }
 0x451   :  { %9461 = vmatpush3.bf16.msra.mxu1 %v9653_v13  ;;  %8243 = vmatprep.mubr.bf16.mxu1 %v7647_v40  ;;  %v9713_v13 = vld [vmem:[#allocation7 + $0x1b8] sm:$0xff]  }
 0x452   :  { %9440 = vmatprep.subr.bf16.mxu0 %v9654_v36  ;;  %9462 = vmatprep.subr.bf16.mxu1 %v9655_v33 }
 0x454   :  { %9441 = vmatpush3.bf16.msra.mxu0 %v9656_v41 }
 0x455   :  { %9463 = vmatpush3.bf16.msra.mxu1 %v9657_v42  ;;  %9442 = vmatprep.subr.bf16.mxu0 %v9658_v43 }
 0x456   :  { %9464 = vmatprep.subr.bf16.mxu1 %v9659_v45 }
 0x458   :  { %9443 = vmatpush3.bf16.msra.mxu0 %v9660_v58 }
 0x459   :  { %9465 = vmatpush3.bf16.msra.mxu1 %v9661_v46  ;;  %9444 = vmatprep.subr.bf16.mxu0 %v9662_v24 }
 0x45a   :  { %9466 = vmatprep.subr.bf16.mxu1 %v9663_v61 }
 0x45c   :  { %9445 = vmatpush3.bf16.msra.mxu0 %v9664_v29 }
 0x45d   :  { %9467 = vmatpush3.bf16.msra.mxu1 %v9665_v47  ;;  %9446 = vmatprep.subr.bf16.mxu0 %v9666_v48  ;;  %v9373_v48 = vld [vmem:[#allocation8] ss:$0 sm:$0xff] }
 0x45e   :  { %9468 = vmatprep.subr.bf16.mxu1 %v9667_v52 }
 0x460   :  { %9447 = vmatpush3.bf16.msra.mxu0 %v9668_v50 }
 0x461   :  { %9469 = vmatpush3.bf16.msra.mxu1 %v9669_v54  ;;  %9448 = vmatprep.subr.bf16.mxu0 %v9670_v56 }
 0x462   :  { %9470 = vmatprep.subr.bf16.mxu1 %v9671_v60 }
 0x464   :  { %9449 = vmatpush3.bf16.msra.mxu0 %v9672_v11 }
 0x465   :  { %9471 = vmatpush3.bf16.msra.mxu1 %v9673_v37  ;;  %9450 = vmatprep.subr.bf16.mxu0 %v9674_v28 }
 0x466   :  { %9472 = vmatprep.subr.bf16.mxu1 %v9675_v53 }
 0x468   :  { %9451 = vmatpush3.bf16.msra.mxu0 %v9676_v2 }
 0x469   :  { %9473 = vmatpush3.bf16.msra.mxu1 %v9677_v3  ;;  %9452 = vmatprep.subr.bf16.mxu0 %v9678_v1 }
 0x46a   :  { %9474 = vmatprep.subr.bf16.mxu1 %v9679_v9 }
 0x46c   :  { %9453 = vmatpush3.bf16.msra.mxu0 %v9680_v4 }
 0x46d   :  { %9475 = vmatpush3.bf16.msra.mxu1 %v9681_v5  ;;  %9482 = vmatprep.subr.bf16.mxu0 %v9682_v55 }
 0x46e   :  { %9504 = vmatprep.subr.bf16.mxu1 %v9683_v20 }
 0x46f   :  { %8204 = vmatmul.mubr.bf16.vlgmr.msra.gmra.mrb[8].mxu0 %v7644_v6 }
 0x470   :  { %8244 = vmatmul.mubr.bf16.vlgmr.msra.gmra.mrb[8].mxu1 %v7646_v10  ;;  %9483 = vmatpush3.bf16.msra.mxu0 %v9684_v44 }
 0x471   :  { %9505 = vmatpush3.bf16.msra.mxu1 %v9685_v7  ;;  %9484 = vmatprep.subr.bf16.mxu0 %v9686_v8 }
 0x472   :  { %9506 = vmatprep.subr.bf16.mxu1 %v9687_v12 }
 0x474   :  { %9485 = vmatpush3.bf16.msra.mxu0 %v9688_v14 }
 0x475   :  { %9507 = vmatpush3.bf16.msra.mxu1 %v9689_v15  ;;  %9486 = vmatprep.subr.bf16.mxu0 %v9690_v16 }
 0x476   :  { %9508 = vmatprep.subr.bf16.mxu1 %v9691_v17 }
 0x478   :  { %9487 = vmatpush3.bf16.msra.mxu0 %v9692_v0 }
 0x479   :  { %9509 = vmatpush3.bf16.msra.mxu1 %v9693_v18  ;;  %9488 = vmatprep.subr.bf16.mxu0 %v9694_v39 }
 0x47a   :  { %9510 = vmatprep.subr.bf16.mxu1 %v9695_v57 }
 0x47c   :  { %9489 = vmatpush3.bf16.msra.mxu0 %v9696_v19 }
 0x47d   :  { %9511 = vmatpush3.bf16.msra.mxu1 %v9697_v51  ;;  %9490 = vmatprep.subr.bf16.mxu0 %v9698_v21 }
 0x47e   :  { %9512 = vmatprep.subr.bf16.mxu1 %v9699_v23 }
 0x480   :  { %9491 = vmatpush3.bf16.msra.mxu0 %v9700_v25 }
 0x481   :  { %9513 = vmatpush3.bf16.msra.mxu1 %v9701_v26  ;;  %9492 = vmatprep.subr.bf16.mxu0 %v9702_v27 }
 0x482   :  { %9514 = vmatprep.subr.bf16.mxu1 %v9703_v22 }
 0x484   :  { %9493 = vmatpush3.bf16.msra.mxu0 %v9704_v59 }
 0x485   :  { %9515 = vmatpush3.bf16.msra.mxu1 %v9705_v49  ;;  %9494 = vmatprep.subr.bf16.mxu0 %v9706_v30 }
 0x486   :  { %9516 = vmatprep.subr.bf16.mxu1 %v9707_v31 }
 0x488   :  { %9495 = vmatpush3.bf16.msra.mxu0 %v9708_v62 }
 0x489   :  { %9517 = vmatpush3.bf16.msra.mxu1 %v9709_v32  ;;  %9496 = vmatprep.subr.bf16.mxu0 %v9710_v63 }
 0x48a   :  { %9518 = vmatprep.subr.bf16.mxu1 %v9711_v34 }
 0x48c   :  { %9497 = vmatpush3.bf16.msra.mxu0 %v9712_v35 }
 0x48d   :  { %9519 = vmatpush3.bf16.msra.mxu1 %v9713_v13 }
 0x522   :  { %v7309_v36 = vpop.f32.mrb[4].mxu0  ;;  %v7637_v38 = vpop.f32.mrb[4].mxu1 }
 0x523   :  { %v7311_v33 = vpop.f32.mrb[5].mxu0  ;;  %v7639_v41 = vpop.f32.mrb[5].mxu1  ;;  %v7648_v43 = vpack.c.bf16 %v7309_v36, %v7309_v36  ;;  %v7650_v24 = vpack.c.bf16 %v7637_v38, %v7637_v38 }
 0x524   :  { %v7649_v40 = vpack.c.bf16 %v7311_v33, %v7311_v33  ;;  %v7313_v42 = vpop.f32.mrb[6].mxu0  ;;  %v7651_v45 = vpack.c.bf16 %v7639_v41, %v7639_v41  ;;  %v7641_v58 = vpop.f32.mrb[6].mxu1 }
 0x525   :  { %v7314_v46 = vpop.f32.mrb[7].mxu0  ;;  %v7642_v61 = vpop.f32.mrb[7].mxu1 }
 0x526   :  { %8283 = vmatprep.mubr.bf16.mxu0 %v7649_v40  ;;  %8323 = vmatprep.mubr.bf16.mxu1 %v7651_v45 }
 0x527   :  { %8284 = vmatmul.mubr.bf16.vlgmr.msra.gmra.mrb[12].mxu0 %v7648_v43  ;;  %8324 = vmatmul.mubr.bf16.vlgmr.msra.gmra.mrb[12].mxu1 %v7650_v24 }
 0x542   :  { %v9454_v29 = vpop.f32.mrb[8].mxu0 }
 0x543   :  { %v9476_v47 = vpop.f32.mrb[8].mxu1  ;;  %v9455_v52 = vpop.f32.mrb[9].mxu0 }
 0x544   :  { %v9456_v50 = vadd.f32 %v9455_v52, %v9454_v29  ;;  %v9477_v54 = vpop.f32.mrb[9].mxu1  ;;  %v9457_v56 = vpop.f32.mrb[10].mxu0 }
 0x545   :  { %v9478_v60 = vadd.f32 %v9477_v54, %v9476_v47  ;;  %v9479_v11 = vpop.f32.mrb[10].mxu1  ;;  %v9458_v37 = vpop.f32.mrb[11].mxu0 }
 0x546   :  { %v8206_v28 = vadd.f32 %v9456_v50, %v9373_v48  ;;  %v9480_v53 = vpop.f32.mrb[11].mxu1 }
 0x548   :  { %v8246_v2 = vadd.f32 %v9478_v60, %v8206_v28 }
 0x5fa   :  { %v9498_v3 = vpop.f32.mrb[12].mxu0  ;;  %v9520_v1 = vpop.f32.mrb[12].mxu1 }
 0x5fb   :  { %v9499_v9 = vpop.f32.mrb[13].mxu0  ;;  %v9521_v5 = vpop.f32.mrb[13].mxu1 }
 0x5fc   :  { %v9500_v4 = vadd.f32 %v9499_v9, %v9498_v3  ;;  %v9501_v55 = vpop.f32.mrb[14].mxu0  ;;  %v9522_v20 = vadd.f32 %v9521_v5, %v9520_v1  ;;  %v9523_v44 = vpop.f32.mrb[14].mxu1 }
 0x5fd   :  { %v9502_v6 = vpop.f32.mrb[15].mxu0  ;;  %v9524_v8 = vpop.f32.mrb[15].mxu1 }
 0x5fe   :  { %v8286_v7 = vadd.f32 %v9500_v4, %v8246_v2 }
 0x600   :  { %v8326_v10 = vadd.f32 %v9522_v20, %v8286_v7 }
 0x602   :  { %8331 = vst [vmem:[#allocation10] sm:$0x3] %v8326_v10 }
 0x603   :  { %9813 = shalt.err (!%p9810_p8)
}
 0x604   :  { %s9814_s16 = scalar_lea.hbm %s10103_s4, 32 }
 0x605   :  { %p9815_p9 = scmp.ne.s32.totalorder %s10103_s4, %s9814_s16  ;;  %p9818_p10 = scmp.lt.u32.totalorder %s9814_s16, %s10103_s4 }
 0x607   :  { %p9820_p11 = pnand %p9818_p10, %p9815_p9 }
 0x609   :  { %9823 = shalt.err (!%p9820_p11)
}
 0x60a   :  { %8341 = dma.vmem_to_hbm [thread:$0]  %s8339_s13, 32, %s10103_s4, [#allocation4]  }
 0x60b   :  { %9830 = dma.done.wait [#allocation4], 32  }
 0x60c   :  { %9831 = vsyncadd [#allocation4], 4294967264 }
 0x60d   :  { %8345 = vsyncpa [#allocation3], 1 }
 0x60e   :  { %8346 = vsyncpa [#allocation6], 1 }
 0x60f   :  { %8347 = vsyncpa [#allocation9], 1 }
 0x610   :  { %8348 = vsyncpa [#allocation4], 1 }

</bundles_post_ra>
